<compile_context>
chip_gen: v6e
topology: v6e:2x2x1
jax: 0.10.0
libtpu: 0.0.40
codegen_flags: <defaults>
</compile_context>

<pallas_src>
import numpy as np
import jax
import jax.numpy as jnp
from jax import lax
from jax.experimental import pallas as pl
from jax.experimental.pallas import tpu as pltpu


# ----------------------------- cell math (pure-JAX reference) ----------------

def lstm_cell_math(x, h, c, wih_t, whh_t, b, H):
    """PyTorch LSTM cell, gate order [i, f, g, o]; weights pre-transposed."""
    gates = (jnp.dot(x, wih_t, preferred_element_type=jnp.float32)
             + jnp.dot(h, whh_t, preferred_element_type=jnp.float32) + b)
    i = jax.nn.sigmoid(gates[:, 0 * H:1 * H])
    f = jax.nn.sigmoid(gates[:, 1 * H:2 * H])
    g = jnp.tanh(gates[:, 2 * H:3 * H])
    o = jax.nn.sigmoid(gates[:, 3 * H:4 * H])
    c_new = f * c + i * g
    h_new = o * jnp.tanh(c_new)
    return h_new, c_new


def gru_cell_math(x, h, wih_t, whh_t, bih, bhh, H):
    """PyTorch GRU cell, gate order [r, z, n]; weights pre-transposed."""
    gi = jnp.dot(x, wih_t, preferred_element_type=jnp.float32) + bih
    gh = jnp.dot(h, whh_t, preferred_element_type=jnp.float32) + bhh
    r = jax.nn.sigmoid(gi[:, 0:H] + gh[:, 0:H])
    z = jax.nn.sigmoid(gi[:, H:2 * H] + gh[:, H:2 * H])
    n = jnp.tanh(gi[:, 2 * H:3 * H] + r * gh[:, 2 * H:3 * H])
    return (1.0 - z) * n + z * h


# ----------------------------- fused Pallas kernel ----------------------------

def fused_text_rnn_kernel(tok_ref, sel_ref, embw0_ref, b0_ref,
                          w_rec0_ref, g_bhh0_ref,
                          w_l1_ref, l_b1_ref,
                          w_g1_ref, g_bih1_ref, g_bhh1_ref,
                          fc_w_ref, fc_b_ref,
                          out_ref, pre_ref):
    """Embedding gather + 2-layer LSTM + 2-layer GRU + (len-1) select + fc.

    MXU pushes per timestep: 3 (layer-0 LSTM+GRU fused, LSTM-1 fused,
    GRU-1 fused) -- see the block-diagonal packing in pack_params.
    """
    TB = tok_ref.shape[1]            # T * BB tokens for this batch block
    BB = sel_ref.shape[0]            # batch-block rows
    T = TB // BB
    H = out_ref.shape[1]
    G = 4 * H                        # padded gate width (LSTM 4H, GRU 3H->4H)
    Vp = embw0_ref.shape[0]          # padded vocab size
    mxu_dt = w_rec0_ref.dtype        # bf16 (perf) or f32 (exactness check)

    # ---- prologue: one-hot gather of the precomputed (emb @ W0) table -------
    # one (TB, Vp) @ (Vp, 2G) push replaces 2*T tiny per-step input matmuls.
    tok = tok_ref[0]                                                   # (TB,1)
    onehot = (lax.broadcasted_iota(jnp.int32, (TB, Vp), 1)
              == tok).astype(jnp.float32)                              # (TB,Vp)
    pre_ref[...] = (jnp.dot(onehot, embw0_ref[...],
                            preferred_element_type=jnp.float32)
                    + b0_ref[...])                                     # (TB,2G)

    selidx = sel_ref[...]                                              # (BB,1)

    def lstm_update(gates, c):
        # packed gate order [i, f, o, g]: one sigmoid over 3H, one tanh over H
        sfo = jax.nn.sigmoid(gates[:, 0:3 * H])
        i, f, o = sfo[:, 0:H], sfo[:, H:2 * H], sfo[:, 2 * H:3 * H]
        g = jnp.tanh(gates[:, 3 * H:4 * H])
        c_new = f * c + i * g
        return o * jnp.tanh(c_new), c_new

    def gru_update(gi, gh, h):
        rz = jax.nn.sigmoid(gi[:, 0:2 * H] + gh[:, 0:2 * H])   # r|z together
        r, z = rz[:, 0:H], rz[:, H:2 * H]
        n = jnp.tanh(gi[:, 2 * H:3 * H] + r * gh[:, 2 * H:3 * H])
        return (1.0 - z) * n + z * h

    zeros = jnp.zeros((BB, H), jnp.float32)
    lh0 = lc0 = lh1 = lc1 = gh0 = gh1 = zeros
    feat_l = zeros
    feat_g = zeros

    # ---- statically unrolled recurrence: 3 h-dependent MXU pushes / step ----
    for t in range(T):
        # static, aligned re-reads from VMEM scratch (bounds live ranges)
        pre_l = pre_ref[t * BB:(t + 1) * BB, 0:G]          # (BB, G) f32
        pre_g = pre_ref[t * BB:(t + 1) * BB, G:2 * G]      # (BB, G) f32

        # --- layer 0: LSTM + GRU recurrences in ONE block-diagonal push ---
        h0 = jnp.concatenate([lh0, gh0], axis=1).astype(mxu_dt)       # (BB,2H)
        rec0 = jnp.dot(h0, w_rec0_ref[...],
                       preferred_element_type=jnp.float32)            # (BB,2G)
        lh0, lc0 = lstm_update(pre_l + rec0[:, 0:G], lc0)
        gh0 = gru_update(pre_g, rec0[:, G:2 * G] + g_bhh0_ref[...], gh0)

        # --- layer 1 LSTM: wih1/whh1 fused into one stacked push ---
        hl = jnp.concatenate([lh0, lh1], axis=1).astype(mxu_dt)       # (BB,2H)
        gates_l1 = (jnp.dot(hl, w_l1_ref[...],
                            preferred_element_type=jnp.float32)
                    + l_b1_ref[...])
        lh1, lc1 = lstm_update(gates_l1, lc1)

        # --- layer 1 GRU: wih1/whh1 fused into one block-diagonal push ---
        hg = jnp.concatenate([gh0, gh1], axis=1).astype(mxu_dt)       # (BB,2H)
        rec_g1 = jnp.dot(hg, w_g1_ref[...],
                         preferred_element_type=jnp.float32)          # (BB,2G)
        gh1 = gru_update(rec_g1[:, 0:G] + g_bih1_ref[...],
                         rec_g1[:, G:2 * G] + g_bhh1_ref[...], gh1)

        # --- accumulate output at t == length-1 (mask computed in-kernel) ---
        m = (selidx == t).astype(jnp.float32)               # (BB, 1)
        feat_l = feat_l + m * lh1
        feat_g = feat_g + m * gh1

    # ---- fc_output: Linear(2H -> H) as one fused push ----------------------
    feats = jnp.concatenate([feat_l, feat_g], axis=1).astype(fc_w_ref.dtype)
    out_ref[...] = (jnp.dot(feats, fc_w_ref[...],
                            preferred_element_type=jnp.float32)
                    + fc_b_ref[...])


# ----------------------------- parameters ------------------------------------

def init_params(key, V, E, H):
    """Logical (PyTorch-equivalent) parameters, pre-transposed for x @ W."""
    k = 1.0 / np.sqrt(H)
    keys = list(jax.random.split(key, 32))
    it = iter(keys)

    def u(shape):
        return jax.random.uniform(next(it), shape, jnp.float32, -k, k)

    p = {}
    p['emb'] = jax.random.normal(next(it), (V, E), jnp.float32)

    # LSTM layer 0 / 1 (PyTorch shapes: w_ih (4H,in), w_hh (4H,H), biases (4H,))
    w_ih, w_hh, b_ih, b_hh = u((4 * H, E)), u((4 * H, H)), u((4 * H,)), u((4 * H,))
    p['l_wih0'], p['l_whh0'] = w_ih.T, w_hh.T
    p['l_b0'] = (b_ih + b_hh).reshape(1, 4 * H)
    w_ih, w_hh, b_ih, b_hh = u((4 * H, H)), u((4 * H, H)), u((4 * H,)), u((4 * H,))
    p['l_wih1'], p['l_whh1'] = w_ih.T, w_hh.T
    p['l_b1'] = (b_ih + b_hh).reshape(1, 4 * H)

    # GRU layer 0 / 1 (w_ih (3H,in), w_hh (3H,H); biases kept separate for the
    # r * (W_hn h + b_hn) term)
    w_ih, w_hh, b_ih, b_hh = u((3 * H, E)), u((3 * H, H)), u((3 * H,)), u((3 * H,))
    p['g_wih0'], p['g_whh0'] = w_ih.T, w_hh.T
    p['g_bih0'], p['g_bhh0'] = b_ih.reshape(1, 3 * H), b_hh.reshape(1, 3 * H)
    w_ih, w_hh, b_ih, b_hh = u((3 * H, H)), u((3 * H, H)), u((3 * H,)), u((3 * H,))
    p['g_wih1'], p['g_whh1'] = w_ih.T, w_hh.T
    p['g_bih1'], p['g_bhh1'] = b_ih.reshape(1, 3 * H), b_hh.reshape(1, 3 * H)

    # fc_output (fc_arch 'B'): Linear(2H, H)
    fc_w, fc_b = u((H, 2 * H)), u((H,))
    p['fc_w'] = fc_w.T
    p['fc_b'] = fc_b.reshape(1, H)
    return p


def pack_params(p, V, E, H, mxu_dtype=jnp.bfloat16):
    """One-time packing for the kernel:
       * LSTM gate columns reordered [i,f,g,o] -> [i,f,o,g] (contiguous sigmoid).
       * GRU gate axis zero-padded 3H -> 4H (lane-dense 128).
       * emb @ W0 (both stacks' layer-0 input projections) precomputed.
       * Recurrent / layer-1 weights packed block-diagonally so each timestep
         needs only 3 MXU pushes; cast to `mxu_dtype` (bf16 for perf)."""
    Vp = ((V + 127) // 128) * 128
    G = 4 * H

    def reorder(w):  # columns [i,f,g,o] -> [i,f,o,g]
        return jnp.concatenate(
            [w[..., 0:2 * H], w[..., 3 * H:4 * H], w[..., 2 * H:3 * H]], axis=-1)

    def pad_gru(w):  # gate axis 3H -> 4H with zeros
        return jnp.concatenate(
            [w, jnp.zeros(w.shape[:-1] + (H,), w.dtype)], axis=-1)

    def blockdiag(a, b):
        top = jnp.concatenate([a, jnp.zeros((a.shape[0], b.shape[1]), a.dtype)], axis=1)
        bot = jnp.concatenate([jnp.zeros((b.shape[0], a.shape[1]), a.dtype), b], axis=1)
        return jnp.concatenate([top, bot], axis=0)

    emb_p = jnp.zeros((Vp, E), jnp.float32).at[:V].set(p['emb'])
    w0 = jnp.concatenate([reorder(p['l_wih0']), pad_gru(p['g_wih0'])], axis=1)  # (E,2G)

    kp = {}
    # Precomputed fused embedding-gather + layer-0 input projection table.
    # Kept f32 (off the per-step critical path; preserves `pre` precision).
    kp['emb_w0'] = jnp.dot(emb_p, w0, precision=lax.Precision.HIGHEST)  # (Vp,2G)
    kp['b0'] = jnp.concatenate([reorder(p['l_b0']), pad_gru(p['g_bih0'])], axis=1)

    # layer-0 recurrent weights (LSTM ++ GRU) as one block-diagonal (2H, 2G)
    kp['w_rec0'] = blockdiag(reorder(p['l_whh0']),
                             pad_gru(p['g_whh0'])).astype(mxu_dtype)
    kp['g_bhh0'] = pad_gru(p['g_bhh0'])

    # LSTM layer 1: vstack so [lh0|lh1] @ w_l1 does wih1 and whh1 together
    kp['w_l1'] = jnp.concatenate([reorder(p['l_wih1']),
                                  reorder(p['l_whh1'])], axis=0).astype(mxu_dtype)
    kp['l_b1'] = reorder(p['l_b1'])

    # GRU layer 1: block-diagonal so [gh0|gh1] @ w_g1 yields [gi1 | ghh1]
    kp['w_g1'] = blockdiag(pad_gru(p['g_wih1']),
                           pad_gru(p['g_whh1'])).astype(mxu_dtype)
    kp['g_bih1'] = pad_gru(p['g_bih1'])
    kp['g_bhh1'] = pad_gru(p['g_bhh1'])

    kp['fc_w'] = p['fc_w'].astype(mxu_dtype)
    kp['fc_b'] = p['fc_b']
    return kp


# ----------------------------- wrapper ----------------------------------------

def text_lstm_gru_forward(itexts, lengths, kp, H):
    """itexts: (T, Bp) int32 padded token ids (sequence-major, text-per-column).
       lengths: true lengths (list/array) for the first B columns."""
    T, Bp = itexts.shape
    B = len(lengths)
    G = 4 * H

    # Batch blocking: full batch per block at demo size; blocks of 128 rows for
    # large batches so the "parallel" grid axis can shard across v7x's 2 TCs.
    BB = Bp if Bp <= 128 else 128
    assert Bp % BB == 0
    nb = Bp // BB
    TB = T * BB

    # Tokens re-laid out so each batch block's (T*BB, 1) column is contiguous.
    tok = jnp.transpose(itexts.astype(jnp.int32).reshape(T, nb, BB),
                        (1, 0, 2)).reshape(nb, TB, 1)
    # Per-column select index (length-1); padded columns get -1 (never selected).
    lengths_arr = jnp.zeros((Bp,), jnp.int32).at[:B].set(
        jnp.asarray(lengths, jnp.int32))
    selidx = (lengths_arr - 1).reshape(Bp, 1)

    def full(a):  # whole-array block, same block for every grid step
        return pl.BlockSpec(a.shape, lambda b, _nd=a.ndim: (0,) * _nd)

    grid_spec = pltpu.PrefetchScalarGridSpec(
        num_scalar_prefetch=0,
        grid=(nb,),
        in_specs=[
            pl.BlockSpec((1, TB, 1), lambda b: (b, 0, 0)),   # tokens
            pl.BlockSpec((BB, 1), lambda b: (b, 0)),         # select index
            full(kp['emb_w0']), full(kp['b0']),
            full(kp['w_rec0']), full(kp['g_bhh0']),
            full(kp['w_l1']), full(kp['l_b1']),
            full(kp['w_g1']), full(kp['g_bih1']), full(kp['g_bhh1']),
            full(kp['fc_w']), full(kp['fc_b']),
        ],
        out_specs=pl.BlockSpec((BB, H), lambda b: (b, 0)),
        scratch_shapes=[pltpu.VMEM((TB, 2 * G), jnp.float32)],  # `pre` activations
    )

    out = pl.pallas_call(
        fused_text_rnn_kernel,
        out_shape=jax.ShapeDtypeStruct((Bp, H), jnp.float32),
        grid_spec=grid_spec,
        compiler_params=pltpu.CompilerParams(
            dimension_semantics=("parallel",)),
    )(tok, selidx, kp['emb_w0'], kp['b0'], kp['w_rec0'], kp['g_bhh0'],
      kp['w_l1'], kp['l_b1'], kp['w_g1'], kp['g_bih1'], kp['g_bhh1'],
      kp['fc_w'], kp['fc_b'])
    return out[:B]


# ----------------------------- pure-JAX reference -----------------------------

def reference_forward(itexts, lengths, p, H):
    emb = p['emb'][itexts]
    T, Bp, _ = emb.shape
    z = jnp.zeros((Bp, H), jnp.float32)
    lh0 = lc0 = lh1 = lc1 = gh0 = gh1 = z
    lstm_outs, gru_outs = [], []
    for t in range(T):
        x_t = emb[t]
        lh0, lc0 = lstm_cell_math(x_t, lh0, lc0, p['l_wih0'], p['l_whh0'], p['l_b0'], H)
        lh1, lc1 = lstm_cell_math(lh0, lh1, lc1, p['l_wih1'], p['l_whh1'], p['l_b1'], H)
        gh0 = gru_cell_math(x_t, gh0, p['g_wih0'], p['g_whh0'], p['g_bih0'], p['g_bhh0'], H)
        gh1 = gru_cell_math(gh0, gh1, p['g_wih1'], p['g_whh1'], p['g_bih1'], p['g_bhh1'], H)
        lstm_outs.append(lh1)
        gru_outs.append(gh1)
    lstm_out = jnp.stack(lstm_outs)
    gru_out = jnp.stack(gru_outs)
    idx = jnp.asarray(lengths, jnp.int32) - 1
    cols = jnp.arange(len(lengths))
    feats = jnp.concatenate([lstm_out[idx, cols], gru_out[idx, cols]], axis=-1)
    return jnp.dot(feats, p['fc_w']) + p['fc_b']


# ----------------------------- main --------------------------------------------

if __name__ == "__main__":
    V, E, H = 50, 32, 32          # vocab, word_embed_dim, hidden_dim
    lengths = [5, 8, 3, 6]        # 4 texts of varying length
    B, T, Bp = len(lengths), max(lengths), 8

    key = jax.random.PRNGKey(0)
    k_par, k_tok = jax.random.split(key)
    params = init_params(k_par, V, E, H)

    # Deterministic "encoded texts" (token ids >= 3 to skip special tokens).
    itexts = np.zeros((T, Bp), dtype=np.int32)
    for i, L in enumerate(lengths):
        k_tok, sub = jax.random.split(k_tok)
        itexts[:L, i] = np.asarray(jax.random.randint(sub, (L,), 3, V))
    itexts = jnp.asarray(itexts)

    ref = jax.block_until_ready(reference_forward(itexts, lengths, params, H))

    # 1) f32-weight variant: proves the fused block-diag structure is exact.
    kp_f32 = pack_params(params, V, E, H, mxu_dtype=jnp.float32)
    out_f32 = jax.block_until_ready(
        text_lstm_gru_forward(itexts, lengths, kp_f32, H))
    np.testing.assert_allclose(np.asarray(out_f32), np.asarray(ref),
                               rtol=2e-4, atol=2e-4)

    # 2) bf16-MXU-operand variant (the perf default). bf16 rounding compounds
    #    over the 8-step, 4-cell recurrence, so tolerance is loosened.
    kp_bf16 = pack_params(params, V, E, H, mxu_dtype=jnp.bfloat16)
    out_bf16 = jax.block_until_ready(
        text_lstm_gru_forward(itexts, lengths, kp_bf16, H))
    np.testing.assert_allclose(np.asarray(out_bf16), np.asarray(ref),
                               rtol=5e-2, atol=5e-2)

    print("KERNEL_OK")
</pallas_src>

<mosaic_0001>
module attributes {stable_mosaic.version = 11 : i64} {
  func.func @fused_text_rnn_kernel(%arg0: i32, %arg1: memref<1x64x1xi32, #tpu.memory_space<vmem>>, %arg2: memref<8x1xi32, #tpu.memory_space<vmem>>, %arg3: memref<128x256xf32, #tpu.memory_space<vmem>>, %arg4: memref<1x256xf32, #tpu.memory_space<vmem>>, %arg5: memref<64x256xf32, #tpu.memory_space<vmem>>, %arg6: memref<1x128xf32, #tpu.memory_space<vmem>>, %arg7: memref<64x128xf32, #tpu.memory_space<vmem>>, %arg8: memref<1x128xf32, #tpu.memory_space<vmem>>, %arg9: memref<64x256xf32, #tpu.memory_space<vmem>>, %arg10: memref<1x128xf32, #tpu.memory_space<vmem>>, %arg11: memref<1x128xf32, #tpu.memory_space<vmem>>, %arg12: memref<64x32xf32, #tpu.memory_space<vmem>>, %arg13: memref<1x32xf32, #tpu.memory_space<vmem>>, %arg14: memref<8x32xf32, #tpu.memory_space<vmem>>, %arg15: memref<64x256xf32, #tpu.memory_space<vmem>>) attributes {dimension_semantics = [#tpu.dimension_semantics<parallel>], iteration_bounds = array<i64: 1>, scalar_prefetch = 0 : i64, scratch_operands = 1 : i64, tpu.core_type = #tpu.core_type<tc>, window_params = [{transform_indices = @transform_0, window_bounds = array<i64: 1, 64, 1>}, {transform_indices = @transform_1, window_bounds = array<i64: 8, 1>}, {pipeline_mode = #tpu.pipeline_mode<synchronous>, transform_indices = @transform_2, window_bounds = array<i64: 128, 256>}, {pipeline_mode = #tpu.pipeline_mode<synchronous>, transform_indices = @transform_3, window_bounds = array<i64: 1, 256>}, {pipeline_mode = #tpu.pipeline_mode<synchronous>, transform_indices = @transform_4, window_bounds = array<i64: 64, 256>}, {pipeline_mode = #tpu.pipeline_mode<synchronous>, transform_indices = @transform_5, window_bounds = array<i64: 1, 128>}, {pipeline_mode = #tpu.pipeline_mode<synchronous>, transform_indices = @transform_6, window_bounds = array<i64: 64, 128>}, {pipeline_mode = #tpu.pipeline_mode<synchronous>, transform_indices = @transform_7, window_bounds = array<i64: 1, 128>}, {pipeline_mode = #tpu.pipeline_mode<synchronous>, transform_indices = @transform_8, window_bounds = array<i64: 64, 256>}, {pipeline_mode = #tpu.pipeline_mode<synchronous>, transform_indices = @transform_9, window_bounds = array<i64: 1, 128>}, {pipeline_mode = #tpu.pipeline_mode<synchronous>, transform_indices = @transform_10, window_bounds = array<i64: 1, 128>}, {pipeline_mode = #tpu.pipeline_mode<synchronous>, transform_indices = @transform_11, window_bounds = array<i64: 64, 32>}, {pipeline_mode = #tpu.pipeline_mode<synchronous>, transform_indices = @transform_12, window_bounds = array<i64: 1, 32>}, {transform_indices = @transform_13, window_bounds = array<i64: 8, 32>}]} {
    %c0 = arith.constant 0 : index
    %c0_0 = arith.constant 0 : index
    %c0_1 = arith.constant 0 : index
    %0 = vector.load %arg1[%c0, %c0_0, %c0_1] : memref<1x64x1xi32, #tpu.memory_space<vmem>>, vector<1x64x1xi32>
    %1 = vector.shape_cast %0 : vector<1x64x1xi32> to vector<64x1xi32>
    %2 = tpu.iota {dimensions = array<i32: 1>} : vector<64x128xi32>
    %3 = vector.broadcast %1 : vector<64x1xi32> to vector<64x128xi32>
    %4 = arith.cmpi eq, %2, %3 : vector<64x128xi32>
    %5 = arith.extui %4 : vector<64x128xi1> to vector<64x128xi32>
    %6 = arith.sitofp %5 : vector<64x128xi32> to vector<64x128xf32>
    %c0_2 = arith.constant 0 : index
    %c0_3 = arith.constant 0 : index
    %7 = vector.load %arg3[%c0_2, %c0_3] : memref<128x256xf32, #tpu.memory_space<vmem>>, vector<128x256xf32>
    %cst = arith.constant dense<0.000000e+00> : vector<64x256xf32>
    %8 = tpu.matmul %6, %7, %cst {dimension_numbers = #tpu.dot_dimension_numbers<[1], [0], [0], [1], [0, 0, 1, 1], [], []>} : vector<64x128xf32>, vector<128x256xf32>, vector<64x256xf32> -> vector<64x256xf32>
    %c0_4 = arith.constant 0 : index
    %c0_5 = arith.constant 0 : index
    %9 = vector.load %arg4[%c0_4, %c0_5] : memref<1x256xf32, #tpu.memory_space<vmem>>, vector<1x256xf32>
    %10 = vector.broadcast %9 : vector<1x256xf32> to vector<64x256xf32>
    %11 = arith.addf %8, %10 : vector<64x256xf32>
    %c0_6 = arith.constant 0 : index
    %c0_7 = arith.constant 0 : index
    %12 = vector.load %arg15[%c0_6, %c0_7] : memref<64x256xf32, #tpu.memory_space<vmem>>, vector<64x256xf32>
    tpu.vector_store %arg15[%c0_6, %c0_7], %11 {strides = array<i32>} : memref<64x256xf32, #tpu.memory_space<vmem>>, vector<64x256xf32>,
    %c0_8 = arith.constant 0 : index
    %c0_9 = arith.constant 0 : index
    %13 = vector.load %arg2[%c0_8, %c0_9] : memref<8x1xi32, #tpu.memory_space<vmem>>, vector<8x1xi32>
    %cst_10 = arith.constant 0.000000e+00 : f32
    %14 = vector.broadcast %cst_10 : f32 to vector<8x32xf32>
    %c0_11 = arith.constant 0 : index
    %c0_12 = arith.constant 0 : index
    %15 = vector.load %arg15[%c0_11, %c0_12] : memref<64x256xf32, #tpu.memory_space<vmem>>, vector<8x128xf32>
    %c0_13 = arith.constant 0 : index
    %c128 = arith.constant 128 : index
    %16 = vector.load %arg15[%c0_13, %c128] : memref<64x256xf32, #tpu.memory_space<vmem>>, vector<8x128xf32>
    %17 = tpu.concatenate %14, %14 in 1 : vector<8x32xf32>, vector<8x32xf32> -> vector<8x64xf32>
    %c0_14 = arith.constant 0 : index
    %c0_15 = arith.constant 0 : index
    %18 = vector.load %arg5[%c0_14, %c0_15] : memref<64x256xf32, #tpu.memory_space<vmem>>, vector<64x256xf32>
    %cst_16 = arith.constant dense<0.000000e+00> : vector<8x256xf32>
    %19 = tpu.matmul %17, %18, %cst_16 {dimension_numbers = #tpu.dot_dimension_numbers<[1], [0], [0], [1], [0, 0, 1, 1], [], []>} : vector<8x64xf32>, vector<64x256xf32>, vector<8x256xf32> -> vector<8x256xf32>
    %20 = vector.extract_strided_slice %19 {offsets = [0, 0], sizes = [8, 128], strides = [1, 1]} : vector<8x256xf32> to vector<8x128xf32>
    %21 = arith.addf %15, %20 : vector<8x128xf32>
    %22 = vector.extract_strided_slice %21 {offsets = [0, 0], sizes = [8, 96], strides = [1, 1]} : vector<8x128xf32> to vector<8x96xf32>
    %23 = arith.negf %22 : vector<8x96xf32>
    %24 = math.exp %23 : vector<8x96xf32>
    %cst_17 = arith.constant 1.000000e+00 : f32
    %25 = vector.broadcast %cst_17 : f32 to vector<8x96xf32>
    %26 = arith.addf %25, %24 : vector<8x96xf32>
    %27 = arith.divf %25, %26 : vector<8x96xf32>
    %28 = vector.extract_strided_slice %27 {offsets = [0, 0], sizes = [8, 32], strides = [1, 1]} : vector<8x96xf32> to vector<8x32xf32>
    %29 = vector.extract_strided_slice %27 {offsets = [0, 32], sizes = [8, 32], strides = [1, 1]} : vector<8x96xf32> to vector<8x32xf32>
    %30 = vector.extract_strided_slice %27 {offsets = [0, 64], sizes = [8, 32], strides = [1, 1]} : vector<8x96xf32> to vector<8x32xf32>
    %31 = vector.extract_strided_slice %21 {offsets = [0, 96], sizes = [8, 32], strides = [1, 1]} : vector<8x128xf32> to vector<8x32xf32>
    %32 = math.tanh %31 : vector<8x32xf32>
    %33 = arith.mulf %29, %14 : vector<8x32xf32>
    %34 = arith.mulf %28, %32 : vector<8x32xf32>
    %35 = arith.addf %33, %34 : vector<8x32xf32>
    %36 = math.tanh %35 : vector<8x32xf32>
    %37 = arith.mulf %30, %36 : vector<8x32xf32>
    %38 = vector.extract_strided_slice %19 {offsets = [0, 128], sizes = [8, 128], strides = [1, 1]} : vector<8x256xf32> to vector<8x128xf32>
    %c0_18 = arith.constant 0 : index
    %c0_19 = arith.constant 0 : index
    %39 = vector.load %arg6[%c0_18, %c0_19] : memref<1x128xf32, #tpu.memory_space<vmem>>, vector<1x128xf32>
    %40 = vector.broadcast %39 : vector<1x128xf32> to vector<8x128xf32>
    %41 = arith.addf %38, %40 : vector<8x128xf32>
    %42 = vector.extract_strided_slice %16 {offsets = [0, 0], sizes = [8, 64], strides = [1, 1]} : vector<8x128xf32> to vector<8x64xf32>
    %43 = vector.extract_strided_slice %41 {offsets = [0, 0], sizes = [8, 64], strides = [1, 1]} : vector<8x128xf32> to vector<8x64xf32>
    %44 = arith.addf %42, %43 : vector<8x64xf32>
    %45 = arith.negf %44 : vector<8x64xf32>
    %46 = math.exp %45 : vector<8x64xf32>
    %cst_20 = arith.constant 1.000000e+00 : f32
    %47 = vector.broadcast %cst_20 : f32 to vector<8x64xf32>
    %48 = arith.addf %47, %46 : vector<8x64xf32>
    %49 = arith.divf %47, %48 : vector<8x64xf32>
    %50 = vector.extract_strided_slice %49 {offsets = [0, 0], sizes = [8, 32], strides = [1, 1]} : vector<8x64xf32> to vector<8x32xf32>
    %51 = vector.extract_strided_slice %49 {offsets = [0, 32], sizes = [8, 32], strides = [1, 1]} : vector<8x64xf32> to vector<8x32xf32>
    %52 = vector.extract_strided_slice %16 {offsets = [0, 64], sizes = [8, 32], strides = [1, 1]} : vector<8x128xf32> to vector<8x32xf32>
    %53 = vector.extract_strided_slice %41 {offsets = [0, 64], sizes = [8, 32], strides = [1, 1]} : vector<8x128xf32> to vector<8x32xf32>
    %54 = arith.mulf %50, %53 : vector<8x32xf32>
    %55 = arith.addf %52, %54 : vector<8x32xf32>
    %56 = math.tanh %55 : vector<8x32xf32>
    %cst_21 = arith.constant 1.000000e+00 : f32
    %57 = vector.broadcast %cst_21 : f32 to vector<8x32xf32>
    %58 = arith.subf %57, %51 : vector<8x32xf32>
    %59 = arith.mulf %58, %56 : vector<8x32xf32>
    %60 = arith.mulf %51, %14 : vector<8x32xf32>
    %61 = arith.addf %59, %60 : vector<8x32xf32>
    %62 = tpu.concatenate %37, %14 in 1 : vector<8x32xf32>, vector<8x32xf32> -> vector<8x64xf32>
    %c0_22 = arith.constant 0 : index
    %c0_23 = arith.constant 0 : index
    %63 = vector.load %arg7[%c0_22, %c0_23] : memref<64x128xf32, #tpu.memory_space<vmem>>, vector<64x128xf32>
    %cst_24 = arith.constant dense<0.000000e+00> : vector<8x128xf32>
    %64 = tpu.matmul %62, %63, %cst_24 {dimension_numbers = #tpu.dot_dimension_numbers<[1], [0], [0], [1], [0, 0, 1, 1], [], []>} : vector<8x64xf32>, vector<64x128xf32>, vector<8x128xf32> -> vector<8x128xf32>
    %c0_25 = arith.constant 0 : index
    %c0_26 = arith.constant 0 : index
    %65 = vector.load %arg8[%c0_25, %c0_26] : memref<1x128xf32, #tpu.memory_space<vmem>>, vector<1x128xf32>
    %66 = vector.broadcast %65 : vector<1x128xf32> to vector<8x128xf32>
    %67 = arith.addf %64, %66 : vector<8x128xf32>
    %68 = vector.extract_strided_slice %67 {offsets = [0, 0], sizes = [8, 96], strides = [1, 1]} : vector<8x128xf32> to vector<8x96xf32>
    %69 = arith.negf %68 : vector<8x96xf32>
    %70 = math.exp %69 : vector<8x96xf32>
    %cst_27 = arith.constant 1.000000e+00 : f32
    %71 = vector.broadcast %cst_27 : f32 to vector<8x96xf32>
    %72 = arith.addf %71, %70 : vector<8x96xf32>
    %73 = arith.divf %71, %72 : vector<8x96xf32>
    %74 = vector.extract_strided_slice %73 {offsets = [0, 0], sizes = [8, 32], strides = [1, 1]} : vector<8x96xf32> to vector<8x32xf32>
    %75 = vector.extract_strided_slice %73 {offsets = [0, 32], sizes = [8, 32], strides = [1, 1]} : vector<8x96xf32> to vector<8x32xf32>
    %76 = vector.extract_strided_slice %73 {offsets = [0, 64], sizes = [8, 32], strides = [1, 1]} : vector<8x96xf32> to vector<8x32xf32>
    %77 = vector.extract_strided_slice %67 {offsets = [0, 96], sizes = [8, 32], strides = [1, 1]} : vector<8x128xf32> to vector<8x32xf32>
    %78 = math.tanh %77 : vector<8x32xf32>
    %79 = arith.mulf %75, %14 : vector<8x32xf32>
    %80 = arith.mulf %74, %78 : vector<8x32xf32>
    %81 = arith.addf %79, %80 : vector<8x32xf32>
    %82 = math.tanh %81 : vector<8x32xf32>
    %83 = arith.mulf %76, %82 : vector<8x32xf32>
    %84 = tpu.concatenate %61, %14 in 1 : vector<8x32xf32>, vector<8x32xf32> -> vector<8x64xf32>
    %c0_28 = arith.constant 0 : index
    %c0_29 = arith.constant 0 : index
    %85 = vector.load %arg9[%c0_28, %c0_29] : memref<64x256xf32, #tpu.memory_space<vmem>>, vector<64x256xf32>
    %cst_30 = arith.constant dense<0.000000e+00> : vector<8x256xf32>
    %86 = tpu.matmul %84, %85, %cst_30 {dimension_numbers = #tpu.dot_dimension_numbers<[1], [0], [0], [1], [0, 0, 1, 1], [], []>} : vector<8x64xf32>, vector<64x256xf32>, vector<8x256xf32> -> vector<8x256xf32>
    %87 = vector.extract_strided_slice %86 {offsets = [0, 0], sizes = [8, 128], strides = [1, 1]} : vector<8x256xf32> to vector<8x128xf32>
    %c0_31 = arith.constant 0 : index
    %c0_32 = arith.constant 0 : index
    %88 = vector.load %arg10[%c0_31, %c0_32] : memref<1x128xf32, #tpu.memory_space<vmem>>, vector<1x128xf32>
    %89 = vector.broadcast %88 : vector<1x128xf32> to vector<8x128xf32>
    %90 = arith.addf %87, %89 : vector<8x128xf32>
    %91 = vector.extract_strided_slice %86 {offsets = [0, 128], sizes = [8, 128], strides = [1, 1]} : vector<8x256xf32> to vector<8x128xf32>
    %c0_33 = arith.constant 0 : index
    %c0_34 = arith.constant 0 : index
    %92 = vector.load %arg11[%c0_33, %c0_34] : memref<1x128xf32, #tpu.memory_space<vmem>>, vector<1x128xf32>
    %93 = vector.broadcast %92 : vector<1x128xf32> to vector<8x128xf32>
    %94 = arith.addf %91, %93 : vector<8x128xf32>
    %95 = vector.extract_strided_slice %90 {offsets = [0, 0], sizes = [8, 64], strides = [1, 1]} : vector<8x128xf32> to vector<8x64xf32>
    %96 = vector.extract_strided_slice %94 {offsets = [0, 0], sizes = [8, 64], strides = [1, 1]} : vector<8x128xf32> to vector<8x64xf32>
    %97 = arith.addf %95, %96 : vector<8x64xf32>
    %98 = arith.negf %97 : vector<8x64xf32>
    %99 = math.exp %98 : vector<8x64xf32>
    %cst_35 = arith.constant 1.000000e+00 : f32
    %100 = vector.broadcast %cst_35 : f32 to vector<8x64xf32>
    %101 = arith.addf %100, %99 : vector<8x64xf32>
    %102 = arith.divf %100, %101 : vector<8x64xf32>
    %103 = vector.extract_strided_slice %102 {offsets = [0, 0], sizes = [8, 32], strides = [1, 1]} : vector<8x64xf32> to vector<8x32xf32>
    %104 = vector.extract_strided_slice %102 {offsets = [0, 32], sizes = [8, 32], strides = [1, 1]} : vector<8x64xf32> to vector<8x32xf32>
    %105 = vector.extract_strided_slice %90 {offsets = [0, 64], sizes = [8, 32], strides = [1, 1]} : vector<8x128xf32> to vector<8x32xf32>
    %106 = vector.extract_strided_slice %94 {offsets = [0, 64], sizes = [8, 32], strides = [1, 1]} : vector<8x128xf32> to vector<8x32xf32>
    %107 = arith.mulf %103, %106 : vector<8x32xf32>
    %108 = arith.addf %105, %107 : vector<8x32xf32>
    %109 = math.tanh %108 : vector<8x32xf32>
    %cst_36 = arith.constant 1.000000e+00 : f32
    %110 = vector.broadcast %cst_36 : f32 to vector<8x32xf32>
    %111 = arith.subf %110, %104 : vector<8x32xf32>
    %112 = arith.mulf %111, %109 : vector<8x32xf32>
    %113 = arith.mulf %104, %14 : vector<8x32xf32>
    %114 = arith.addf %112, %113 : vector<8x32xf32>
    %c0_i32 = arith.constant 0 : i32
    %115 = vector.broadcast %c0_i32 : i32 to vector<8x1xi32>
    %116 = arith.cmpi eq, %13, %115 : vector<8x1xi32>
    %117 = arith.extui %116 : vector<8x1xi1> to vector<8x1xi32>
    %118 = arith.sitofp %117 : vector<8x1xi32> to vector<8x1xf32>
    %119 = vector.broadcast %118 : vector<8x1xf32> to vector<8x32xf32>
    %120 = arith.mulf %119, %83 : vector<8x32xf32>
    %121 = arith.addf %14, %120 : vector<8x32xf32>
    %122 = vector.broadcast %118 : vector<8x1xf32> to vector<8x32xf32>
    %123 = arith.mulf %122, %114 : vector<8x32xf32>
    %124 = arith.addf %14, %123 : vector<8x32xf32>
    %c8 = arith.constant 8 : index
    %c0_37 = arith.constant 0 : index
    %125 = vector.load %arg15[%c8, %c0_37] : memref<64x256xf32, #tpu.memory_space<vmem>>, vector<8x128xf32>
    %c8_38 = arith.constant 8 : index
    %c128_39 = arith.constant 128 : index
    %126 = vector.load %arg15[%c8_38, %c128_39] : memref<64x256xf32, #tpu.memory_space<vmem>>, vector<8x128xf32>
    %127 = tpu.concatenate %37, %61 in 1 : vector<8x32xf32>, vector<8x32xf32> -> vector<8x64xf32>
    %c0_40 = arith.constant 0 : index
    %c0_41 = arith.constant 0 : index
    %128 = vector.load %arg5[%c0_40, %c0_41] : memref<64x256xf32, #tpu.memory_space<vmem>>, vector<64x256xf32>
    %cst_42 = arith.constant dense<0.000000e+00> : vector<8x256xf32>
    %129 = tpu.matmul %127, %128, %cst_42 {dimension_numbers = #tpu.dot_dimension_numbers<[1], [0], [0], [1], [0, 0, 1, 1], [], []>} : vector<8x64xf32>, vector<64x256xf32>, vector<8x256xf32> -> vector<8x256xf32>
    %130 = vector.extract_strided_slice %129 {offsets = [0, 0], sizes = [8, 128], strides = [1, 1]} : vector<8x256xf32> to vector<8x128xf32>
    %131 = arith.addf %125, %130 : vector<8x128xf32>
    %132 = vector.extract_strided_slice %131 {offsets = [0, 0], sizes = [8, 96], strides = [1, 1]} : vector<8x128xf32> to vector<8x96xf32>
    %133 = arith.negf %132 : vector<8x96xf32>
    %134 = math.exp %133 : vector<8x96xf32>
    %cst_43 = arith.constant 1.000000e+00 : f32
    %135 = vector.broadcast %cst_43 : f32 to vector<8x96xf32>
    %136 = arith.addf %135, %134 : vector<8x96xf32>
    %137 = arith.divf %135, %136 : vector<8x96xf32>
    %138 = vector.extract_strided_slice %137 {offsets = [0, 0], sizes = [8, 32], strides = [1, 1]} : vector<8x96xf32> to vector<8x32xf32>
    %139 = vector.extract_strided_slice %137 {offsets = [0, 32], sizes = [8, 32], strides = [1, 1]} : vector<8x96xf32> to vector<8x32xf32>
    %140 = vector.extract_strided_slice %137 {offsets = [0, 64], sizes = [8, 32], strides = [1, 1]} : vector<8x96xf32> to vector<8x32xf32>
    %141 = vector.extract_strided_slice %131 {offsets = [0, 96], sizes = [8, 32], strides = [1, 1]} : vector<8x128xf32> to vector<8x32xf32>
    %142 = math.tanh %141 : vector<8x32xf32>
    %143 = arith.mulf %139, %35 : vector<8x32xf32>
    %144 = arith.mulf %138, %142 : vector<8x32xf32>
    %145 = arith.addf %143, %144 : vector<8x32xf32>
    %146 = math.tanh %145 : vector<8x32xf32>
    %147 = arith.mulf %140, %146 : vector<8x32xf32>
    %148 = vector.extract_strided_slice %129 {offsets = [0, 128], sizes = [8, 128], strides = [1, 1]} : vector<8x256xf32> to vector<8x128xf32>
    %c0_44 = arith.constant 0 : index
    %c0_45 = arith.constant 0 : index
    %149 = vector.load %arg6[%c0_44, %c0_45] : memref<1x128xf32, #tpu.memory_space<vmem>>, vector<1x128xf32>
    %150 = vector.broadcast %149 : vector<1x128xf32> to vector<8x128xf32>
    %151 = arith.addf %148, %150 : vector<8x128xf32>
    %152 = vector.extract_strided_slice %126 {offsets = [0, 0], sizes = [8, 64], strides = [1, 1]} : vector<8x128xf32> to vector<8x64xf32>
    %153 = vector.extract_strided_slice %151 {offsets = [0, 0], sizes = [8, 64], strides = [1, 1]} : vector<8x128xf32> to vector<8x64xf32>
    %154 = arith.addf %152, %153 : vector<8x64xf32>
    %155 = arith.negf %154 : vector<8x64xf32>
    %156 = math.exp %155 : vector<8x64xf32>
    %cst_46 = arith.constant 1.000000e+00 : f32
    %157 = vector.broadcast %cst_46 : f32 to vector<8x64xf32>
    %158 = arith.addf %157, %156 : vector<8x64xf32>
    %159 = arith.divf %157, %158 : vector<8x64xf32>
    %160 = vector.extract_strided_slice %159 {offsets = [0, 0], sizes = [8, 32], strides = [1, 1]} : vector<8x64xf32> to vector<8x32xf32>
    %161 = vector.extract_strided_slice %159 {offsets = [0, 32], sizes = [8, 32], strides = [1, 1]} : vector<8x64xf32> to vector<8x32xf32>
    %162 = vector.extract_strided_slice %126 {offsets = [0, 64], sizes = [8, 32], strides = [1, 1]} : vector<8x128xf32> to vector<8x32xf32>
    %163 = vector.extract_strided_slice %151 {offsets = [0, 64], sizes = [8, 32], strides = [1, 1]} : vector<8x128xf32> to vector<8x32xf32>
    %164 = arith.mulf %160, %163 : vector<8x32xf32>
    %165 = arith.addf %162, %164 : vector<8x32xf32>
    %166 = math.tanh %165 : vector<8x32xf32>
    %cst_47 = arith.constant 1.000000e+00 : f32
    %167 = vector.broadcast %cst_47 : f32 to vector<8x32xf32>
    %168 = arith.subf %167, %161 : vector<8x32xf32>
    %169 = arith.mulf %168, %166 : vector<8x32xf32>
    %170 = arith.mulf %161, %61 : vector<8x32xf32>
    %171 = arith.addf %169, %170 : vector<8x32xf32>
    %172 = tpu.concatenate %147, %83 in 1 : vector<8x32xf32>, vector<8x32xf32> -> vector<8x64xf32>
    %c0_48 = arith.constant 0 : index
    %c0_49 = arith.constant 0 : index
    %173 = vector.load %arg7[%c0_48, %c0_49] : memref<64x128xf32, #tpu.memory_space<vmem>>, vector<64x128xf32>
    %cst_50 = arith.constant dense<0.000000e+00> : vector<8x128xf32>
    %174 = tpu.matmul %172, %173, %cst_50 {dimension_numbers = #tpu.dot_dimension_numbers<[1], [0], [0], [1], [0, 0, 1, 1], [], []>} : vector<8x64xf32>, vector<64x128xf32>, vector<8x128xf32> -> vector<8x128xf32>
    %c0_51 = arith.constant 0 : index
    %c0_52 = arith.constant 0 : index
    %175 = vector.load %arg8[%c0_51, %c0_52] : memref<1x128xf32, #tpu.memory_space<vmem>>, vector<1x128xf32>
    %176 = vector.broadcast %175 : vector<1x128xf32> to vector<8x128xf32>
    %177 = arith.addf %174, %176 : vector<8x128xf32>
    %178 = vector.extract_strided_slice %177 {offsets = [0, 0], sizes = [8, 96], strides = [1, 1]} : vector<8x128xf32> to vector<8x96xf32>
    %179 = arith.negf %178 : vector<8x96xf32>
    %180 = math.exp %179 : vector<8x96xf32>
    %cst_53 = arith.constant 1.000000e+00 : f32
    %181 = vector.broadcast %cst_53 : f32 to vector<8x96xf32>
    %182 = arith.addf %181, %180 : vector<8x96xf32>
    %183 = arith.divf %181, %182 : vector<8x96xf32>
    %184 = vector.extract_strided_slice %183 {offsets = [0, 0], sizes = [8, 32], strides = [1, 1]} : vector<8x96xf32> to vector<8x32xf32>
    %185 = vector.extract_strided_slice %183 {offsets = [0, 32], sizes = [8, 32], strides = [1, 1]} : vector<8x96xf32> to vector<8x32xf32>
    %186 = vector.extract_strided_slice %183 {offsets = [0, 64], sizes = [8, 32], strides = [1, 1]} : vector<8x96xf32> to vector<8x32xf32>
    %187 = vector.extract_strided_slice %177 {offsets = [0, 96], sizes = [8, 32], strides = [1, 1]} : vector<8x128xf32> to vector<8x32xf32>
    %188 = math.tanh %187 : vector<8x32xf32>
    %189 = arith.mulf %185, %81 : vector<8x32xf32>
    %190 = arith.mulf %184, %188 : vector<8x32xf32>
    %191 = arith.addf %189, %190 : vector<8x32xf32>
    %192 = math.tanh %191 : vector<8x32xf32>
    %193 = arith.mulf %186, %192 : vector<8x32xf32>
    %194 = tpu.concatenate %171, %114 in 1 : vector<8x32xf32>, vector<8x32xf32> -> vector<8x64xf32>
    %c0_54 = arith.constant 0 : index
    %c0_55 = arith.constant 0 : index
    %195 = vector.load %arg9[%c0_54, %c0_55] : memref<64x256xf32, #tpu.memory_space<vmem>>, vector<64x256xf32>
    %cst_56 = arith.constant dense<0.000000e+00> : vector<8x256xf32>
    %196 = tpu.matmul %194, %195, %cst_56 {dimension_numbers = #tpu.dot_dimension_numbers<[1], [0], [0], [1], [0, 0, 1, 1], [], []>} : vector<8x64xf32>, vector<64x256xf32>, vector<8x256xf32> -> vector<8x256xf32>
    %197 = vector.extract_strided_slice %196 {offsets = [0, 0], sizes = [8, 128], strides = [1, 1]} : vector<8x256xf32> to vector<8x128xf32>
    %c0_57 = arith.constant 0 : index
    %c0_58 = arith.constant 0 : index
    %198 = vector.load %arg10[%c0_57, %c0_58] : memref<1x128xf32, #tpu.memory_space<vmem>>, vector<1x128xf32>
    %199 = vector.broadcast %198 : vector<1x128xf32> to vector<8x128xf32>
    %200 = arith.addf %197, %199 : vector<8x128xf32>
    %201 = vector.extract_strided_slice %196 {offsets = [0, 128], sizes = [8, 128], strides = [1, 1]} : vector<8x256xf32> to vector<8x128xf32>
    %c0_59 = arith.constant 0 : index
    %c0_60 = arith.constant 0 : index
    %202 = vector.load %arg11[%c0_59, %c0_60] : memref<1x128xf32, #tpu.memory_space<vmem>>, vector<1x128xf32>
    %203 = vector.broadcast %202 : vector<1x128xf32> to vector<8x128xf32>
    %204 = arith.addf %201, %203 : vector<8x128xf32>
    %205 = vector.extract_strided_slice %200 {offsets = [0, 0], sizes = [8, 64], strides = [1, 1]} : vector<8x128xf32> to vector<8x64xf32>
    %206 = vector.extract_strided_slice %204 {offsets = [0, 0], sizes = [8, 64], strides = [1, 1]} : vector<8x128xf32> to vector<8x64xf32>
    %207 = arith.addf %205, %206 : vector<8x64xf32>
    %208 = arith.negf %207 : vector<8x64xf32>
    %209 = math.exp %208 : vector<8x64xf32>
    %cst_61 = arith.constant 1.000000e+00 : f32
    %210 = vector.broadcast %cst_61 : f32 to vector<8x64xf32>
    %211 = arith.addf %210, %209 : vector<8x64xf32>
    %212 = arith.divf %210, %211 : vector<8x64xf32>
    %213 = vector.extract_strided_slice %212 {offsets = [0, 0], sizes = [8, 32], strides = [1, 1]} : vector<8x64xf32> to vector<8x32xf32>
    %214 = vector.extract_strided_slice %212 {offsets = [0, 32], sizes = [8, 32], strides = [1, 1]} : vector<8x64xf32> to vector<8x32xf32>
    %215 = vector.extract_strided_slice %200 {offsets = [0, 64], sizes = [8, 32], strides = [1, 1]} : vector<8x128xf32> to vector<8x32xf32>
    %216 = vector.extract_strided_slice %204 {offsets = [0, 64], sizes = [8, 32], strides = [1, 1]} : vector<8x128xf32> to vector<8x32xf32>
    %217 = arith.mulf %213, %216 : vector<8x32xf32>
    %218 = arith.addf %215, %217 : vector<8x32xf32>
    %219 = math.tanh %218 : vector<8x32xf32>
    %cst_62 = arith.constant 1.000000e+00 : f32
    %220 = vector.broadcast %cst_62 : f32 to vector<8x32xf32>
    %221 = arith.subf %220, %214 : vector<8x32xf32>
    %222 = arith.mulf %221, %219 : vector<8x32xf32>
    %223 = arith.mulf %214, %114 : vector<8x32xf32>
    %224 = arith.addf %222, %223 : vector<8x32xf32>
    %c1_i32 = arith.constant 1 : i32
    %225 = vector.broadcast %c1_i32 : i32 to vector<8x1xi32>
    %226 = arith.cmpi eq, %13, %225 : vector<8x1xi32>
    %227 = arith.extui %226 : vector<8x1xi1> to vector<8x1xi32>
    %228 = arith.sitofp %227 : vector<8x1xi32> to vector<8x1xf32>
    %229 = vector.broadcast %228 : vector<8x1xf32> to vector<8x32xf32>
    %230 = arith.mulf %229, %193 : vector<8x32xf32>
    %231 = arith.addf %121, %230 : vector<8x32xf32>
    %232 = vector.broadcast %228 : vector<8x1xf32> to vector<8x32xf32>
    %233 = arith.mulf %232, %224 : vector<8x32xf32>
    %234 = arith.addf %124, %233 : vector<8x32xf32>
    %c16 = arith.constant 16 : index
    %c0_63 = arith.constant 0 : index
    %235 = vector.load %arg15[%c16, %c0_63] : memref<64x256xf32, #tpu.memory_space<vmem>>, vector<8x128xf32>
    %c16_64 = arith.constant 16 : index
    %c128_65 = arith.constant 128 : index
    %236 = vector.load %arg15[%c16_64, %c128_65] : memref<64x256xf32, #tpu.memory_space<vmem>>, vector<8x128xf32>
    %237 = tpu.concatenate %147, %171 in 1 : vector<8x32xf32>, vector<8x32xf32> -> vector<8x64xf32>
    %c0_66 = arith.constant 0 : index
    %c0_67 = arith.constant 0 : index
    %238 = vector.load %arg5[%c0_66, %c0_67] : memref<64x256xf32, #tpu.memory_space<vmem>>, vector<64x256xf32>
    %cst_68 = arith.constant dense<0.000000e+00> : vector<8x256xf32>
    %239 = tpu.matmul %237, %238, %cst_68 {dimension_numbers = #tpu.dot_dimension_numbers<[1], [0], [0], [1], [0, 0, 1, 1], [], []>} : vector<8x64xf32>, vector<64x256xf32>, vector<8x256xf32> -> vector<8x256xf32>
    %240 = vector.extract_strided_slice %239 {offsets = [0, 0], sizes = [8, 128], strides = [1, 1]} : vector<8x256xf32> to vector<8x128xf32>
    %241 = arith.addf %235, %240 : vector<8x128xf32>
    %242 = vector.extract_strided_slice %241 {offsets = [0, 0], sizes = [8, 96], strides = [1, 1]} : vector<8x128xf32> to vector<8x96xf32>
    %243 = arith.negf %242 : vector<8x96xf32>
    %244 = math.exp %243 : vector<8x96xf32>
    %cst_69 = arith.constant 1.000000e+00 : f32
    %245 = vector.broadcast %cst_69 : f32 to vector<8x96xf32>
    %246 = arith.addf %245, %244 : vector<8x96xf32>
    %247 = arith.divf %245, %246 : vector<8x96xf32>
    %248 = vector.extract_strided_slice %247 {offsets = [0, 0], sizes = [8, 32], strides = [1, 1]} : vector<8x96xf32> to vector<8x32xf32>
    %249 = vector.extract_strided_slice %247 {offsets = [0, 32], sizes = [8, 32], strides = [1, 1]} : vector<8x96xf32> to vector<8x32xf32>
    %250 = vector.extract_strided_slice %247 {offsets = [0, 64], sizes = [8, 32], strides = [1, 1]} : vector<8x96xf32> to vector<8x32xf32>
    %251 = vector.extract_strided_slice %241 {offsets = [0, 96], sizes = [8, 32], strides = [1, 1]} : vector<8x128xf32> to vector<8x32xf32>
    %252 = math.tanh %251 : vector<8x32xf32>
    %253 = arith.mulf %249, %145 : vector<8x32xf32>
    %254 = arith.mulf %248, %252 : vector<8x32xf32>
    %255 = arith.addf %253, %254 : vector<8x32xf32>
    %256 = math.tanh %255 : vector<8x32xf32>
    %257 = arith.mulf %250, %256 : vector<8x32xf32>
    %258 = vector.extract_strided_slice %239 {offsets = [0, 128], sizes = [8, 128], strides = [1, 1]} : vector<8x256xf32> to vector<8x128xf32>
    %c0_70 = arith.constant 0 : index
    %c0_71 = arith.constant 0 : index
    %259 = vector.load %arg6[%c0_70, %c0_71] : memref<1x128xf32, #tpu.memory_space<vmem>>, vector<1x128xf32>
    %260 = vector.broadcast %259 : vector<1x128xf32> to vector<8x128xf32>
    %261 = arith.addf %258, %260 : vector<8x128xf32>
    %262 = vector.extract_strided_slice %236 {offsets = [0, 0], sizes = [8, 64], strides = [1, 1]} : vector<8x128xf32> to vector<8x64xf32>
    %263 = vector.extract_strided_slice %261 {offsets = [0, 0], sizes = [8, 64], strides = [1, 1]} : vector<8x128xf32> to vector<8x64xf32>
    %264 = arith.addf %262, %263 : vector<8x64xf32>
    %265 = arith.negf %264 : vector<8x64xf32>
    %266 = math.exp %265 : vector<8x64xf32>
    %cst_72 = arith.constant 1.000000e+00 : f32
    %267 = vector.broadcast %cst_72 : f32 to vector<8x64xf32>
    %268 = arith.addf %267, %266 : vector<8x64xf32>
    %269 = arith.divf %267, %268 : vector<8x64xf32>
    %270 = vector.extract_strided_slice %269 {offsets = [0, 0], sizes = [8, 32], strides = [1, 1]} : vector<8x64xf32> to vector<8x32xf32>
    %271 = vector.extract_strided_slice %269 {offsets = [0, 32], sizes = [8, 32], strides = [1, 1]} : vector<8x64xf32> to vector<8x32xf32>
    %272 = vector.extract_strided_slice %236 {offsets = [0, 64], sizes = [8, 32], strides = [1, 1]} : vector<8x128xf32> to vector<8x32xf32>
    %273 = vector.extract_strided_slice %261 {offsets = [0, 64], sizes = [8, 32], strides = [1, 1]} : vector<8x128xf32> to vector<8x32xf32>
    %274 = arith.mulf %270, %273 : vector<8x32xf32>
    %275 = arith.addf %272, %274 : vector<8x32xf32>
    %276 = math.tanh %275 : vector<8x32xf32>
    %cst_73 = arith.constant 1.000000e+00 : f32
    %277 = vector.broadcast %cst_73 : f32 to vector<8x32xf32>
    %278 = arith.subf %277, %271 : vector<8x32xf32>
    %279 = arith.mulf %278, %276 : vector<8x32xf32>
    %280 = arith.mulf %271, %171 : vector<8x32xf32>
    %281 = arith.addf %279, %280 : vector<8x32xf32>
    %282 = tpu.concatenate %257, %193 in 1 : vector<8x32xf32>, vector<8x32xf32> -> vector<8x64xf32>
    %c0_74 = arith.constant 0 : index
    %c0_75 = arith.constant 0 : index
    %283 = vector.load %arg7[%c0_74, %c0_75] : memref<64x128xf32, #tpu.memory_space<vmem>>, vector<64x128xf32>
    %cst_76 = arith.constant dense<0.000000e+00> : vector<8x128xf32>
    %284 = tpu.matmul %282, %283, %cst_76 {dimension_numbers = #tpu.dot_dimension_numbers<[1], [0], [0], [1], [0, 0, 1, 1], [], []>} : vector<8x64xf32>, vector<64x128xf32>, vector<8x128xf32> -> vector<8x128xf32>
    %c0_77 = arith.constant 0 : index
    %c0_78 = arith.constant 0 : index
    %285 = vector.load %arg8[%c0_77, %c0_78] : memref<1x128xf32, #tpu.memory_space<vmem>>, vector<1x128xf32>
    %286 = vector.broadcast %285 : vector<1x128xf32> to vector<8x128xf32>
    %287 = arith.addf %284, %286 : vector<8x128xf32>
    %288 = vector.extract_strided_slice %287 {offsets = [0, 0], sizes = [8, 96], strides = [1, 1]} : vector<8x128xf32> to vector<8x96xf32>
    %289 = arith.negf %288 : vector<8x96xf32>
    %290 = math.exp %289 : vector<8x96xf32>
    %cst_79 = arith.constant 1.000000e+00 : f32
    %291 = vector.broadcast %cst_79 : f32 to vector<8x96xf32>
    %292 = arith.addf %291, %290 : vector<8x96xf32>
    %293 = arith.divf %291, %292 : vector<8x96xf32>
    %294 = vector.extract_strided_slice %293 {offsets = [0, 0], sizes = [8, 32], strides = [1, 1]} : vector<8x96xf32> to vector<8x32xf32>
    %295 = vector.extract_strided_slice %293 {offsets = [0, 32], sizes = [8, 32], strides = [1, 1]} : vector<8x96xf32> to vector<8x32xf32>
    %296 = vector.extract_strided_slice %293 {offsets = [0, 64], sizes = [8, 32], strides = [1, 1]} : vector<8x96xf32> to vector<8x32xf32>
    %297 = vector.extract_strided_slice %287 {offsets = [0, 96], sizes = [8, 32], strides = [1, 1]} : vector<8x128xf32> to vector<8x32xf32>
    %298 = math.tanh %297 : vector<8x32xf32>
    %299 = arith.mulf %295, %191 : vector<8x32xf32>
    %300 = arith.mulf %294, %298 : vector<8x32xf32>
    %301 = arith.addf %299, %300 : vector<8x32xf32>
    %302 = math.tanh %301 : vector<8x32xf32>
    %303 = arith.mulf %296, %302 : vector<8x32xf32>
    %304 = tpu.concatenate %281, %224 in 1 : vector<8x32xf32>, vector<8x32xf32> -> vector<8x64xf32>
    %c0_80 = arith.constant 0 : index
    %c0_81 = arith.constant 0 : index
    %305 = vector.load %arg9[%c0_80, %c0_81] : memref<64x256xf32, #tpu.memory_space<vmem>>, vector<64x256xf32>
    %cst_82 = arith.constant dense<0.000000e+00> : vector<8x256xf32>
    %306 = tpu.matmul %304, %305, %cst_82 {dimension_numbers = #tpu.dot_dimension_numbers<[1], [0], [0], [1], [0, 0, 1, 1], [], []>} : vector<8x64xf32>, vector<64x256xf32>, vector<8x256xf32> -> vector<8x256xf32>
    %307 = vector.extract_strided_slice %306 {offsets = [0, 0], sizes = [8, 128], strides = [1, 1]} : vector<8x256xf32> to vector<8x128xf32>
    %c0_83 = arith.constant 0 : index
    %c0_84 = arith.constant 0 : index
    %308 = vector.load %arg10[%c0_83, %c0_84] : memref<1x128xf32, #tpu.memory_space<vmem>>, vector<1x128xf32>
    %309 = vector.broadcast %308 : vector<1x128xf32> to vector<8x128xf32>
    %310 = arith.addf %307, %309 : vector<8x128xf32>
    %311 = vector.extract_strided_slice %306 {offsets = [0, 128], sizes = [8, 128], strides = [1, 1]} : vector<8x256xf32> to vector<8x128xf32>
    %c0_85 = arith.constant 0 : index
    %c0_86 = arith.constant 0 : index
    %312 = vector.load %arg11[%c0_85, %c0_86] : memref<1x128xf32, #tpu.memory_space<vmem>>, vector<1x128xf32>
    %313 = vector.broadcast %312 : vector<1x128xf32> to vector<8x128xf32>
    %314 = arith.addf %311, %313 : vector<8x128xf32>
    %315 = vector.extract_strided_slice %310 {offsets = [0, 0], sizes = [8, 64], strides = [1, 1]} : vector<8x128xf32> to vector<8x64xf32>
    %316 = vector.extract_strided_slice %314 {offsets = [0, 0], sizes = [8, 64], strides = [1, 1]} : vector<8x128xf32> to vector<8x64xf32>
    %317 = arith.addf %315, %316 : vector<8x64xf32>
    %318 = arith.negf %317 : vector<8x64xf32>
    %319 = math.exp %318 : vector<8x64xf32>
    %cst_87 = arith.constant 1.000000e+00 : f32
    %320 = vector.broadcast %cst_87 : f32 to vector<8x64xf32>
    %321 = arith.addf %320, %319 : vector<8x64xf32>
    %322 = arith.divf %320, %321 : vector<8x64xf32>
    %323 = vector.extract_strided_slice %322 {offsets = [0, 0], sizes = [8, 32], strides = [1, 1]} : vector<8x64xf32> to vector<8x32xf32>
    %324 = vector.extract_strided_slice %322 {offsets = [0, 32], sizes = [8, 32], strides = [1, 1]} : vector<8x64xf32> to vector<8x32xf32>
    %325 = vector.extract_strided_slice %310 {offsets = [0, 64], sizes = [8, 32], strides = [1, 1]} : vector<8x128xf32> to vector<8x32xf32>
    %326 = vector.extract_strided_slice %314 {offsets = [0, 64], sizes = [8, 32], strides = [1, 1]} : vector<8x128xf32> to vector<8x32xf32>
    %327 = arith.mulf %323, %326 : vector<8x32xf32>
    %328 = arith.addf %325, %327 : vector<8x32xf32>
    %329 = math.tanh %328 : vector<8x32xf32>
    %cst_88 = arith.constant 1.000000e+00 : f32
    %330 = vector.broadcast %cst_88 : f32 to vector<8x32xf32>
    %331 = arith.subf %330, %324 : vector<8x32xf32>
    %332 = arith.mulf %331, %329 : vector<8x32xf32>
    %333 = arith.mulf %324, %224 : vector<8x32xf32>
    %334 = arith.addf %332, %333 : vector<8x32xf32>
    %c2_i32 = arith.constant 2 : i32
    %335 = vector.broadcast %c2_i32 : i32 to vector<8x1xi32>
    %336 = arith.cmpi eq, %13, %335 : vector<8x1xi32>
    %337 = arith.extui %336 : vector<8x1xi1> to vector<8x1xi32>
    %338 = arith.sitofp %337 : vector<8x1xi32> to vector<8x1xf32>
    %339 = vector.broadcast %338 : vector<8x1xf32> to vector<8x32xf32>
    %340 = arith.mulf %339, %303 : vector<8x32xf32>
    %341 = arith.addf %231, %340 : vector<8x32xf32>
    %342 = vector.broadcast %338 : vector<8x1xf32> to vector<8x32xf32>
    %343 = arith.mulf %342, %334 : vector<8x32xf32>
    %344 = arith.addf %234, %343 : vector<8x32xf32>
    %c24 = arith.constant 24 : index
    %c0_89 = arith.constant 0 : index
    %345 = vector.load %arg15[%c24, %c0_89] : memref<64x256xf32, #tpu.memory_space<vmem>>, vector<8x128xf32>
    %c24_90 = arith.constant 24 : index
    %c128_91 = arith.constant 128 : index
    %346 = vector.load %arg15[%c24_90, %c128_91] : memref<64x256xf32, #tpu.memory_space<vmem>>, vector<8x128xf32>
    %347 = tpu.concatenate %257, %281 in 1 : vector<8x32xf32>, vector<8x32xf32> -> vector<8x64xf32>
    %c0_92 = arith.constant 0 : index
    %c0_93 = arith.constant 0 : index
    %348 = vector.load %arg5[%c0_92, %c0_93] : memref<64x256xf32, #tpu.memory_space<vmem>>, vector<64x256xf32>
    %cst_94 = arith.constant dense<0.000000e+00> : vector<8x256xf32>
    %349 = tpu.matmul %347, %348, %cst_94 {dimension_numbers = #tpu.dot_dimension_numbers<[1], [0], [0], [1], [0, 0, 1, 1], [], []>} : vector<8x64xf32>, vector<64x256xf32>, vector<8x256xf32> -> vector<8x256xf32>
    %350 = vector.extract_strided_slice %349 {offsets = [0, 0], sizes = [8, 128], strides = [1, 1]} : vector<8x256xf32> to vector<8x128xf32>
    %351 = arith.addf %345, %350 : vector<8x128xf32>
    %352 = vector.extract_strided_slice %351 {offsets = [0, 0], sizes = [8, 96], strides = [1, 1]} : vector<8x128xf32> to vector<8x96xf32>
    %353 = arith.negf %352 : vector<8x96xf32>
    %354 = math.exp %353 : vector<8x96xf32>
    %cst_95 = arith.constant 1.000000e+00 : f32
    %355 = vector.broadcast %cst_95 : f32 to vector<8x96xf32>
    %356 = arith.addf %355, %354 : vector<8x96xf32>
    %357 = arith.divf %355, %356 : vector<8x96xf32>
    %358 = vector.extract_strided_slice %357 {offsets = [0, 0], sizes = [8, 32], strides = [1, 1]} : vector<8x96xf32> to vector<8x32xf32>
    %359 = vector.extract_strided_slice %357 {offsets = [0, 32], sizes = [8, 32], strides = [1, 1]} : vector<8x96xf32> to vector<8x32xf32>
    %360 = vector.extract_strided_slice %357 {offsets = [0, 64], sizes = [8, 32], strides = [1, 1]} : vector<8x96xf32> to vector<8x32xf32>
    %361 = vector.extract_strided_slice %351 {offsets = [0, 96], sizes = [8, 32], strides = [1, 1]} : vector<8x128xf32> to vector<8x32xf32>
    %362 = math.tanh %361 : vector<8x32xf32>
    %363 = arith.mulf %359, %255 : vector<8x32xf32>
    %364 = arith.mulf %358, %362 : vector<8x32xf32>
    %365 = arith.addf %363, %364 : vector<8x32xf32>
    %366 = math.tanh %365 : vector<8x32xf32>
    %367 = arith.mulf %360, %366 : vector<8x32xf32>
    %368 = vector.extract_strided_slice %349 {offsets = [0, 128], sizes = [8, 128], strides = [1, 1]} : vector<8x256xf32> to vector<8x128xf32>
    %c0_96 = arith.constant 0 : index
    %c0_97 = arith.constant 0 : index
    %369 = vector.load %arg6[%c0_96, %c0_97] : memref<1x128xf32, #tpu.memory_space<vmem>>, vector<1x128xf32>
    %370 = vector.broadcast %369 : vector<1x128xf32> to vector<8x128xf32>
    %371 = arith.addf %368, %370 : vector<8x128xf32>
    %372 = vector.extract_strided_slice %346 {offsets = [0, 0], sizes = [8, 64], strides = [1, 1]} : vector<8x128xf32> to vector<8x64xf32>
    %373 = vector.extract_strided_slice %371 {offsets = [0, 0], sizes = [8, 64], strides = [1, 1]} : vector<8x128xf32> to vector<8x64xf32>
    %374 = arith.addf %372, %373 : vector<8x64xf32>
    %375 = arith.negf %374 : vector<8x64xf32>
    %376 = math.exp %375 : vector<8x64xf32>
    %cst_98 = arith.constant 1.000000e+00 : f32
    %377 = vector.broadcast %cst_98 : f32 to vector<8x64xf32>
    %378 = arith.addf %377, %376 : vector<8x64xf32>
    %379 = arith.divf %377, %378 : vector<8x64xf32>
    %380 = vector.extract_strided_slice %379 {offsets = [0, 0], sizes = [8, 32], strides = [1, 1]} : vector<8x64xf32> to vector<8x32xf32>
    %381 = vector.extract_strided_slice %379 {offsets = [0, 32], sizes = [8, 32], strides = [1, 1]} : vector<8x64xf32> to vector<8x32xf32>
    %382 = vector.extract_strided_slice %346 {offsets = [0, 64], sizes = [8, 32], strides = [1, 1]} : vector<8x128xf32> to vector<8x32xf32>
    %383 = vector.extract_strided_slice %371 {offsets = [0, 64], sizes = [8, 32], strides = [1, 1]} : vector<8x128xf32> to vector<8x32xf32>
    %384 = arith.mulf %380, %383 : vector<8x32xf32>
    %385 = arith.addf %382, %384 : vector<8x32xf32>
    %386 = math.tanh %385 : vector<8x32xf32>
    %cst_99 = arith.constant 1.000000e+00 : f32
    %387 = vector.broadcast %cst_99 : f32 to vector<8x32xf32>
    %388 = arith.subf %387, %381 : vector<8x32xf32>
    %389 = arith.mulf %388, %386 : vector<8x32xf32>
    %390 = arith.mulf %381, %281 : vector<8x32xf32>
    %391 = arith.addf %389, %390 : vector<8x32xf32>
    %392 = tpu.concatenate %367, %303 in 1 : vector<8x32xf32>, vector<8x32xf32> -> vector<8x64xf32>
    %c0_100 = arith.constant 0 : index
    %c0_101 = arith.constant 0 : index
    %393 = vector.load %arg7[%c0_100, %c0_101] : memref<64x128xf32, #tpu.memory_space<vmem>>, vector<64x128xf32>
    %cst_102 = arith.constant dense<0.000000e+00> : vector<8x128xf32>
    %394 = tpu.matmul %392, %393, %cst_102 {dimension_numbers = #tpu.dot_dimension_numbers<[1], [0], [0], [1], [0, 0, 1, 1], [], []>} : vector<8x64xf32>, vector<64x128xf32>, vector<8x128xf32> -> vector<8x128xf32>
    %c0_103 = arith.constant 0 : index
    %c0_104 = arith.constant 0 : index
    %395 = vector.load %arg8[%c0_103, %c0_104] : memref<1x128xf32, #tpu.memory_space<vmem>>, vector<1x128xf32>
    %396 = vector.broadcast %395 : vector<1x128xf32> to vector<8x128xf32>
    %397 = arith.addf %394, %396 : vector<8x128xf32>
    %398 = vector.extract_strided_slice %397 {offsets = [0, 0], sizes = [8, 96], strides = [1, 1]} : vector<8x128xf32> to vector<8x96xf32>
    %399 = arith.negf %398 : vector<8x96xf32>
    %400 = math.exp %399 : vector<8x96xf32>
    %cst_105 = arith.constant 1.000000e+00 : f32
    %401 = vector.broadcast %cst_105 : f32 to vector<8x96xf32>
    %402 = arith.addf %401, %400 : vector<8x96xf32>
    %403 = arith.divf %401, %402 : vector<8x96xf32>
    %404 = vector.extract_strided_slice %403 {offsets = [0, 0], sizes = [8, 32], strides = [1, 1]} : vector<8x96xf32> to vector<8x32xf32>
    %405 = vector.extract_strided_slice %403 {offsets = [0, 32], sizes = [8, 32], strides = [1, 1]} : vector<8x96xf32> to vector<8x32xf32>
    %406 = vector.extract_strided_slice %403 {offsets = [0, 64], sizes = [8, 32], strides = [1, 1]} : vector<8x96xf32> to vector<8x32xf32>
    %407 = vector.extract_strided_slice %397 {offsets = [0, 96], sizes = [8, 32], strides = [1, 1]} : vector<8x128xf32> to vector<8x32xf32>
    %408 = math.tanh %407 : vector<8x32xf32>
    %409 = arith.mulf %405, %301 : vector<8x32xf32>
    %410 = arith.mulf %404, %408 : vector<8x32xf32>
    %411 = arith.addf %409, %410 : vector<8x32xf32>
    %412 = math.tanh %411 : vector<8x32xf32>
    %413 = arith.mulf %406, %412 : vector<8x32xf32>
    %414 = tpu.concatenate %391, %334 in 1 : vector<8x32xf32>, vector<8x32xf32> -> vector<8x64xf32>
    %c0_106 = arith.constant 0 : index
    %c0_107 = arith.constant 0 : index
    %415 = vector.load %arg9[%c0_106, %c0_107] : memref<64x256xf32, #tpu.memory_space<vmem>>, vector<64x256xf32>
    %cst_108 = arith.constant dense<0.000000e+00> : vector<8x256xf32>
    %416 = tpu.matmul %414, %415, %cst_108 {dimension_numbers = #tpu.dot_dimension_numbers<[1], [0], [0], [1], [0, 0, 1, 1], [], []>} : vector<8x64xf32>, vector<64x256xf32>, vector<8x256xf32> -> vector<8x256xf32>
    %417 = vector.extract_strided_slice %416 {offsets = [0, 0], sizes = [8, 128], strides = [1, 1]} : vector<8x256xf32> to vector<8x128xf32>
    %c0_109 = arith.constant 0 : index
    %c0_110 = arith.constant 0 : index
    %418 = vector.load %arg10[%c0_109, %c0_110] : memref<1x128xf32, #tpu.memory_space<vmem>>, vector<1x128xf32>
    %419 = vector.broadcast %418 : vector<1x128xf32> to vector<8x128xf32>
    %420 = arith.addf %417, %419 : vector<8x128xf32>
    %421 = vector.extract_strided_slice %416 {offsets = [0, 128], sizes = [8, 128], strides = [1, 1]} : vector<8x256xf32> to vector<8x128xf32>
    %c0_111 = arith.constant 0 : index
    %c0_112 = arith.constant 0 : index
    %422 = vector.load %arg11[%c0_111, %c0_112] : memref<1x128xf32, #tpu.memory_space<vmem>>, vector<1x128xf32>
    %423 = vector.broadcast %422 : vector<1x128xf32> to vector<8x128xf32>
    %424 = arith.addf %421, %423 : vector<8x128xf32>
    %425 = vector.extract_strided_slice %420 {offsets = [0, 0], sizes = [8, 64], strides = [1, 1]} : vector<8x128xf32> to vector<8x64xf32>
    %426 = vector.extract_strided_slice %424 {offsets = [0, 0], sizes = [8, 64], strides = [1, 1]} : vector<8x128xf32> to vector<8x64xf32>
    %427 = arith.addf %425, %426 : vector<8x64xf32>
    %428 = arith.negf %427 : vector<8x64xf32>
    %429 = math.exp %428 : vector<8x64xf32>
    %cst_113 = arith.constant 1.000000e+00 : f32
    %430 = vector.broadcast %cst_113 : f32 to vector<8x64xf32>
    %431 = arith.addf %430, %429 : vector<8x64xf32>
    %432 = arith.divf %430, %431 : vector<8x64xf32>
    %433 = vector.extract_strided_slice %432 {offsets = [0, 0], sizes = [8, 32], strides = [1, 1]} : vector<8x64xf32> to vector<8x32xf32>
    %434 = vector.extract_strided_slice %432 {offsets = [0, 32], sizes = [8, 32], strides = [1, 1]} : vector<8x64xf32> to vector<8x32xf32>
    %435 = vector.extract_strided_slice %420 {offsets = [0, 64], sizes = [8, 32], strides = [1, 1]} : vector<8x128xf32> to vector<8x32xf32>
    %436 = vector.extract_strided_slice %424 {offsets = [0, 64], sizes = [8, 32], strides = [1, 1]} : vector<8x128xf32> to vector<8x32xf32>
    %437 = arith.mulf %433, %436 : vector<8x32xf32>
    %438 = arith.addf %435, %437 : vector<8x32xf32>
    %439 = math.tanh %438 : vector<8x32xf32>
    %cst_114 = arith.constant 1.000000e+00 : f32
    %440 = vector.broadcast %cst_114 : f32 to vector<8x32xf32>
    %441 = arith.subf %440, %434 : vector<8x32xf32>
    %442 = arith.mulf %441, %439 : vector<8x32xf32>
    %443 = arith.mulf %434, %334 : vector<8x32xf32>
    %444 = arith.addf %442, %443 : vector<8x32xf32>
    %c3_i32 = arith.constant 3 : i32
    %445 = vector.broadcast %c3_i32 : i32 to vector<8x1xi32>
    %446 = arith.cmpi eq, %13, %445 : vector<8x1xi32>
    %447 = arith.extui %446 : vector<8x1xi1> to vector<8x1xi32>
    %448 = arith.sitofp %447 : vector<8x1xi32> to vector<8x1xf32>
    %449 = vector.broadcast %448 : vector<8x1xf32> to vector<8x32xf32>
    %450 = arith.mulf %449, %413 : vector<8x32xf32>
    %451 = arith.addf %341, %450 : vector<8x32xf32>
    %452 = vector.broadcast %448 : vector<8x1xf32> to vector<8x32xf32>
    %453 = arith.mulf %452, %444 : vector<8x32xf32>
    %454 = arith.addf %344, %453 : vector<8x32xf32>
    %c32 = arith.constant 32 : index
    %c0_115 = arith.constant 0 : index
    %455 = vector.load %arg15[%c32, %c0_115] : memref<64x256xf32, #tpu.memory_space<vmem>>, vector<8x128xf32>
    %c32_116 = arith.constant 32 : index
    %c128_117 = arith.constant 128 : index
    %456 = vector.load %arg15[%c32_116, %c128_117] : memref<64x256xf32, #tpu.memory_space<vmem>>, vector<8x128xf32>
    %457 = tpu.concatenate %367, %391 in 1 : vector<8x32xf32>, vector<8x32xf32> -> vector<8x64xf32>
    %c0_118 = arith.constant 0 : index
    %c0_119 = arith.constant 0 : index
    %458 = vector.load %arg5[%c0_118, %c0_119] : memref<64x256xf32, #tpu.memory_space<vmem>>, vector<64x256xf32>
    %cst_120 = arith.constant dense<0.000000e+00> : vector<8x256xf32>
    %459 = tpu.matmul %457, %458, %cst_120 {dimension_numbers = #tpu.dot_dimension_numbers<[1], [0], [0], [1], [0, 0, 1, 1], [], []>} : vector<8x64xf32>, vector<64x256xf32>, vector<8x256xf32> -> vector<8x256xf32>
    %460 = vector.extract_strided_slice %459 {offsets = [0, 0], sizes = [8, 128], strides = [1, 1]} : vector<8x256xf32> to vector<8x128xf32>
    %461 = arith.addf %455, %460 : vector<8x128xf32>
    %462 = vector.extract_strided_slice %461 {offsets = [0, 0], sizes = [8, 96], strides = [1, 1]} : vector<8x128xf32> to vector<8x96xf32>
    %463 = arith.negf %462 : vector<8x96xf32>
    %464 = math.exp %463 : vector<8x96xf32>
    %cst_121 = arith.constant 1.000000e+00 : f32
    %465 = vector.broadcast %cst_121 : f32 to vector<8x96xf32>
    %466 = arith.addf %465, %464 : vector<8x96xf32>
    %467 = arith.divf %465, %466 : vector<8x96xf32>
    %468 = vector.extract_strided_slice %467 {offsets = [0, 0], sizes = [8, 32], strides = [1, 1]} : vector<8x96xf32> to vector<8x32xf32>
    %469 = vector.extract_strided_slice %467 {offsets = [0, 32], sizes = [8, 32], strides = [1, 1]} : vector<8x96xf32> to vector<8x32xf32>
    %470 = vector.extract_strided_slice %467 {offsets = [0, 64], sizes = [8, 32], strides = [1, 1]} : vector<8x96xf32> to vector<8x32xf32>
    %471 = vector.extract_strided_slice %461 {offsets = [0, 96], sizes = [8, 32], strides = [1, 1]} : vector<8x128xf32> to vector<8x32xf32>
    %472 = math.tanh %471 : vector<8x32xf32>
    %473 = arith.mulf %469, %365 : vector<8x32xf32>
    %474 = arith.mulf %468, %472 : vector<8x32xf32>
    %475 = arith.addf %473, %474 : vector<8x32xf32>
    %476 = math.tanh %475 : vector<8x32xf32>
    %477 = arith.mulf %470, %476 : vector<8x32xf32>
    %478 = vector.extract_strided_slice %459 {offsets = [0, 128], sizes = [8, 128], strides = [1, 1]} : vector<8x256xf32> to vector<8x128xf32>
    %c0_122 = arith.constant 0 : index
    %c0_123 = arith.constant 0 : index
    %479 = vector.load %arg6[%c0_122, %c0_123] : memref<1x128xf32, #tpu.memory_space<vmem>>, vector<1x128xf32>
    %480 = vector.broadcast %479 : vector<1x128xf32> to vector<8x128xf32>
    %481 = arith.addf %478, %480 : vector<8x128xf32>
    %482 = vector.extract_strided_slice %456 {offsets = [0, 0], sizes = [8, 64], strides = [1, 1]} : vector<8x128xf32> to vector<8x64xf32>
    %483 = vector.extract_strided_slice %481 {offsets = [0, 0], sizes = [8, 64], strides = [1, 1]} : vector<8x128xf32> to vector<8x64xf32>
    %484 = arith.addf %482, %483 : vector<8x64xf32>
    %485 = arith.negf %484 : vector<8x64xf32>
    %486 = math.exp %485 : vector<8x64xf32>
    %cst_124 = arith.constant 1.000000e+00 : f32
    %487 = vector.broadcast %cst_124 : f32 to vector<8x64xf32>
    %488 = arith.addf %487, %486 : vector<8x64xf32>
    %489 = arith.divf %487, %488 : vector<8x64xf32>
    %490 = vector.extract_strided_slice %489 {offsets = [0, 0], sizes = [8, 32], strides = [1, 1]} : vector<8x64xf32> to vector<8x32xf32>
    %491 = vector.extract_strided_slice %489 {offsets = [0, 32], sizes = [8, 32], strides = [1, 1]} : vector<8x64xf32> to vector<8x32xf32>
    %492 = vector.extract_strided_slice %456 {offsets = [0, 64], sizes = [8, 32], strides = [1, 1]} : vector<8x128xf32> to vector<8x32xf32>
    %493 = vector.extract_strided_slice %481 {offsets = [0, 64], sizes = [8, 32], strides = [1, 1]} : vector<8x128xf32> to vector<8x32xf32>
    %494 = arith.mulf %490, %493 : vector<8x32xf32>
    %495 = arith.addf %492, %494 : vector<8x32xf32>
    %496 = math.tanh %495 : vector<8x32xf32>
    %cst_125 = arith.constant 1.000000e+00 : f32
    %497 = vector.broadcast %cst_125 : f32 to vector<8x32xf32>
    %498 = arith.subf %497, %491 : vector<8x32xf32>
    %499 = arith.mulf %498, %496 : vector<8x32xf32>
    %500 = arith.mulf %491, %391 : vector<8x32xf32>
    %501 = arith.addf %499, %500 : vector<8x32xf32>
    %502 = tpu.concatenate %477, %413 in 1 : vector<8x32xf32>, vector<8x32xf32> -> vector<8x64xf32>
    %c0_126 = arith.constant 0 : index
    %c0_127 = arith.constant 0 : index
    %503 = vector.load %arg7[%c0_126, %c0_127] : memref<64x128xf32, #tpu.memory_space<vmem>>, vector<64x128xf32>
    %cst_128 = arith.constant dense<0.000000e+00> : vector<8x128xf32>
    %504 = tpu.matmul %502, %503, %cst_128 {dimension_numbers = #tpu.dot_dimension_numbers<[1], [0], [0], [1], [0, 0, 1, 1], [], []>} : vector<8x64xf32>, vector<64x128xf32>, vector<8x128xf32> -> vector<8x128xf32>
    %c0_129 = arith.constant 0 : index
    %c0_130 = arith.constant 0 : index
    %505 = vector.load %arg8[%c0_129, %c0_130] : memref<1x128xf32, #tpu.memory_space<vmem>>, vector<1x128xf32>
    %506 = vector.broadcast %505 : vector<1x128xf32> to vector<8x128xf32>
    %507 = arith.addf %504, %506 : vector<8x128xf32>
    %508 = vector.extract_strided_slice %507 {offsets = [0, 0], sizes = [8, 96], strides = [1, 1]} : vector<8x128xf32> to vector<8x96xf32>
    %509 = arith.negf %508 : vector<8x96xf32>
    %510 = math.exp %509 : vector<8x96xf32>
    %cst_131 = arith.constant 1.000000e+00 : f32
    %511 = vector.broadcast %cst_131 : f32 to vector<8x96xf32>
    %512 = arith.addf %511, %510 : vector<8x96xf32>
    %513 = arith.divf %511, %512 : vector<8x96xf32>
    %514 = vector.extract_strided_slice %513 {offsets = [0, 0], sizes = [8, 32], strides = [1, 1]} : vector<8x96xf32> to vector<8x32xf32>
    %515 = vector.extract_strided_slice %513 {offsets = [0, 32], sizes = [8, 32], strides = [1, 1]} : vector<8x96xf32> to vector<8x32xf32>
    %516 = vector.extract_strided_slice %513 {offsets = [0, 64], sizes = [8, 32], strides = [1, 1]} : vector<8x96xf32> to vector<8x32xf32>
    %517 = vector.extract_strided_slice %507 {offsets = [0, 96], sizes = [8, 32], strides = [1, 1]} : vector<8x128xf32> to vector<8x32xf32>
    %518 = math.tanh %517 : vector<8x32xf32>
    %519 = arith.mulf %515, %411 : vector<8x32xf32>
    %520 = arith.mulf %514, %518 : vector<8x32xf32>
    %521 = arith.addf %519, %520 : vector<8x32xf32>
    %522 = math.tanh %521 : vector<8x32xf32>
    %523 = arith.mulf %516, %522 : vector<8x32xf32>
    %524 = tpu.concatenate %501, %444 in 1 : vector<8x32xf32>, vector<8x32xf32> -> vector<8x64xf32>
    %c0_132 = arith.constant 0 : index
    %c0_133 = arith.constant 0 : index
    %525 = vector.load %arg9[%c0_132, %c0_133] : memref<64x256xf32, #tpu.memory_space<vmem>>, vector<64x256xf32>
    %cst_134 = arith.constant dense<0.000000e+00> : vector<8x256xf32>
    %526 = tpu.matmul %524, %525, %cst_134 {dimension_numbers = #tpu.dot_dimension_numbers<[1], [0], [0], [1], [0, 0, 1, 1], [], []>} : vector<8x64xf32>, vector<64x256xf32>, vector<8x256xf32> -> vector<8x256xf32>
    %527 = vector.extract_strided_slice %526 {offsets = [0, 0], sizes = [8, 128], strides = [1, 1]} : vector<8x256xf32> to vector<8x128xf32>
    %c0_135 = arith.constant 0 : index
    %c0_136 = arith.constant 0 : index
    %528 = vector.load %arg10[%c0_135, %c0_136] : memref<1x128xf32, #tpu.memory_space<vmem>>, vector<1x128xf32>
    %529 = vector.broadcast %528 : vector<1x128xf32> to vector<8x128xf32>
    %530 = arith.addf %527, %529 : vector<8x128xf32>
    %531 = vector.extract_strided_slice %526 {offsets = [0, 128], sizes = [8, 128], strides = [1, 1]} : vector<8x256xf32> to vector<8x128xf32>
    %c0_137 = arith.constant 0 : index
    %c0_138 = arith.constant 0 : index
    %532 = vector.load %arg11[%c0_137, %c0_138] : memref<1x128xf32, #tpu.memory_space<vmem>>, vector<1x128xf32>
    %533 = vector.broadcast %532 : vector<1x128xf32> to vector<8x128xf32>
    %534 = arith.addf %531, %533 : vector<8x128xf32>
    %535 = vector.extract_strided_slice %530 {offsets = [0, 0], sizes = [8, 64], strides = [1, 1]} : vector<8x128xf32> to vector<8x64xf32>
    %536 = vector.extract_strided_slice %534 {offsets = [0, 0], sizes = [8, 64], strides = [1, 1]} : vector<8x128xf32> to vector<8x64xf32>
    %537 = arith.addf %535, %536 : vector<8x64xf32>
    %538 = arith.negf %537 : vector<8x64xf32>
    %539 = math.exp %538 : vector<8x64xf32>
    %cst_139 = arith.constant 1.000000e+00 : f32
    %540 = vector.broadcast %cst_139 : f32 to vector<8x64xf32>
    %541 = arith.addf %540, %539 : vector<8x64xf32>
    %542 = arith.divf %540, %541 : vector<8x64xf32>
    %543 = vector.extract_strided_slice %542 {offsets = [0, 0], sizes = [8, 32], strides = [1, 1]} : vector<8x64xf32> to vector<8x32xf32>
    %544 = vector.extract_strided_slice %542 {offsets = [0, 32], sizes = [8, 32], strides = [1, 1]} : vector<8x64xf32> to vector<8x32xf32>
    %545 = vector.extract_strided_slice %530 {offsets = [0, 64], sizes = [8, 32], strides = [1, 1]} : vector<8x128xf32> to vector<8x32xf32>
    %546 = vector.extract_strided_slice %534 {offsets = [0, 64], sizes = [8, 32], strides = [1, 1]} : vector<8x128xf32> to vector<8x32xf32>
    %547 = arith.mulf %543, %546 : vector<8x32xf32>
    %548 = arith.addf %545, %547 : vector<8x32xf32>
    %549 = math.tanh %548 : vector<8x32xf32>
    %cst_140 = arith.constant 1.000000e+00 : f32
    %550 = vector.broadcast %cst_140 : f32 to vector<8x32xf32>
    %551 = arith.subf %550, %544 : vector<8x32xf32>
    %552 = arith.mulf %551, %549 : vector<8x32xf32>
    %553 = arith.mulf %544, %444 : vector<8x32xf32>
    %554 = arith.addf %552, %553 : vector<8x32xf32>
    %c4_i32 = arith.constant 4 : i32
    %555 = vector.broadcast %c4_i32 : i32 to vector<8x1xi32>
    %556 = arith.cmpi eq, %13, %555 : vector<8x1xi32>
    %557 = arith.extui %556 : vector<8x1xi1> to vector<8x1xi32>
    %558 = arith.sitofp %557 : vector<8x1xi32> to vector<8x1xf32>
    %559 = vector.broadcast %558 : vector<8x1xf32> to vector<8x32xf32>
    %560 = arith.mulf %559, %523 : vector<8x32xf32>
    %561 = arith.addf %451, %560 : vector<8x32xf32>
    %562 = vector.broadcast %558 : vector<8x1xf32> to vector<8x32xf32>
    %563 = arith.mulf %562, %554 : vector<8x32xf32>
    %564 = arith.addf %454, %563 : vector<8x32xf32>
    %c40 = arith.constant 40 : index
    %c0_141 = arith.constant 0 : index
    %565 = vector.load %arg15[%c40, %c0_141] : memref<64x256xf32, #tpu.memory_space<vmem>>, vector<8x128xf32>
    %c40_142 = arith.constant 40 : index
    %c128_143 = arith.constant 128 : index
    %566 = vector.load %arg15[%c40_142, %c128_143] : memref<64x256xf32, #tpu.memory_space<vmem>>, vector<8x128xf32>
    %567 = tpu.concatenate %477, %501 in 1 : vector<8x32xf32>, vector<8x32xf32> -> vector<8x64xf32>
    %c0_144 = arith.constant 0 : index
    %c0_145 = arith.constant 0 : index
    %568 = vector.load %arg5[%c0_144, %c0_145] : memref<64x256xf32, #tpu.memory_space<vmem>>, vector<64x256xf32>
    %cst_146 = arith.constant dense<0.000000e+00> : vector<8x256xf32>
    %569 = tpu.matmul %567, %568, %cst_146 {dimension_numbers = #tpu.dot_dimension_numbers<[1], [0], [0], [1], [0, 0, 1, 1], [], []>} : vector<8x64xf32>, vector<64x256xf32>, vector<8x256xf32> -> vector<8x256xf32>
    %570 = vector.extract_strided_slice %569 {offsets = [0, 0], sizes = [8, 128], strides = [1, 1]} : vector<8x256xf32> to vector<8x128xf32>
    %571 = arith.addf %565, %570 : vector<8x128xf32>
    %572 = vector.extract_strided_slice %571 {offsets = [0, 0], sizes = [8, 96], strides = [1, 1]} : vector<8x128xf32> to vector<8x96xf32>
    %573 = arith.negf %572 : vector<8x96xf32>
    %574 = math.exp %573 : vector<8x96xf32>
    %cst_147 = arith.constant 1.000000e+00 : f32
    %575 = vector.broadcast %cst_147 : f32 to vector<8x96xf32>
    %576 = arith.addf %575, %574 : vector<8x96xf32>
    %577 = arith.divf %575, %576 : vector<8x96xf32>
    %578 = vector.extract_strided_slice %577 {offsets = [0, 0], sizes = [8, 32], strides = [1, 1]} : vector<8x96xf32> to vector<8x32xf32>
    %579 = vector.extract_strided_slice %577 {offsets = [0, 32], sizes = [8, 32], strides = [1, 1]} : vector<8x96xf32> to vector<8x32xf32>
    %580 = vector.extract_strided_slice %577 {offsets = [0, 64], sizes = [8, 32], strides = [1, 1]} : vector<8x96xf32> to vector<8x32xf32>
    %581 = vector.extract_strided_slice %571 {offsets = [0, 96], sizes = [8, 32], strides = [1, 1]} : vector<8x128xf32> to vector<8x32xf32>
    %582 = math.tanh %581 : vector<8x32xf32>
    %583 = arith.mulf %579, %475 : vector<8x32xf32>
    %584 = arith.mulf %578, %582 : vector<8x32xf32>
    %585 = arith.addf %583, %584 : vector<8x32xf32>
    %586 = math.tanh %585 : vector<8x32xf32>
    %587 = arith.mulf %580, %586 : vector<8x32xf32>
    %588 = vector.extract_strided_slice %569 {offsets = [0, 128], sizes = [8, 128], strides = [1, 1]} : vector<8x256xf32> to vector<8x128xf32>
    %c0_148 = arith.constant 0 : index
    %c0_149 = arith.constant 0 : index
    %589 = vector.load %arg6[%c0_148, %c0_149] : memref<1x128xf32, #tpu.memory_space<vmem>>, vector<1x128xf32>
    %590 = vector.broadcast %589 : vector<1x128xf32> to vector<8x128xf32>
    %591 = arith.addf %588, %590 : vector<8x128xf32>
    %592 = vector.extract_strided_slice %566 {offsets = [0, 0], sizes = [8, 64], strides = [1, 1]} : vector<8x128xf32> to vector<8x64xf32>
    %593 = vector.extract_strided_slice %591 {offsets = [0, 0], sizes = [8, 64], strides = [1, 1]} : vector<8x128xf32> to vector<8x64xf32>
    %594 = arith.addf %592, %593 : vector<8x64xf32>
    %595 = arith.negf %594 : vector<8x64xf32>
    %596 = math.exp %595 : vector<8x64xf32>
    %cst_150 = arith.constant 1.000000e+00 : f32
    %597 = vector.broadcast %cst_150 : f32 to vector<8x64xf32>
    %598 = arith.addf %597, %596 : vector<8x64xf32>
    %599 = arith.divf %597, %598 : vector<8x64xf32>
    %600 = vector.extract_strided_slice %599 {offsets = [0, 0], sizes = [8, 32], strides = [1, 1]} : vector<8x64xf32> to vector<8x32xf32>
    %601 = vector.extract_strided_slice %599 {offsets = [0, 32], sizes = [8, 32], strides = [1, 1]} : vector<8x64xf32> to vector<8x32xf32>
    %602 = vector.extract_strided_slice %566 {offsets = [0, 64], sizes = [8, 32], strides = [1, 1]} : vector<8x128xf32> to vector<8x32xf32>
    %603 = vector.extract_strided_slice %591 {offsets = [0, 64], sizes = [8, 32], strides = [1, 1]} : vector<8x128xf32> to vector<8x32xf32>
    %604 = arith.mulf %600, %603 : vector<8x32xf32>
    %605 = arith.addf %602, %604 : vector<8x32xf32>
    %606 = math.tanh %605 : vector<8x32xf32>
    %cst_151 = arith.constant 1.000000e+00 : f32
    %607 = vector.broadcast %cst_151 : f32 to vector<8x32xf32>
    %608 = arith.subf %607, %601 : vector<8x32xf32>
    %609 = arith.mulf %608, %606 : vector<8x32xf32>
    %610 = arith.mulf %601, %501 : vector<8x32xf32>
    %611 = arith.addf %609, %610 : vector<8x32xf32>
    %612 = tpu.concatenate %587, %523 in 1 : vector<8x32xf32>, vector<8x32xf32> -> vector<8x64xf32>
    %c0_152 = arith.constant 0 : index
    %c0_153 = arith.constant 0 : index
    %613 = vector.load %arg7[%c0_152, %c0_153] : memref<64x128xf32, #tpu.memory_space<vmem>>, vector<64x128xf32>
    %cst_154 = arith.constant dense<0.000000e+00> : vector<8x128xf32>
    %614 = tpu.matmul %612, %613, %cst_154 {dimension_numbers = #tpu.dot_dimension_numbers<[1], [0], [0], [1], [0, 0, 1, 1], [], []>} : vector<8x64xf32>, vector<64x128xf32>, vector<8x128xf32> -> vector<8x128xf32>
    %c0_155 = arith.constant 0 : index
    %c0_156 = arith.constant 0 : index
    %615 = vector.load %arg8[%c0_155, %c0_156] : memref<1x128xf32, #tpu.memory_space<vmem>>, vector<1x128xf32>
    %616 = vector.broadcast %615 : vector<1x128xf32> to vector<8x128xf32>
    %617 = arith.addf %614, %616 : vector<8x128xf32>
    %618 = vector.extract_strided_slice %617 {offsets = [0, 0], sizes = [8, 96], strides = [1, 1]} : vector<8x128xf32> to vector<8x96xf32>
    %619 = arith.negf %618 : vector<8x96xf32>
    %620 = math.exp %619 : vector<8x96xf32>
    %cst_157 = arith.constant 1.000000e+00 : f32
    %621 = vector.broadcast %cst_157 : f32 to vector<8x96xf32>
    %622 = arith.addf %621, %620 : vector<8x96xf32>
    %623 = arith.divf %621, %622 : vector<8x96xf32>
    %624 = vector.extract_strided_slice %623 {offsets = [0, 0], sizes = [8, 32], strides = [1, 1]} : vector<8x96xf32> to vector<8x32xf32>
    %625 = vector.extract_strided_slice %623 {offsets = [0, 32], sizes = [8, 32], strides = [1, 1]} : vector<8x96xf32> to vector<8x32xf32>
    %626 = vector.extract_strided_slice %623 {offsets = [0, 64], sizes = [8, 32], strides = [1, 1]} : vector<8x96xf32> to vector<8x32xf32>
    %627 = vector.extract_strided_slice %617 {offsets = [0, 96], sizes = [8, 32], strides = [1, 1]} : vector<8x128xf32> to vector<8x32xf32>
    %628 = math.tanh %627 : vector<8x32xf32>
    %629 = arith.mulf %625, %521 : vector<8x32xf32>
    %630 = arith.mulf %624, %628 : vector<8x32xf32>
    %631 = arith.addf %629, %630 : vector<8x32xf32>
    %632 = math.tanh %631 : vector<8x32xf32>
    %633 = arith.mulf %626, %632 : vector<8x32xf32>
    %634 = tpu.concatenate %611, %554 in 1 : vector<8x32xf32>, vector<8x32xf32> -> vector<8x64xf32>
    %c0_158 = arith.constant 0 : index
    %c0_159 = arith.constant 0 : index
    %635 = vector.load %arg9[%c0_158, %c0_159] : memref<64x256xf32, #tpu.memory_space<vmem>>, vector<64x256xf32>
    %cst_160 = arith.constant dense<0.000000e+00> : vector<8x256xf32>
    %636 = tpu.matmul %634, %635, %cst_160 {dimension_numbers = #tpu.dot_dimension_numbers<[1], [0], [0], [1], [0, 0, 1, 1], [], []>} : vector<8x64xf32>, vector<64x256xf32>, vector<8x256xf32> -> vector<8x256xf32>
    %637 = vector.extract_strided_slice %636 {offsets = [0, 0], sizes = [8, 128], strides = [1, 1]} : vector<8x256xf32> to vector<8x128xf32>
    %c0_161 = arith.constant 0 : index
    %c0_162 = arith.constant 0 : index
    %638 = vector.load %arg10[%c0_161, %c0_162] : memref<1x128xf32, #tpu.memory_space<vmem>>, vector<1x128xf32>
    %639 = vector.broadcast %638 : vector<1x128xf32> to vector<8x128xf32>
    %640 = arith.addf %637, %639 : vector<8x128xf32>
    %641 = vector.extract_strided_slice %636 {offsets = [0, 128], sizes = [8, 128], strides = [1, 1]} : vector<8x256xf32> to vector<8x128xf32>
    %c0_163 = arith.constant 0 : index
    %c0_164 = arith.constant 0 : index
    %642 = vector.load %arg11[%c0_163, %c0_164] : memref<1x128xf32, #tpu.memory_space<vmem>>, vector<1x128xf32>
    %643 = vector.broadcast %642 : vector<1x128xf32> to vector<8x128xf32>
    %644 = arith.addf %641, %643 : vector<8x128xf32>
    %645 = vector.extract_strided_slice %640 {offsets = [0, 0], sizes = [8, 64], strides = [1, 1]} : vector<8x128xf32> to vector<8x64xf32>
    %646 = vector.extract_strided_slice %644 {offsets = [0, 0], sizes = [8, 64], strides = [1, 1]} : vector<8x128xf32> to vector<8x64xf32>
    %647 = arith.addf %645, %646 : vector<8x64xf32>
    %648 = arith.negf %647 : vector<8x64xf32>
    %649 = math.exp %648 : vector<8x64xf32>
    %cst_165 = arith.constant 1.000000e+00 : f32
    %650 = vector.broadcast %cst_165 : f32 to vector<8x64xf32>
    %651 = arith.addf %650, %649 : vector<8x64xf32>
    %652 = arith.divf %650, %651 : vector<8x64xf32>
    %653 = vector.extract_strided_slice %652 {offsets = [0, 0], sizes = [8, 32], strides = [1, 1]} : vector<8x64xf32> to vector<8x32xf32>
    %654 = vector.extract_strided_slice %652 {offsets = [0, 32], sizes = [8, 32], strides = [1, 1]} : vector<8x64xf32> to vector<8x32xf32>
    %655 = vector.extract_strided_slice %640 {offsets = [0, 64], sizes = [8, 32], strides = [1, 1]} : vector<8x128xf32> to vector<8x32xf32>
    %656 = vector.extract_strided_slice %644 {offsets = [0, 64], sizes = [8, 32], strides = [1, 1]} : vector<8x128xf32> to vector<8x32xf32>
    %657 = arith.mulf %653, %656 : vector<8x32xf32>
    %658 = arith.addf %655, %657 : vector<8x32xf32>
    %659 = math.tanh %658 : vector<8x32xf32>
    %cst_166 = arith.constant 1.000000e+00 : f32
    %660 = vector.broadcast %cst_166 : f32 to vector<8x32xf32>
    %661 = arith.subf %660, %654 : vector<8x32xf32>
    %662 = arith.mulf %661, %659 : vector<8x32xf32>
    %663 = arith.mulf %654, %554 : vector<8x32xf32>
    %664 = arith.addf %662, %663 : vector<8x32xf32>
    %c5_i32 = arith.constant 5 : i32
    %665 = vector.broadcast %c5_i32 : i32 to vector<8x1xi32>
    %666 = arith.cmpi eq, %13, %665 : vector<8x1xi32>
    %667 = arith.extui %666 : vector<8x1xi1> to vector<8x1xi32>
    %668 = arith.sitofp %667 : vector<8x1xi32> to vector<8x1xf32>
    %669 = vector.broadcast %668 : vector<8x1xf32> to vector<8x32xf32>
    %670 = arith.mulf %669, %633 : vector<8x32xf32>
    %671 = arith.addf %561, %670 : vector<8x32xf32>
    %672 = vector.broadcast %668 : vector<8x1xf32> to vector<8x32xf32>
    %673 = arith.mulf %672, %664 : vector<8x32xf32>
    %674 = arith.addf %564, %673 : vector<8x32xf32>
    %c48 = arith.constant 48 : index
    %c0_167 = arith.constant 0 : index
    %675 = vector.load %arg15[%c48, %c0_167] : memref<64x256xf32, #tpu.memory_space<vmem>>, vector<8x128xf32>
    %c48_168 = arith.constant 48 : index
    %c128_169 = arith.constant 128 : index
    %676 = vector.load %arg15[%c48_168, %c128_169] : memref<64x256xf32, #tpu.memory_space<vmem>>, vector<8x128xf32>
    %677 = tpu.concatenate %587, %611 in 1 : vector<8x32xf32>, vector<8x32xf32> -> vector<8x64xf32>
    %c0_170 = arith.constant 0 : index
    %c0_171 = arith.constant 0 : index
    %678 = vector.load %arg5[%c0_170, %c0_171] : memref<64x256xf32, #tpu.memory_space<vmem>>, vector<64x256xf32>
    %cst_172 = arith.constant dense<0.000000e+00> : vector<8x256xf32>
    %679 = tpu.matmul %677, %678, %cst_172 {dimension_numbers = #tpu.dot_dimension_numbers<[1], [0], [0], [1], [0, 0, 1, 1], [], []>} : vector<8x64xf32>, vector<64x256xf32>, vector<8x256xf32> -> vector<8x256xf32>
    %680 = vector.extract_strided_slice %679 {offsets = [0, 0], sizes = [8, 128], strides = [1, 1]} : vector<8x256xf32> to vector<8x128xf32>
    %681 = arith.addf %675, %680 : vector<8x128xf32>
    %682 = vector.extract_strided_slice %681 {offsets = [0, 0], sizes = [8, 96], strides = [1, 1]} : vector<8x128xf32> to vector<8x96xf32>
    %683 = arith.negf %682 : vector<8x96xf32>
    %684 = math.exp %683 : vector<8x96xf32>
    %cst_173 = arith.constant 1.000000e+00 : f32
    %685 = vector.broadcast %cst_173 : f32 to vector<8x96xf32>
    %686 = arith.addf %685, %684 : vector<8x96xf32>
    %687 = arith.divf %685, %686 : vector<8x96xf32>
    %688 = vector.extract_strided_slice %687 {offsets = [0, 0], sizes = [8, 32], strides = [1, 1]} : vector<8x96xf32> to vector<8x32xf32>
    %689 = vector.extract_strided_slice %687 {offsets = [0, 32], sizes = [8, 32], strides = [1, 1]} : vector<8x96xf32> to vector<8x32xf32>
    %690 = vector.extract_strided_slice %687 {offsets = [0, 64], sizes = [8, 32], strides = [1, 1]} : vector<8x96xf32> to vector<8x32xf32>
    %691 = vector.extract_strided_slice %681 {offsets = [0, 96], sizes = [8, 32], strides = [1, 1]} : vector<8x128xf32> to vector<8x32xf32>
    %692 = math.tanh %691 : vector<8x32xf32>
    %693 = arith.mulf %689, %585 : vector<8x32xf32>
    %694 = arith.mulf %688, %692 : vector<8x32xf32>
    %695 = arith.addf %693, %694 : vector<8x32xf32>
    %696 = math.tanh %695 : vector<8x32xf32>
    %697 = arith.mulf %690, %696 : vector<8x32xf32>
    %698 = vector.extract_strided_slice %679 {offsets = [0, 128], sizes = [8, 128], strides = [1, 1]} : vector<8x256xf32> to vector<8x128xf32>
    %c0_174 = arith.constant 0 : index
    %c0_175 = arith.constant 0 : index
    %699 = vector.load %arg6[%c0_174, %c0_175] : memref<1x128xf32, #tpu.memory_space<vmem>>, vector<1x128xf32>
    %700 = vector.broadcast %699 : vector<1x128xf32> to vector<8x128xf32>
    %701 = arith.addf %698, %700 : vector<8x128xf32>
    %702 = vector.extract_strided_slice %676 {offsets = [0, 0], sizes = [8, 64], strides = [1, 1]} : vector<8x128xf32> to vector<8x64xf32>
    %703 = vector.extract_strided_slice %701 {offsets = [0, 0], sizes = [8, 64], strides = [1, 1]} : vector<8x128xf32> to vector<8x64xf32>
    %704 = arith.addf %702, %703 : vector<8x64xf32>
    %705 = arith.negf %704 : vector<8x64xf32>
    %706 = math.exp %705 : vector<8x64xf32>
    %cst_176 = arith.constant 1.000000e+00 : f32
    %707 = vector.broadcast %cst_176 : f32 to vector<8x64xf32>
    %708 = arith.addf %707, %706 : vector<8x64xf32>
    %709 = arith.divf %707, %708 : vector<8x64xf32>
    %710 = vector.extract_strided_slice %709 {offsets = [0, 0], sizes = [8, 32], strides = [1, 1]} : vector<8x64xf32> to vector<8x32xf32>
    %711 = vector.extract_strided_slice %709 {offsets = [0, 32], sizes = [8, 32], strides = [1, 1]} : vector<8x64xf32> to vector<8x32xf32>
    %712 = vector.extract_strided_slice %676 {offsets = [0, 64], sizes = [8, 32], strides = [1, 1]} : vector<8x128xf32> to vector<8x32xf32>
    %713 = vector.extract_strided_slice %701 {offsets = [0, 64], sizes = [8, 32], strides = [1, 1]} : vector<8x128xf32> to vector<8x32xf32>
    %714 = arith.mulf %710, %713 : vector<8x32xf32>
    %715 = arith.addf %712, %714 : vector<8x32xf32>
    %716 = math.tanh %715 : vector<8x32xf32>
    %cst_177 = arith.constant 1.000000e+00 : f32
    %717 = vector.broadcast %cst_177 : f32 to vector<8x32xf32>
    %718 = arith.subf %717, %711 : vector<8x32xf32>
    %719 = arith.mulf %718, %716 : vector<8x32xf32>
    %720 = arith.mulf %711, %611 : vector<8x32xf32>
    %721 = arith.addf %719, %720 : vector<8x32xf32>
    %722 = tpu.concatenate %697, %633 in 1 : vector<8x32xf32>, vector<8x32xf32> -> vector<8x64xf32>
    %c0_178 = arith.constant 0 : index
    %c0_179 = arith.constant 0 : index
    %723 = vector.load %arg7[%c0_178, %c0_179] : memref<64x128xf32, #tpu.memory_space<vmem>>, vector<64x128xf32>
    %cst_180 = arith.constant dense<0.000000e+00> : vector<8x128xf32>
    %724 = tpu.matmul %722, %723, %cst_180 {dimension_numbers = #tpu.dot_dimension_numbers<[1], [0], [0], [1], [0, 0, 1, 1], [], []>} : vector<8x64xf32>, vector<64x128xf32>, vector<8x128xf32> -> vector<8x128xf32>
    %c0_181 = arith.constant 0 : index
    %c0_182 = arith.constant 0 : index
    %725 = vector.load %arg8[%c0_181, %c0_182] : memref<1x128xf32, #tpu.memory_space<vmem>>, vector<1x128xf32>
    %726 = vector.broadcast %725 : vector<1x128xf32> to vector<8x128xf32>
    %727 = arith.addf %724, %726 : vector<8x128xf32>
    %728 = vector.extract_strided_slice %727 {offsets = [0, 0], sizes = [8, 96], strides = [1, 1]} : vector<8x128xf32> to vector<8x96xf32>
    %729 = arith.negf %728 : vector<8x96xf32>
    %730 = math.exp %729 : vector<8x96xf32>
    %cst_183 = arith.constant 1.000000e+00 : f32
    %731 = vector.broadcast %cst_183 : f32 to vector<8x96xf32>
    %732 = arith.addf %731, %730 : vector<8x96xf32>
    %733 = arith.divf %731, %732 : vector<8x96xf32>
    %734 = vector.extract_strided_slice %733 {offsets = [0, 0], sizes = [8, 32], strides = [1, 1]} : vector<8x96xf32> to vector<8x32xf32>
    %735 = vector.extract_strided_slice %733 {offsets = [0, 32], sizes = [8, 32], strides = [1, 1]} : vector<8x96xf32> to vector<8x32xf32>
    %736 = vector.extract_strided_slice %733 {offsets = [0, 64], sizes = [8, 32], strides = [1, 1]} : vector<8x96xf32> to vector<8x32xf32>
    %737 = vector.extract_strided_slice %727 {offsets = [0, 96], sizes = [8, 32], strides = [1, 1]} : vector<8x128xf32> to vector<8x32xf32>
    %738 = math.tanh %737 : vector<8x32xf32>
    %739 = arith.mulf %735, %631 : vector<8x32xf32>
    %740 = arith.mulf %734, %738 : vector<8x32xf32>
    %741 = arith.addf %739, %740 : vector<8x32xf32>
    %742 = math.tanh %741 : vector<8x32xf32>
    %743 = arith.mulf %736, %742 : vector<8x32xf32>
    %744 = tpu.concatenate %721, %664 in 1 : vector<8x32xf32>, vector<8x32xf32> -> vector<8x64xf32>
    %c0_184 = arith.constant 0 : index
    %c0_185 = arith.constant 0 : index
    %745 = vector.load %arg9[%c0_184, %c0_185] : memref<64x256xf32, #tpu.memory_space<vmem>>, vector<64x256xf32>
    %cst_186 = arith.constant dense<0.000000e+00> : vector<8x256xf32>
    %746 = tpu.matmul %744, %745, %cst_186 {dimension_numbers = #tpu.dot_dimension_numbers<[1], [0], [0], [1], [0, 0, 1, 1], [], []>} : vector<8x64xf32>, vector<64x256xf32>, vector<8x256xf32> -> vector<8x256xf32>
    %747 = vector.extract_strided_slice %746 {offsets = [0, 0], sizes = [8, 128], strides = [1, 1]} : vector<8x256xf32> to vector<8x128xf32>
    %c0_187 = arith.constant 0 : index
    %c0_188 = arith.constant 0 : index
    %748 = vector.load %arg10[%c0_187, %c0_188] : memref<1x128xf32, #tpu.memory_space<vmem>>, vector<1x128xf32>
    %749 = vector.broadcast %748 : vector<1x128xf32> to vector<8x128xf32>
    %750 = arith.addf %747, %749 : vector<8x128xf32>
    %751 = vector.extract_strided_slice %746 {offsets = [0, 128], sizes = [8, 128], strides = [1, 1]} : vector<8x256xf32> to vector<8x128xf32>
    %c0_189 = arith.constant 0 : index
    %c0_190 = arith.constant 0 : index
    %752 = vector.load %arg11[%c0_189, %c0_190] : memref<1x128xf32, #tpu.memory_space<vmem>>, vector<1x128xf32>
    %753 = vector.broadcast %752 : vector<1x128xf32> to vector<8x128xf32>
    %754 = arith.addf %751, %753 : vector<8x128xf32>
    %755 = vector.extract_strided_slice %750 {offsets = [0, 0], sizes = [8, 64], strides = [1, 1]} : vector<8x128xf32> to vector<8x64xf32>
    %756 = vector.extract_strided_slice %754 {offsets = [0, 0], sizes = [8, 64], strides = [1, 1]} : vector<8x128xf32> to vector<8x64xf32>
    %757 = arith.addf %755, %756 : vector<8x64xf32>
    %758 = arith.negf %757 : vector<8x64xf32>
    %759 = math.exp %758 : vector<8x64xf32>
    %cst_191 = arith.constant 1.000000e+00 : f32
    %760 = vector.broadcast %cst_191 : f32 to vector<8x64xf32>
    %761 = arith.addf %760, %759 : vector<8x64xf32>
    %762 = arith.divf %760, %761 : vector<8x64xf32>
    %763 = vector.extract_strided_slice %762 {offsets = [0, 0], sizes = [8, 32], strides = [1, 1]} : vector<8x64xf32> to vector<8x32xf32>
    %764 = vector.extract_strided_slice %762 {offsets = [0, 32], sizes = [8, 32], strides = [1, 1]} : vector<8x64xf32> to vector<8x32xf32>
    %765 = vector.extract_strided_slice %750 {offsets = [0, 64], sizes = [8, 32], strides = [1, 1]} : vector<8x128xf32> to vector<8x32xf32>
    %766 = vector.extract_strided_slice %754 {offsets = [0, 64], sizes = [8, 32], strides = [1, 1]} : vector<8x128xf32> to vector<8x32xf32>
    %767 = arith.mulf %763, %766 : vector<8x32xf32>
    %768 = arith.addf %765, %767 : vector<8x32xf32>
    %769 = math.tanh %768 : vector<8x32xf32>
    %cst_192 = arith.constant 1.000000e+00 : f32
    %770 = vector.broadcast %cst_192 : f32 to vector<8x32xf32>
    %771 = arith.subf %770, %764 : vector<8x32xf32>
    %772 = arith.mulf %771, %769 : vector<8x32xf32>
    %773 = arith.mulf %764, %664 : vector<8x32xf32>
    %774 = arith.addf %772, %773 : vector<8x32xf32>
    %c6_i32 = arith.constant 6 : i32
    %775 = vector.broadcast %c6_i32 : i32 to vector<8x1xi32>
    %776 = arith.cmpi eq, %13, %775 : vector<8x1xi32>
    %777 = arith.extui %776 : vector<8x1xi1> to vector<8x1xi32>
    %778 = arith.sitofp %777 : vector<8x1xi32> to vector<8x1xf32>
    %779 = vector.broadcast %778 : vector<8x1xf32> to vector<8x32xf32>
    %780 = arith.mulf %779, %743 : vector<8x32xf32>
    %781 = arith.addf %671, %780 : vector<8x32xf32>
    %782 = vector.broadcast %778 : vector<8x1xf32> to vector<8x32xf32>
    %783 = arith.mulf %782, %774 : vector<8x32xf32>
    %784 = arith.addf %674, %783 : vector<8x32xf32>
    %c56 = arith.constant 56 : index
    %c0_193 = arith.constant 0 : index
    %785 = vector.load %arg15[%c56, %c0_193] : memref<64x256xf32, #tpu.memory_space<vmem>>, vector<8x128xf32>
    %c56_194 = arith.constant 56 : index
    %c128_195 = arith.constant 128 : index
    %786 = vector.load %arg15[%c56_194, %c128_195] : memref<64x256xf32, #tpu.memory_space<vmem>>, vector<8x128xf32>
    %787 = tpu.concatenate %697, %721 in 1 : vector<8x32xf32>, vector<8x32xf32> -> vector<8x64xf32>
    %c0_196 = arith.constant 0 : index
    %c0_197 = arith.constant 0 : index
    %788 = vector.load %arg5[%c0_196, %c0_197] : memref<64x256xf32, #tpu.memory_space<vmem>>, vector<64x256xf32>
    %cst_198 = arith.constant dense<0.000000e+00> : vector<8x256xf32>
    %789 = tpu.matmul %787, %788, %cst_198 {dimension_numbers = #tpu.dot_dimension_numbers<[1], [0], [0], [1], [0, 0, 1, 1], [], []>} : vector<8x64xf32>, vector<64x256xf32>, vector<8x256xf32> -> vector<8x256xf32>
    %790 = vector.extract_strided_slice %789 {offsets = [0, 0], sizes = [8, 128], strides = [1, 1]} : vector<8x256xf32> to vector<8x128xf32>
    %791 = arith.addf %785, %790 : vector<8x128xf32>
    %792 = vector.extract_strided_slice %791 {offsets = [0, 0], sizes = [8, 96], strides = [1, 1]} : vector<8x128xf32> to vector<8x96xf32>
    %793 = arith.negf %792 : vector<8x96xf32>
    %794 = math.exp %793 : vector<8x96xf32>
    %cst_199 = arith.constant 1.000000e+00 : f32
    %795 = vector.broadcast %cst_199 : f32 to vector<8x96xf32>
    %796 = arith.addf %795, %794 : vector<8x96xf32>
    %797 = arith.divf %795, %796 : vector<8x96xf32>
    %798 = vector.extract_strided_slice %797 {offsets = [0, 0], sizes = [8, 32], strides = [1, 1]} : vector<8x96xf32> to vector<8x32xf32>
    %799 = vector.extract_strided_slice %797 {offsets = [0, 32], sizes = [8, 32], strides = [1, 1]} : vector<8x96xf32> to vector<8x32xf32>
    %800 = vector.extract_strided_slice %797 {offsets = [0, 64], sizes = [8, 32], strides = [1, 1]} : vector<8x96xf32> to vector<8x32xf32>
    %801 = vector.extract_strided_slice %791 {offsets = [0, 96], sizes = [8, 32], strides = [1, 1]} : vector<8x128xf32> to vector<8x32xf32>
    %802 = math.tanh %801 : vector<8x32xf32>
    %803 = arith.mulf %799, %695 : vector<8x32xf32>
    %804 = arith.mulf %798, %802 : vector<8x32xf32>
    %805 = arith.addf %803, %804 : vector<8x32xf32>
    %806 = math.tanh %805 : vector<8x32xf32>
    %807 = arith.mulf %800, %806 : vector<8x32xf32>
    %808 = vector.extract_strided_slice %789 {offsets = [0, 128], sizes = [8, 128], strides = [1, 1]} : vector<8x256xf32> to vector<8x128xf32>
    %c0_200 = arith.constant 0 : index
    %c0_201 = arith.constant 0 : index
    %809 = vector.load %arg6[%c0_200, %c0_201] : memref<1x128xf32, #tpu.memory_space<vmem>>, vector<1x128xf32>
    %810 = vector.broadcast %809 : vector<1x128xf32> to vector<8x128xf32>
    %811 = arith.addf %808, %810 : vector<8x128xf32>
    %812 = vector.extract_strided_slice %786 {offsets = [0, 0], sizes = [8, 64], strides = [1, 1]} : vector<8x128xf32> to vector<8x64xf32>
    %813 = vector.extract_strided_slice %811 {offsets = [0, 0], sizes = [8, 64], strides = [1, 1]} : vector<8x128xf32> to vector<8x64xf32>
    %814 = arith.addf %812, %813 : vector<8x64xf32>
    %815 = arith.negf %814 : vector<8x64xf32>
    %816 = math.exp %815 : vector<8x64xf32>
    %cst_202 = arith.constant 1.000000e+00 : f32
    %817 = vector.broadcast %cst_202 : f32 to vector<8x64xf32>
    %818 = arith.addf %817, %816 : vector<8x64xf32>
    %819 = arith.divf %817, %818 : vector<8x64xf32>
    %820 = vector.extract_strided_slice %819 {offsets = [0, 0], sizes = [8, 32], strides = [1, 1]} : vector<8x64xf32> to vector<8x32xf32>
    %821 = vector.extract_strided_slice %819 {offsets = [0, 32], sizes = [8, 32], strides = [1, 1]} : vector<8x64xf32> to vector<8x32xf32>
    %822 = vector.extract_strided_slice %786 {offsets = [0, 64], sizes = [8, 32], strides = [1, 1]} : vector<8x128xf32> to vector<8x32xf32>
    %823 = vector.extract_strided_slice %811 {offsets = [0, 64], sizes = [8, 32], strides = [1, 1]} : vector<8x128xf32> to vector<8x32xf32>
    %824 = arith.mulf %820, %823 : vector<8x32xf32>
    %825 = arith.addf %822, %824 : vector<8x32xf32>
    %826 = math.tanh %825 : vector<8x32xf32>
    %cst_203 = arith.constant 1.000000e+00 : f32
    %827 = vector.broadcast %cst_203 : f32 to vector<8x32xf32>
    %828 = arith.subf %827, %821 : vector<8x32xf32>
    %829 = arith.mulf %828, %826 : vector<8x32xf32>
    %830 = arith.mulf %821, %721 : vector<8x32xf32>
    %831 = arith.addf %829, %830 : vector<8x32xf32>
    %832 = tpu.concatenate %807, %743 in 1 : vector<8x32xf32>, vector<8x32xf32> -> vector<8x64xf32>
    %c0_204 = arith.constant 0 : index
    %c0_205 = arith.constant 0 : index
    %833 = vector.load %arg7[%c0_204, %c0_205] : memref<64x128xf32, #tpu.memory_space<vmem>>, vector<64x128xf32>
    %cst_206 = arith.constant dense<0.000000e+00> : vector<8x128xf32>
    %834 = tpu.matmul %832, %833, %cst_206 {dimension_numbers = #tpu.dot_dimension_numbers<[1], [0], [0], [1], [0, 0, 1, 1], [], []>} : vector<8x64xf32>, vector<64x128xf32>, vector<8x128xf32> -> vector<8x128xf32>
    %c0_207 = arith.constant 0 : index
    %c0_208 = arith.constant 0 : index
    %835 = vector.load %arg8[%c0_207, %c0_208] : memref<1x128xf32, #tpu.memory_space<vmem>>, vector<1x128xf32>
    %836 = vector.broadcast %835 : vector<1x128xf32> to vector<8x128xf32>
    %837 = arith.addf %834, %836 : vector<8x128xf32>
    %838 = vector.extract_strided_slice %837 {offsets = [0, 0], sizes = [8, 96], strides = [1, 1]} : vector<8x128xf32> to vector<8x96xf32>
    %839 = arith.negf %838 : vector<8x96xf32>
    %840 = math.exp %839 : vector<8x96xf32>
    %cst_209 = arith.constant 1.000000e+00 : f32
    %841 = vector.broadcast %cst_209 : f32 to vector<8x96xf32>
    %842 = arith.addf %841, %840 : vector<8x96xf32>
    %843 = arith.divf %841, %842 : vector<8x96xf32>
    %844 = vector.extract_strided_slice %843 {offsets = [0, 0], sizes = [8, 32], strides = [1, 1]} : vector<8x96xf32> to vector<8x32xf32>
    %845 = vector.extract_strided_slice %843 {offsets = [0, 32], sizes = [8, 32], strides = [1, 1]} : vector<8x96xf32> to vector<8x32xf32>
    %846 = vector.extract_strided_slice %843 {offsets = [0, 64], sizes = [8, 32], strides = [1, 1]} : vector<8x96xf32> to vector<8x32xf32>
    %847 = vector.extract_strided_slice %837 {offsets = [0, 96], sizes = [8, 32], strides = [1, 1]} : vector<8x128xf32> to vector<8x32xf32>
    %848 = math.tanh %847 : vector<8x32xf32>
    %849 = arith.mulf %845, %741 : vector<8x32xf32>
    %850 = arith.mulf %844, %848 : vector<8x32xf32>
    %851 = arith.addf %849, %850 : vector<8x32xf32>
    %852 = math.tanh %851 : vector<8x32xf32>
    %853 = arith.mulf %846, %852 : vector<8x32xf32>
    %854 = tpu.concatenate %831, %774 in 1 : vector<8x32xf32>, vector<8x32xf32> -> vector<8x64xf32>
    %c0_210 = arith.constant 0 : index
    %c0_211 = arith.constant 0 : index
    %855 = vector.load %arg9[%c0_210, %c0_211] : memref<64x256xf32, #tpu.memory_space<vmem>>, vector<64x256xf32>
    %cst_212 = arith.constant dense<0.000000e+00> : vector<8x256xf32>
    %856 = tpu.matmul %854, %855, %cst_212 {dimension_numbers = #tpu.dot_dimension_numbers<[1], [0], [0], [1], [0, 0, 1, 1], [], []>} : vector<8x64xf32>, vector<64x256xf32>, vector<8x256xf32> -> vector<8x256xf32>
    %857 = vector.extract_strided_slice %856 {offsets = [0, 0], sizes = [8, 128], strides = [1, 1]} : vector<8x256xf32> to vector<8x128xf32>
    %c0_213 = arith.constant 0 : index
    %c0_214 = arith.constant 0 : index
    %858 = vector.load %arg10[%c0_213, %c0_214] : memref<1x128xf32, #tpu.memory_space<vmem>>, vector<1x128xf32>
    %859 = vector.broadcast %858 : vector<1x128xf32> to vector<8x128xf32>
    %860 = arith.addf %857, %859 : vector<8x128xf32>
    %861 = vector.extract_strided_slice %856 {offsets = [0, 128], sizes = [8, 128], strides = [1, 1]} : vector<8x256xf32> to vector<8x128xf32>
    %c0_215 = arith.constant 0 : index
    %c0_216 = arith.constant 0 : index
    %862 = vector.load %arg11[%c0_215, %c0_216] : memref<1x128xf32, #tpu.memory_space<vmem>>, vector<1x128xf32>
    %863 = vector.broadcast %862 : vector<1x128xf32> to vector<8x128xf32>
    %864 = arith.addf %861, %863 : vector<8x128xf32>
    %865 = vector.extract_strided_slice %860 {offsets = [0, 0], sizes = [8, 64], strides = [1, 1]} : vector<8x128xf32> to vector<8x64xf32>
    %866 = vector.extract_strided_slice %864 {offsets = [0, 0], sizes = [8, 64], strides = [1, 1]} : vector<8x128xf32> to vector<8x64xf32>
    %867 = arith.addf %865, %866 : vector<8x64xf32>
    %868 = arith.negf %867 : vector<8x64xf32>
    %869 = math.exp %868 : vector<8x64xf32>
    %cst_217 = arith.constant 1.000000e+00 : f32
    %870 = vector.broadcast %cst_217 : f32 to vector<8x64xf32>
    %871 = arith.addf %870, %869 : vector<8x64xf32>
    %872 = arith.divf %870, %871 : vector<8x64xf32>
    %873 = vector.extract_strided_slice %872 {offsets = [0, 0], sizes = [8, 32], strides = [1, 1]} : vector<8x64xf32> to vector<8x32xf32>
    %874 = vector.extract_strided_slice %872 {offsets = [0, 32], sizes = [8, 32], strides = [1, 1]} : vector<8x64xf32> to vector<8x32xf32>
    %875 = vector.extract_strided_slice %860 {offsets = [0, 64], sizes = [8, 32], strides = [1, 1]} : vector<8x128xf32> to vector<8x32xf32>
    %876 = vector.extract_strided_slice %864 {offsets = [0, 64], sizes = [8, 32], strides = [1, 1]} : vector<8x128xf32> to vector<8x32xf32>
    %877 = arith.mulf %873, %876 : vector<8x32xf32>
    %878 = arith.addf %875, %877 : vector<8x32xf32>
    %879 = math.tanh %878 : vector<8x32xf32>
    %cst_218 = arith.constant 1.000000e+00 : f32
    %880 = vector.broadcast %cst_218 : f32 to vector<8x32xf32>
    %881 = arith.subf %880, %874 : vector<8x32xf32>
    %882 = arith.mulf %881, %879 : vector<8x32xf32>
    %883 = arith.mulf %874, %774 : vector<8x32xf32>
    %884 = arith.addf %882, %883 : vector<8x32xf32>
    %c7_i32 = arith.constant 7 : i32
    %885 = vector.broadcast %c7_i32 : i32 to vector<8x1xi32>
    %886 = arith.cmpi eq, %13, %885 : vector<8x1xi32>
    %887 = arith.extui %886 : vector<8x1xi1> to vector<8x1xi32>
    %888 = arith.sitofp %887 : vector<8x1xi32> to vector<8x1xf32>
    %889 = vector.broadcast %888 : vector<8x1xf32> to vector<8x32xf32>
    %890 = arith.mulf %889, %853 : vector<8x32xf32>
    %891 = arith.addf %781, %890 : vector<8x32xf32>
    %892 = vector.broadcast %888 : vector<8x1xf32> to vector<8x32xf32>
    %893 = arith.mulf %892, %884 : vector<8x32xf32>
    %894 = arith.addf %784, %893 : vector<8x32xf32>
    %895 = tpu.concatenate %891, %894 in 1 : vector<8x32xf32>, vector<8x32xf32> -> vector<8x64xf32>
    %c0_219 = arith.constant 0 : index
    %c0_220 = arith.constant 0 : index
    %896 = vector.load %arg12[%c0_219, %c0_220] : memref<64x32xf32, #tpu.memory_space<vmem>>, vector<64x32xf32>
    %cst_221 = arith.constant dense<0.000000e+00> : vector<8x32xf32>
    %897 = tpu.matmul %895, %896, %cst_221 {dimension_numbers = #tpu.dot_dimension_numbers<[1], [0], [0], [1], [0, 0, 1, 1], [], []>} : vector<8x64xf32>, vector<64x32xf32>, vector<8x32xf32> -> vector<8x32xf32>
    %c0_222 = arith.constant 0 : index
    %c0_223 = arith.constant 0 : index
    %898 = vector.load %arg13[%c0_222, %c0_223] : memref<1x32xf32, #tpu.memory_space<vmem>>, vector<1x32xf32>
    %899 = vector.broadcast %898 : vector<1x32xf32> to vector<8x32xf32>
    %900 = arith.addf %897, %899 : vector<8x32xf32>
    %c0_224 = arith.constant 0 : index
    %c0_225 = arith.constant 0 : index
    %901 = vector.load %arg14[%c0_224, %c0_225] : memref<8x32xf32, #tpu.memory_space<vmem>>, vector<8x32xf32>
    tpu.vector_store %arg14[%c0_224, %c0_225], %900 {strides = array<i32>} : memref<8x32xf32, #tpu.memory_space<vmem>>, vector<8x32xf32>,
    return
  }
  func.func @transform_0(%arg0: i32) -> (i32, i32, i32) {
    %c0_i32 = arith.constant 0 : i32
    %c0_i32_0 = arith.constant 0 : i32
    %c0_i32_1 = arith.constant 0 : i32
    return %arg0, %c0_i32, %c0_i32_0 : i32, i32, i32
  }
  func.func @transform_1(%arg0: i32) -> (i32, i32) {
    %c0_i32 = arith.constant 0 : i32
    %c0_i32_0 = arith.constant 0 : i32
    return %arg0, %c0_i32 : i32, i32
  }
  func.func @transform_2(%arg0: i32) -> (i32, i32) {
    %c0_i32 = arith.constant 0 : i32
    %c0_i32_0 = arith.constant 0 : i32
    %c0_i32_1 = arith.constant 0 : i32
    return %c0_i32, %c0_i32_0 : i32, i32
  }
  func.func @transform_3(%arg0: i32) -> (i32, i32) {
    %c0_i32 = arith.constant 0 : i32
    %c0_i32_0 = arith.constant 0 : i32
    %c0_i32_1 = arith.constant 0 : i32
    return %c0_i32, %c0_i32_0 : i32, i32
  }
  func.func @transform_4(%arg0: i32) -> (i32, i32) {
    %c0_i32 = arith.constant 0 : i32
    %c0_i32_0 = arith.constant 0 : i32
    %c0_i32_1 = arith.constant 0 : i32
    return %c0_i32, %c0_i32_0 : i32, i32
  }
  func.func @transform_5(%arg0: i32) -> (i32, i32) {
    %c0_i32 = arith.constant 0 : i32
    %c0_i32_0 = arith.constant 0 : i32
    %c0_i32_1 = arith.constant 0 : i32
    return %c0_i32, %c0_i32_0 : i32, i32
  }
  func.func @transform_6(%arg0: i32) -> (i32, i32) {
    %c0_i32 = arith.constant 0 : i32
    %c0_i32_0 = arith.constant 0 : i32
    %c0_i32_1 = arith.constant 0 : i32
    return %c0_i32, %c0_i32_0 : i32, i32
  }
  func.func @transform_7(%arg0: i32) -> (i32, i32) {
    %c0_i32 = arith.constant 0 : i32
    %c0_i32_0 = arith.constant 0 : i32
    %c0_i32_1 = arith.constant 0 : i32
    return %c0_i32, %c0_i32_0 : i32, i32
  }
  func.func @transform_8(%arg0: i32) -> (i32, i32) {
    %c0_i32 = arith.constant 0 : i32
    %c0_i32_0 = arith.constant 0 : i32
    %c0_i32_1 = arith.constant 0 : i32
    return %c0_i32, %c0_i32_0 : i32, i32
  }
  func.func @transform_9(%arg0: i32) -> (i32, i32) {
    %c0_i32 = arith.constant 0 : i32
    %c0_i32_0 = arith.constant 0 : i32
    %c0_i32_1 = arith.constant 0 : i32
    return %c0_i32, %c0_i32_0 : i32, i32
  }
  func.func @transform_10(%arg0: i32) -> (i32, i32) {
    %c0_i32 = arith.constant 0 : i32
    %c0_i32_0 = arith.constant 0 : i32
    %c0_i32_1 = arith.constant 0 : i32
    return %c0_i32, %c0_i32_0 : i32, i32
  }
  func.func @transform_11(%arg0: i32) -> (i32, i32) {
    %c0_i32 = arith.constant 0 : i32
    %c0_i32_0 = arith.constant 0 : i32
    %c0_i32_1 = arith.constant 0 : i32
    return %c0_i32, %c0_i32_0 : i32, i32
  }
  func.func @transform_12(%arg0: i32) -> (i32, i32) {
    %c0_i32 = arith.constant 0 : i32
    %c0_i32_0 = arith.constant 0 : i32
    %c0_i32_1 = arith.constant 0 : i32
    return %c0_i32, %c0_i32_0 : i32, i32
  }
  func.func @transform_13(%arg0: i32) -> (i32, i32) {
    %c0_i32 = arith.constant 0 : i32
    %c0_i32_0 = arith.constant 0 : i32
    return %arg0, %c0_i32 : i32, i32
  }
}

</mosaic_0001>

<bundles_post_ra>
// kernel: tpu_custom_call.1
= control target key start
LH: loop header
LB: loop body
LE: loop exit
PB: predicated region body
PF: predicated region fallthrough
CT: control target
= control target key end

     0   :  { %18 = vsyncpa [#allocation4], 0  ;;  %s5482_s0 = inlined_call_operand.vmem [shape: s32[1,64,1], index: 0, kind: input, shape index: {}]   ;;  %s5483_s1 = inlined_call_operand.vmem [shape: s32[8,1], index: 1, kind: input, shape index: {}]   ;;  %s5484_s2 = inlined_call_operand.hbm [shape: f32[128,256], index: 2, kind: input, shape index: {}]   ;;  %s5485_s3 = inlined_call_operand.vmem [shape: f32[1,256], index: 3, kind: input, shape index: {}]   ;;  %s5486_s4 = inlined_call_operand.vmem [shape: f32[64,256], index: 4, kind: input, shape index: {}]   ;;  %s5487_s5 = inlined_call_operand.vmem [shape: f32[1,128], index: 5, kind: input, shape index: {}]   ;;  %s5488_s6 = inlined_call_operand.hbm [shape: f32[64,128], index: 6, kind: input, shape index: {}]   ;;  %s5489_s7 = inlined_call_operand.vmem [shape: f32[1,128], index: 7, kind: input, shape index: {}]   ;;  %s5490_s8 = inlined_call_operand.hbm [shape: f32[64,256], index: 8, kind: input, shape index: {}]   ;;  %s5491_s9 = inlined_call_operand.vmem [shape: f32[1,128], index: 9, kind: input, shape index: {}]   ;;  %s5492_s10 = inlined_call_operand.vmem [shape: f32[1,128], index: 10, kind: input, shape index: {}]   ;;  %s5493_s11 = inlined_call_operand.vmem [shape: f32[64,32], index: 11, kind: input, shape index: {}]   ;;  %s5494_s12 = inlined_call_operand.vmem [shape: f32[1,32], index: 12, kind: input, shape index: {}]   ;;  %s5495_s13 = inlined_call_operand.hbm [shape: f32[8,32], index: 13, kind: output, shape index: {}]  }
   0x1   :  { %19 = vsyncpa [#allocation7], 0 }
   0x2   :  { %20 = vsyncpa [#allocation5], 0  ;;  %s4064_s25 = smov [#allocation6]  }
   0x3   :  { %s48_s26 = sshll.u32 %s4064_s25, 4  ;;  %s49_s26 = int_to_ptr.vmem [resolvable:$true] %s48_s26 }
   0x4   :  { %s3986_s27 = scalar_lea.vmem %s49_s26, 1024  ;;  %p3991_p1 = scmp.lt.s32.totalorder %s49_s26, %s49_s26 }
   0x5   :  { %p3987_p0 = scmp.ne.s32.totalorder %s49_s26, %s3986_s27  ;;  %p3992_p2 = scmp.lt.s32.totalorder %s3986_s27, %s3986_s27 }
   0x7   :  { %p3993_p3 = por %p3992_p2, %p3991_p1 }
   0x9   :  { %p3994_p4 = pnand %p3993_p3, %p3987_p0 }
   0xb   :  { %3997 = shalt.err (!%p3994_p4)
}
   0xc   :  { %s4065_s28 = smov 128   ;;  %s4066_s29 = smov 8  }
   0xd   :  { %54 = dma.hbm_to_vmem [thread:$0]  %s5488_s6, 1024, %s49_s26, [#allocation7], %s4065_s28, %s4065_s28, %s4066_s29  }
   0xe   :  { %s4067_s15 = smov [#allocation3]  }
   0xf   :  { %s30_s16 = sshll.u32 %s4067_s15, 4  ;;  %s31_s16 = int_to_ptr.vmem [resolvable:$true] %s30_s16 }
  0x10   :  { %s4006_s17 = scalar_lea.vmem %s31_s16, 4096  ;;  %p4011_p6 = scmp.lt.s32.totalorder %s31_s16, %s31_s16 }
  0x11   :  { %p4007_p5 = scmp.ne.s32.totalorder %s31_s16, %s4006_s17  ;;  %p4012_p7 = scmp.lt.s32.totalorder %s4006_s17, %s4006_s17 }
  0x13   :  { %p4013_p8 = por %p4012_p7, %p4011_p6 }
  0x15   :  { %p4014_p9 = pnand %p4013_p8, %p4007_p5 }
  0x17   :  { %4017 = shalt.err (!%p4014_p9)
}
  0x18   :  { %s4068_s18 = smov 256   ;;  %s4069_s19 = smov 16  }
  0x19   :  { %36 = dma.hbm_to_vmem [thread:$0]  %s5484_s2, 4096, %s31_s16, [#allocation4], %s4068_s18, %s4068_s18, %s4069_s19  }
  0x1a   :  { %s4070_s22 = smov [#allocation8]  }
  0x1b   :  { %s62_s23 = sshll.u32 %s4070_s22, 4  ;;  %s63_s23 = int_to_ptr.vmem [resolvable:$true] %s62_s23 }
  0x1c   :  { %s4026_s6 = scalar_lea.vmem %s63_s23, 2048  ;;  %p4031_p11 = scmp.lt.s32.totalorder %s63_s23, %s63_s23 }
  0x1d   :  { %p4027_p10 = scmp.ne.s32.totalorder %s63_s23, %s4026_s6  ;;  %p4032_p12 = scmp.lt.s32.totalorder %s4026_s6, %s4026_s6 }
  0x1f   :  { %p4033_p13 = por %p4032_p12, %p4031_p11 }
  0x21   :  { %p4034_p0 = pnand %p4033_p13, %p4027_p10 }
  0x23   :  { %4037 = shalt.err (!%p4034_p0)
}
  0x24   :  { %68 = dma.hbm_to_vmem [thread:$0]  %s5490_s8, 2048, %s63_s23, [#allocation7], %s4068_s18, %s4068_s18, %s4069_s19  }
  0x25   :  { %4058 = dma.done.wait [#allocation4], 4096  }
  0x26   :  { %4059 = vsyncadd [#allocation4], 4294963200 }
  0x27   :  { %4060 = dma.done.wait [#allocation7], 3072  }
  0x28   :  { %4061 = vsyncadd [#allocation7], 4294964224  ;;  %v4071_v0 = vmov 0   ;;  %v5496_v1 = vmov 0.0   ;;  %v86_v2 = vld [vmem:[%s5482_s0] sm:$0xff]  ;;  %v4166_v3 = vld [vmem:[%s5486_s4 + $0x78] sm:$0xff]  ;;  %v94_v51 = vlaneseq }
  0x29   :  { %3677 = vset.pattern.permute.xlu0 %v4071_v0  ;;  %404 = vmatprep.mubr.f32.mxu1 %v5496_v1  ;;  %v4171_v4 = vld [vmem:[%s5486_s4 + $0x70] sm:$0xff]  ;;  %v4177_v5 = vld [vmem:[%s5486_s4 + $0x68] sm:$0xff]  ;;  %v4182_v6 = vld [vmem:[%s5486_s4 + $0x60] sm:$0xff]  ;;  %v4073_v54 = vmov 1.0   ;;  %s4074_s23 = smov 64   ;;  %s4075_s25 = smov 32  }
  0x2a   :  { %252 = vmatprep.mubr.f32.mxu0 %v5496_v1  ;;  %3678 = vset.pattern.permute.xlu1 %v4071_v0  ;;  %v4188_v7 = vld [vmem:[%s5486_s4 + $0x58] sm:$0xff]  ;;  %v4194_v8 = vld [vmem:[%s5486_s4 + $0x50] sm:$0xff]  ;;  %v4200_v9 = vld [vmem:[%s5486_s4 + $0x48] sm:$0xff]  ;;  %v4262_v52 = vand.u32 127, %v94_v51  ;;  %v179_v59 = vshrl.u32 %v94_v51, 7  ;;  %s4076_s20 = smov 96  }
  0x2b   :  { %97 = vperm.xlu0 %3677, %v86_v2   ;;  %356 = vmatprep.subr.mxu1 %v4166_v3  ;;  %v4206_v10 = vld [vmem:[%s5486_s4 + $0x40] sm:$0xff]  ;;  %v4211_v11 = vld [vmem:[%s5486_s4 + $0x38] sm:$0xff]  ;;  %v174_v13 = vld [vmem:[#allocation3 + $0xf0] sm:$0xff]  ;;  %vm4077_vm2 = vmmov 0   ;;  %vm474_vm9 = vcmask 261120   ;;  %vm336_vm10 = vcmask 523264  }
  0x2c   :  { %357 = vmatpush1.msra.mxu1 %v4171_v4  ;;  %v175_v12 = vld [vmem:[#allocation3 + $0xf8] sm:$0xff]  ;;  %v173_v14 = vld [vmem:[#allocation3 + $0xe8] sm:$0xff]  ;;  %v172_v15 = vld [vmem:[#allocation3 + $0xe0] sm:$0xff]  ;;  %v180_v60 = vsub.s32 0, %v179_v59  ;;  %v184_v62 = vsub.s32 1, %v179_v59 }
  0x2d   :  { %358 = vmatprep.subr.mxu1 %v4177_v5  ;;  %188 = vmatprep.subr.mxu0 %v175_v12  ;;  %v4218_v16 = vld [vmem:[%s5486_s4 + $0x30] sm:$0xff]  ;;  %v171_v17 = vld [vmem:[#allocation3 + $0xd8] sm:$0xff]  ;;  %v4224_v18 = vld [vmem:[%s5486_s4 + $0x28] sm:$0xff] }
  0x2e   :  { %359 = vmatpush1.msra.mxu1 %v4182_v6  ;;  %189 = vmatpush1.msra.mxu0 %v174_v13  ;;  %v170_v19 = vld [vmem:[#allocation3 + $0xd0] sm:$0xff]  ;;  %v4230_v20 = vld [vmem:[%s5486_s4 + $0x20] sm:$0xff]  ;;  %v169_v21 = vld [vmem:[#allocation3 + $0xc8] sm:$0xff] }
  0x2f   :  { %360 = vmatprep.subr.mxu1 %v4188_v7  ;;  %190 = vmatprep.subr.mxu0 %v173_v14  ;;  %v4236_v22 = vld [vmem:[%s5486_s4 + $0x18] sm:$0xff]  ;;  %v168_v23 = vld [vmem:[#allocation3 + $0xc0] sm:$0xff]  ;;  %v4242_v24 = vld [vmem:[%s5486_s4 + $0x10] sm:$0xff] }
  0x30   :  { %361 = vmatpush1.msra.mxu1 %v4194_v8  ;;  %191 = vmatpush1.msra.mxu0 %v172_v15  ;;  %v167_v25 = vld [vmem:[#allocation3 + $0xb8] sm:$0xff]  ;;  %v4248_v26 = vld [vmem:[%s5486_s4 + $0x8] sm:$0xff]  ;;  %v166_v27 = vld [vmem:[#allocation3 + $0xb0] sm:$0xff] }
  0x31   :  { %362 = vmatprep.subr.mxu1 %v4200_v9  ;;  %192 = vmatprep.subr.mxu0 %v171_v17  ;;  %v4254_v28 = vld [vmem:[%s5486_s4] sm:$0xff]  ;;  %v165_v29 = vld [vmem:[#allocation3 + $0xa8] sm:$0xff]  ;;  %v163_v31 = vld [vmem:[#allocation3 + $0x98] sm:$0xff] }
  0x32   :  { %363 = vmatpush1.msra.mxu1 %v4206_v10  ;;  %193 = vmatpush1.msra.mxu0 %v170_v19  ;;  %v164_v30 = vld [vmem:[#allocation3 + $0xa0] sm:$0xff]  ;;  %v162_v32 = vld [vmem:[#allocation3 + $0x90] sm:$0xff]  ;;  %v161_v33 = vld [vmem:[#allocation3 + $0x88] sm:$0xff] }
  0x33   :  { %364 = vmatprep.subr.mxu1 %v4211_v11  ;;  %194 = vmatprep.subr.mxu0 %v169_v21  ;;  %v160_v34 = vld [vmem:[#allocation3 + $0x80] sm:$0xff]  ;;  %v159_v35 = vld [vmem:[#allocation3 + $0x78] sm:$0xff]  ;;  %v158_v36 = vld [vmem:[#allocation3 + $0x70] sm:$0xff] }
  0x34   :  { %365 = vmatpush1.msra.mxu1 %v4218_v16  ;;  %195 = vmatpush1.msra.mxu0 %v168_v23  ;;  %v157_v37 = vld [vmem:[#allocation3 + $0x68] sm:$0xff]  ;;  %v156_v38 = vld [vmem:[#allocation3 + $0x60] sm:$0xff]  ;;  %v155_v39 = vld [vmem:[#allocation3 + $0x58] sm:$0xff] }
  0x35   :  { %366 = vmatprep.subr.mxu1 %v4224_v18  ;;  %196 = vmatprep.subr.mxu0 %v167_v25  ;;  %v154_v40 = vld [vmem:[#allocation3 + $0x50] sm:$0xff]  ;;  %v153_v41 = vld [vmem:[#allocation3 + $0x48] sm:$0xff]  ;;  %v152_v42 = vld [vmem:[#allocation3 + $0x40] sm:$0xff] }
  0x36   :  { %367 = vmatpush1.msra.mxu1 %v4230_v20  ;;  %197 = vmatpush1.msra.mxu0 %v166_v27  ;;  %v151_v43 = vld [vmem:[#allocation3 + $0x38] sm:$0xff]  ;;  %v150_v44 = vld [vmem:[#allocation3 + $0x30] sm:$0xff]  ;;  %v149_v45 = vld [vmem:[#allocation3 + $0x28] sm:$0xff] }
  0x37   :  { %368 = vmatprep.subr.mxu1 %v4236_v22  ;;  %198 = vmatprep.subr.mxu0 %v165_v29  ;;  %v148_v46 = vld [vmem:[#allocation3 + $0x20] sm:$0xff]  ;;  %v147_v47 = vld [vmem:[#allocation3 + $0x18] sm:$0xff]  ;;  %v146_v48 = vld [vmem:[#allocation3 + $0x10] sm:$0xff] }
  0x38   :  { %369 = vmatpush1.msra.mxu1 %v4242_v24  ;;  %199 = vmatpush1.msra.mxu0 %v164_v30  ;;  %v145_v49 = vld [vmem:[#allocation3 + $0x8] sm:$0xff]  ;;  %v144_v50 = vld [vmem:[#allocation3] sm:$0xff]  ;;  %v4347_v59 = vld [vmem:[#allocation6 + $0x18] sm:$0xff] }
  0x39   :  { %370 = vmatprep.subr.mxu1 %v4248_v26  ;;  %200 = vmatprep.subr.mxu0 %v163_v31  ;;  %v4285_v56 = vld [vmem:[%s5487_s5] ss:$0 sm:$0xff]  ;;  %v87_v31 = vld [vmem:[%s5482_s0 + $0x8] sm:$0xff] }
  0x3a   :  { %371 = vmatpush1.msra.mxu1 %v4254_v28  ;;  %201 = vmatpush1.msra.mxu0 %v162_v32  ;;  %v176_v61 = vld [vmem:[%s5485_s3] sm:$0x3]  ;;  %v89_v32 = vld [vmem:[%s5482_s0 + $0x18] sm:$0xff] }
  0x3b   :  { %405 = vmatmul.mubr.f32.vlgmr.msra.gmra.mxu1 %v5496_v1  ;;  %3491 = vmatprep.subr.mxu1 %v5496_v1  ;;  %v4292_v63 = vrot.slane %v176_v61, %v180_v60  ;;  %v4294_v0 = vrot.slane %v176_v61, %v184_v62  ;;  %v4351_v60 = vld [vmem:[#allocation6 + $0x10] sm:$0xff]  ;;  %v4355_v61 = vld [vmem:[#allocation6 + $0x8] sm:$0xff]  ;;  %v4361_v62 = vld [vmem:[#allocation6] sm:$0xff] }
  0x3c   :  { %202 = vmatprep.subr.mxu0 %v161_v33  ;;  %v91_v33 = vld [vmem:[%s5482_s0 + $0x28] sm:$0xff]  ;;  %3507 = vmatprep.mubr.msk.f32.mxu1 %vm4077_vm2, %v5496_v1 }
  0x3d   :  { %203 = vmatpush1.msra.mxu0 %v160_v34  ;;  %v93_v34 = vld [vmem:[%s5482_s0 + $0x38] sm:$0xff] }
  0x3e   :  { %204 = vmatprep.subr.mxu0 %v159_v35 }
  0x3f   :  { %205 = vmatpush1.msra.mxu0 %v158_v36 }
  0x40   :  { %206 = vmatprep.subr.mxu0 %v157_v37 }
  0x41   :  { %207 = vmatpush1.msra.mxu0 %v156_v38 }
  0x42   :  { %208 = vmatprep.subr.mxu0 %v155_v39 }
  0x43   :  { %209 = vmatpush1.msra.mxu0 %v154_v40 }
  0x44   :  { %210 = vmatprep.subr.mxu0 %v153_v41 }
  0x45   :  { %211 = vmatpush1.msra.mxu0 %v152_v42 }
  0x46   :  { %212 = vmatprep.subr.mxu0 %v151_v43 }
  0x47   :  { %213 = vmatpush1.msra.mxu0 %v150_v44 }
  0x48   :  { %214 = vmatprep.subr.mxu0 %v149_v45 }
  0x49   :  { %215 = vmatpush1.msra.mxu0 %v148_v46 }
  0x4a   :  { %216 = vmatprep.subr.mxu0 %v147_v47 }
  0x4b   :  { %217 = vmatpush1.msra.mxu0 %v146_v48  ;;  %v88_v48 = vld [vmem:[%s5482_s0 + $0x10] sm:$0xff] }
  0x4c   :  { %218 = vmatprep.subr.mxu0 %v145_v49  ;;  %v90_v49 = vld [vmem:[%s5482_s0 + $0x20] sm:$0xff] }
  0x4d   :  { %219 = vmatpush1.msra.mxu0 %v144_v50  ;;  %v92_v50 = vld [vmem:[%s5482_s0 + $0x30] sm:$0xff] }
  0x4e   :  { %759 = vmatprep.subr.mxu0 %v4166_v3 }
  0xa6   :  { %v98_v53 = vpop.permute.xlu0 %97 }
  0xa7   :  { %vm120_vm0 = vcmp.eq.s32.totalorder %v4262_v52, %v98_v53  ;;  %v4333_v53 = vld [vmem:[#allocation6 + $0x38] sm:$0xff] }
  0xa8   :  { %3333 = vmatmul.mubr.msk.f32.vlgmr.msra.gmra.mxu0 %vm120_vm0, %v4073_v54  ;;  %3492 = vmatpush3.msra.mxu1 %v4333_v53 }
  0xa9   :  { %258 = vmatprep.mubr.f32.mxu0 %v5496_v1  ;;  %760 = vmatpush1.msra.mxu0 %v4171_v4 }
  0xaa   :  { %761 = vmatprep.subr.mxu0 %v4177_v5  ;;  %3493 = vmatprep.subr.mxu1 %v5496_v1 }
  0xab   :  { %762 = vmatpush1.msra.mxu0 %v4182_v6 }
  0xac   :  { %763 = vmatprep.subr.mxu0 %v4188_v7 }
  0xad   :  { %764 = vmatpush1.msra.mxu0 %v4194_v8 }
  0xae   :  { %765 = vmatprep.subr.mxu0 %v4200_v9 }
  0xaf   :  { %766 = vmatpush1.msra.mxu0 %v4206_v10 }
  0xb0   :  { %767 = vmatprep.subr.mxu0 %v4211_v11 }
  0xb1   :  { %768 = vmatpush1.msra.mxu0 %v4218_v16 }
  0xb2   :  { %769 = vmatprep.subr.mxu0 %v4224_v18 }
  0xb3   :  { %770 = vmatpush1.msra.mxu0 %v4230_v20 }
  0xb4   :  { %771 = vmatprep.subr.mxu0 %v4236_v22 }
  0xb5   :  { %772 = vmatpush1.msra.mxu0 %v4242_v24 }
  0xb6   :  { %773 = vmatprep.subr.mxu0 %v4248_v26 }
  0xb7   :  { %774 = vmatpush1.msra.mxu0 %v4254_v28 }
  0xfb   :  { %v406_v55 = vpop.f32.mrf.mxu1 }
  0xfd   :  { %v408_v57 = vpop.f32.mrf.mxu1 }
  0xfe   :  { %v443_v58 = vadd.f32 %v4285_v56, %v408_v57  ;;  %v4339_v57 = vld [vmem:[#allocation6 + $0x28] sm:$0xff] }
 0x100   :  { %452 = vrot.lane.b32.xlu1 %v443_v58, %s4074_s23 }
 0x168   :  { %v254_v2 = vpop.f32.mrf.mxu0 }
 0x169   :  { %v255_v12 = vadd.f32 %v254_v2, %v4292_v63 }
 0x16a   :  { %v256_v13 = vpop.f32.mrf.mxu0 }
 0x16b   :  { %v411_v14 = vadd.f32 %v406_v55, %v255_v12  ;;  %v257_v15 = vadd.f32 %v256_v13, %v4294_v0  ;;  %v4335_v55 = vld [vmem:[#allocation6 + $0x30] sm:$0xff] }
 0x16c   :  { %3494 = vmatpush3.msra.mxu1 %v4335_v55 }
 0x16d   :  { %3684 = vtanh.f32 %v411_v14  ;;  %v444_v17 = vadd.f32 %v443_v58, %v257_v15  ;;  %v3341_v35 = vmul.f32 -1.442695, %v411_v14  ;;  %3495 = vmatprep.subr.mxu1 %v5496_v1  ;;  %v4343_v58 = vld [vmem:[#allocation6 + $0x20] sm:$0xff] }
 0x16e   :  { %3496 = vmatpush3.msra.mxu1 %v4339_v57 }
 0x16f   :  { %v3343_v19 = vmul.f32 -1.442695, %v444_v17  ;;  %3497 = vmatprep.subr.mxu1 %v5496_v1 }
 0x170   :  { %3498 = vmatpush3.msra.mxu1 %v4343_v58 }
 0x171   :  { %3686 = vpow2.f32 %v3343_v19  ;;  %3499 = vmatprep.subr.mxu1 %v5496_v1 }
 0x172   :  { %v453_v27 = vpop.permute.xlu1 %452  ;;  %3500 = vmatpush3.msra.mxu1 %v4347_v59 }
 0x173   :  { %3501 = vmatprep.subr.mxu1 %v5496_v1 }
 0x174   :  { %3502 = vmatpush3.msra.mxu1 %v4351_v60 }
 0x175   :  { %3503 = vmatprep.subr.mxu1 %v5496_v1 }
 0x176   :  { %3504 = vmatpush3.msra.mxu1 %v4355_v61 }
 0x177   :  { %3505 = vmatprep.subr.mxu1 %v5496_v1 }
 0x178   :  { %3506 = vmatpush3.msra.mxu1 %v4361_v62 }
 0x17a   :  { %v3685_v21 = vpop.eup %3684 }
 0x17b   :  { %421 = vrot.lane.b32.xlu0 %v3685_v21, %s4075_s25 }
 0x17e   :  { %v3687_v23 = vpop.eup %3686 }
 0x17f   :  { %v448_v25 = vadd.f32 1.0, %v3687_v23 }
 0x181   :  { %3688 = vrcp.f32 %v448_v25 }
 0x182   :  { %3690 = vpow2.f32 %v3341_v35 }
 0x18e   :  { %v4299_v29 = vpop.eup %3688 }
 0x18f   :  { %v455_v30 = vmul.f32 %v4299_v29, %v453_v27  ;;  %v3691_v36 = vpop.eup %3690  ;;  %v462_v25 = vsub.f32 1.0, %v4299_v29 }
 0x190   :  { %v415_v37 = vadd.f32 1.0, %v3691_v36 }
 0x191   :  { %457 = vrot.lane.b32.xlu0 %v455_v30, %s4074_s23  ;;  %v468_v30 = vmul.f32 0.0, %v4299_v29 }
 0x192   :  { %3692 = vrcp.f32 %v415_v37 }
 0x195   :  { %100 = vperm.xlu0 %3677, %v87_v31  }
 0x199   :  { %106 = vperm.xlu0 %3677, %v89_v32  }
 0x19d   :  { %112 = vperm.xlu0 %3677, %v91_v33  }
 0x19f   :  { %v3693_v38 = vpop.eup %3692 }
 0x1a0   :  { %v419_v43 = vmul.f32 0.0, %v3693_v38 }
 0x1a1   :  { %118 = vperm.xlu0 %3677, %v93_v34  }
 0x1ed   :  { %v422_v39 = vpop.permute.xlu0 %421 }
 0x1ee   :  { %v424_v40 = vmul.f32 %v3693_v38, %v422_v39 }
 0x1f0   :  { %426 = vrot.lane.b32.xlu1 %v424_v40, %s4075_s25 }
 0x203   :  { %v458_v41 = vpop.permute.xlu0 %457 }
 0x204   :  { %v460_v46 = vadd.f32 %v458_v41, %v257_v15 }
 0x210   :  { %v101_v42 = vpop.permute.xlu0 %100 }
 0x211   :  { %vm121_vm1 = vcmp.eq.s32.totalorder %v4262_v52, %v101_v42 }
 0x212   :  { %3334 = vmatmul.mubr.msk.f32.gmra.mxu0 %vm121_vm1, %v4073_v54 }
 0x213   :  { %264 = vmatprep.mubr.f32.mxu0 %v5496_v1 }
 0x214   :  { %v107_v14 = vpop.permute.xlu0 %106 }
 0x215   :  { %vm123_vm4 = vcmp.eq.s32.totalorder %v4262_v52, %v107_v14 }
 0x218   :  { %v113_v17 = vpop.permute.xlu0 %112 }
 0x219   :  { %vm125_vm6 = vcmp.eq.s32.totalorder %v4262_v52, %v113_v17 }
 0x21c   :  { %v119_v21 = vpop.permute.xlu0 %118 }
 0x21d   :  { %vm127_vm8 = vcmp.eq.s32.totalorder %v4262_v52, %v119_v21 }
 0x262   :  { %v427_v44 = vpop.permute.xlu1 %426 }
 0x263   :  { %v4319_v45 = vadd.f32 %v427_v44, %v419_v43 }
 0x265   :  { %3694 = vtanh.f32 %v4319_v45 }
 0x266   :  { %3696 = vtanh.f32 %v460_v46 }
 0x272   :  { %v3695_v47 = vpop.eup %3694 }
 0x273   :  { %432 = vrot.lane.b32.xlu1 %v3695_v47, %s4075_s25  ;;  %v3697_v51 = vpop.eup %3696  ;;  %v4423_v47 = vld [vmem:[%s5489_s7] ss:$0 sm:$0xff] }
 0x277   :  { %103 = vperm.xlu1 %3678, %v88_v48  }
 0x27b   :  { %109 = vperm.xlu1 %3678, %v90_v49  }
 0x27f   :  { %115 = vperm.xlu1 %3678, %v92_v50  }
 0x283   :  { %464 = vrot.lane.b32.xlu1 %v3697_v51, %s4076_s20 }
 0x2e5   :  { %v433_v2 = vpop.permute.xlu1 %432 }
 0x2e6   :  { %v435_v12 = vmul.f32 %v3693_v38, %v433_v2 }
 0x2e8   :  { %471 = vrot.lane.b32.xlu0 %v435_v12, %s4074_s23 }
 0x2f2   :  { %v104_v13 = vpop.permute.xlu1 %103 }
 0x2f3   :  { %vm122_vm3 = vcmp.eq.s32.totalorder %v4262_v52, %v104_v13 }
 0x2f4   :  { %3335 = vmatmul.mubr.msk.f32.gmra.mxu0 %vm122_vm3, %v4073_v54 }
 0x2f5   :  { %270 = vmatprep.mubr.f32.mxu0 %v5496_v1 }
 0x2f6   :  { %v110_v15 = vpop.permute.xlu1 %109 }
 0x2f7   :  { %vm124_vm5 = vcmp.eq.s32.totalorder %v4262_v52, %v110_v15 }
 0x2f8   :  { %3336 = vmatmul.mubr.msk.f32.gmra.mxu0 %vm123_vm4, %v4073_v54 }
 0x2f9   :  { %276 = vmatprep.mubr.f32.mxu0 %v5496_v1 }
 0x2fa   :  { %v116_v19 = vpop.permute.xlu1 %115 }
 0x2fb   :  { %vm126_vm7 = vcmp.eq.s32.totalorder %v4262_v52, %v116_v19 }
 0x2fc   :  { %3337 = vmatmul.mubr.msk.f32.gmra.mxu0 %vm124_vm5, %v4073_v54 }
 0x2fd   :  { %282 = vmatprep.mubr.f32.mxu0 %v5496_v1 }
 0x2fe   :  { %v465_v23 = vpop.permute.xlu1 %464 }
 0x2ff   :  { %v467_v27 = vmul.f32 %v465_v23, %v462_v25 }
 0x300   :  { %3338 = vmatmul.mubr.msk.f32.gmra.mxu0 %vm125_vm6, %v4073_v54 }
 0x301   :  { %288 = vmatprep.mubr.f32.mxu0 %v5496_v1  ;;  %v4387_v31 = vadd.f32 %v468_v30, %v467_v27 }
 0x304   :  { %3339 = vmatmul.mubr.msk.f32.gmra.mxu0 %vm126_vm7, %v4073_v54 }
 0x305   :  { %294 = vmatprep.mubr.f32.mxu0 %v5496_v1 }
 0x308   :  { %3340 = vmatmul.mubr.msk.f32.gmra.mxu0 %vm127_vm8, %v4073_v54  ;;  %v260_v54 = vpop.f32.mrf.mxu0 }
 0x309   :  { %807 = vmatprep.mubr.f32.mxu0 %v5496_v1  ;;  %v261_v48 = vadd.f32 %v260_v54, %v4292_v63 }
 0x30a   :  { %v262_v29 = vpop.f32.mrf.mxu0 }
 0x35a   :  { %v472_v32 = vpop.permute.xlu0 %471 }
 0x35b   :  { %v475_v33 = vsel %vm474_vm9, %v472_v32, 0.0  ;;  %v739_v52 = vsel %vm474_vm9, %v472_v32, %v4387_v31 }
 0x35c   :  { %3508 = vmatmul.mubr.msk.f32.vlgmr.msra.gmra.mxu1 %vm336_vm10, %v475_v33  ;;  %3352 = vmatmul.mubr.msk.f32.vlgmr.msra.gmra.mxu0 %vm336_vm10, %v739_v52 }
 0x35d   :  { %676 = vmatprep.mubr.f32.mxu1 %v5496_v1  ;;  %1044 = vmatprep.mubr.f32.mxu0 %v5496_v1  ;;  %v4511_v1 = vld [vmem:[#allocation8 + $0x8] sm:$0xff] }
 0x3b4   :  { %v4396_v34 = vpop.f32.mrf.mxu0 }
 0x3b6   :  { %v4398_v35 = vpop.f32.mrf.mxu0 }
 0x3b8   :  { %v4400_v36 = vpop.f32.mrf.mxu0 }
 0x3ba   :  { %v4402_v37 = vpop.f32.mrf.mxu0 }
 0x3bb   :  { %5506 = vst [vmem:[#allocation13_spill] sm:$0xff] %v4402_v37 }
 0x3bc   :  { %v4404_v38 = vpop.f32.mrf.mxu0 }
 0x3bd   :  { %5507 = vst [vmem:[#allocation14_spill] sm:$0xff] %v4404_v38 }
 0x3be   :  { %v4406_v39 = vpop.f32.mrf.mxu0 }
 0x3bf   :  { %5508 = vst [vmem:[#allocation15_spill] sm:$0xff] %v4406_v39 }
 0x3c0   :  { %v4408_v40 = vpop.f32.mrf.mxu0 }
 0x3c1   :  { %5509 = vst [vmem:[#allocation16_spill] sm:$0xff] %v4408_v40 }
 0x3c2   :  { %v4410_v41 = vpop.f32.mrf.mxu0 }
 0x3c3   :  { %5510 = vst [vmem:[#allocation17_spill] sm:$0xff] %v4410_v41 }
 0x3c4   :  { %v4412_v42 = vpop.f32.mrf.mxu0 }
 0x3c5   :  { %5511 = vst [vmem:[#allocation18_spill] sm:$0xff] %v4412_v42 }
 0x3c6   :  { %v4414_v43 = vpop.f32.mrf.mxu0 }
 0x3c7   :  { %5512 = vst [vmem:[#allocation19_spill] sm:$0xff] %v4414_v43 }
 0x3c8   :  { %v4416_v44 = vpop.f32.mrf.mxu0 }
 0x3c9   :  { %5513 = vst [vmem:[#allocation20_spill] sm:$0xff] %v4416_v44 }
 0x3ca   :  { %v4418_v46 = vpop.f32.mrf.mxu0 }
 0x3cb   :  { %5514 = vst [vmem:[#allocation21_spill] sm:$0xff] %v4418_v46  ;;  %v5515_v46 = vmov 0.0  }
 0x41c   :  { %v560_v49 = vpop.f32.mrf.mxu1  ;;  %v809_v50 = vpop.f32.mrf.mxu0 }
 0x41d   :  { %v561_v51 = vadd.f32 %v4423_v47, %v560_v49  ;;  %v814_v2 = vadd.f32 %v809_v50, %v261_v48  ;;  %v4439_v50 = vld [vmem:[#allocation8 + $0x78] sm:$0xff] }
 0x41e   :  { %v3509_v12 = vpop.f32.mrf.mxu1  ;;  %v811_v54 = vpop.f32.mrf.mxu0  ;;  %628 = vmatprep.subr.mxu1 %v4439_v50  ;;  %996 = vmatprep.subr.mxu0 %v4439_v50 }
 0x41f   :  { %3698 = vtanh.f32 %v561_v51  ;;  %v3346_v15 = vmul.f32 -1.442695, %v561_v51  ;;  %v3353_v17 = vmul.f32 -1.442695, %v814_v2  ;;  %v839_v49 = vadd.f32 %v4285_v56, %v811_v54 }
 0x420   :  { %3700 = vtanh.f32 %v814_v2  ;;  %v4444_v51 = vadd.f32 %v262_v29, %v4294_v0  ;;  %v4456_v29 = vld [vmem:[#allocation8 + $0x58] sm:$0xff] }
 0x421   :  { %3702 = vpow2.f32 %v3346_v15  ;;  %v4447_v15 = vld [vmem:[#allocation8 + $0x70] sm:$0xff] }
 0x422   :  { %3704 = vpow2.f32 %v3353_v17  ;;  %v840_v2 = vadd.f32 %v839_v49, %v4444_v51  ;;  %629 = vmatpush1.msra.mxu1 %v4447_v15  ;;  %v4450_v17 = vld [vmem:[#allocation8 + $0x68] sm:$0xff]  ;;  %997 = vmatpush1.msra.mxu0 %v4447_v15 }
 0x423   :  { %630 = vmatprep.subr.mxu1 %v4450_v17  ;;  %998 = vmatprep.subr.mxu0 %v4450_v17 }
 0x424   :  { %v3354_v12 = vmul.f32 -1.442695, %v840_v2 }
 0x42c   :  { %v3699_v13 = vpop.eup %3698 }
 0x42d   :  { %v3701_v14 = vpop.eup %3700  ;;  %573 = vrot.lane.b32.xlu1 %v3699_v13, %s4075_s25 }
 0x42e   :  { %824 = vrot.lane.b32.xlu0 %v3701_v14, %s4075_s25  ;;  %v3703_v19 = vpop.eup %3702 }
 0x42f   :  { %v3705_v21 = vpop.eup %3704  ;;  %v567_v23 = vadd.f32 1.0, %v3703_v19  ;;  %v4454_v19 = vld [vmem:[#allocation8 + $0x60] sm:$0xff] }
 0x430   :  { %v818_v25 = vadd.f32 1.0, %v3705_v21  ;;  %v4458_v21 = vld [vmem:[#allocation8 + $0x50] sm:$0xff]  ;;  %631 = vmatpush1.msra.mxu1 %v4454_v19  ;;  %999 = vmatpush1.msra.mxu0 %v4454_v19 }
 0x431   :  { %3706 = vrcp.f32 %v567_v23  ;;  %v4462_v23 = vld [vmem:[#allocation8 + $0x48] sm:$0xff]  ;;  %632 = vmatprep.subr.mxu1 %v4456_v29  ;;  %1000 = vmatprep.subr.mxu0 %v4456_v29 }
 0x432   :  { %3708 = vrcp.f32 %v818_v25  ;;  %v4466_v25 = vld [vmem:[#allocation8 + $0x40] sm:$0xff]  ;;  %633 = vmatpush1.msra.mxu1 %v4458_v21  ;;  %1001 = vmatpush1.msra.mxu0 %v4458_v21 }
 0x433   :  { %3710 = vpow2.f32 %v3354_v12  ;;  %634 = vmatprep.subr.mxu1 %v4462_v23  ;;  %1002 = vmatprep.subr.mxu0 %v4462_v23  ;;  %v4483_v12 = vld [vmem:[#allocation8 + $0x28] sm:$0xff] }
 0x434   :  { %635 = vmatpush1.msra.mxu1 %v4466_v25  ;;  %1003 = vmatpush1.msra.mxu0 %v4466_v25 }
 0x43e   :  { %v4429_v27 = vpop.eup %3706 }
 0x43f   :  { %v4431_v32 = vpop.eup %3708 }
 0x440   :  { %v3711_v13 = vpop.eup %3710 }
 0x441   :  { %v844_v14 = vadd.f32 1.0, %v3711_v13 }
 0x443   :  { %3712 = vrcp.f32 %v844_v14 }
 0x49f   :  { %v574_v30 = vpop.permute.xlu1 %573 }
 0x4a0   :  { %v825_v33 = vpop.permute.xlu0 %824  ;;  %v576_v52 = vmul.f32 %v4429_v27, %v574_v30  ;;  %v571_v30 = vmul.f32 0.0, %v4429_v27 }
 0x4a1   :  { %v827_v48 = vmul.f32 %v4431_v32, %v825_v33  ;;  %v4471_v33 = vld [vmem:[#allocation8 + $0x38] sm:$0xff] }
 0x4a2   :  { %578 = vrot.lane.b32.xlu1 %v576_v52, %s4075_s25  ;;  %v822_v52 = vmul.f32 %v4431_v32, %v4319_v45  ;;  %636 = vmatprep.subr.mxu1 %v4471_v33  ;;  %v4493_v45 = vpop.eup %3712 }
 0x4a3   :  { %829 = vrot.lane.b32.xlu0 %v827_v48, %s4075_s25  ;;  %v4477_v48 = vld [vmem:[#allocation8 + $0x30] sm:$0xff]  ;;  %1004 = vmatprep.subr.mxu0 %v4471_v33 }
 0x4a4   :  { %637 = vmatpush1.msra.mxu1 %v4477_v48  ;;  %1005 = vmatpush1.msra.mxu0 %v4477_v48 }
 0x4a5   :  { %638 = vmatprep.subr.mxu1 %v4483_v12  ;;  %1006 = vmatprep.subr.mxu0 %v4483_v12 }
 0x4a6   :  { %848 = vrot.lane.b32.xlu1 %v839_v49, %s4074_s23 }
 0x514   :  { %v579_v54 = vpop.permute.xlu1 %578 }
 0x515   :  { %v830_v49 = vpop.permute.xlu0 %829  ;;  %v4480_v2 = vadd.f32 %v579_v54, %v571_v30  ;;  %v4497_v30 = vld [vmem:[#allocation8 + $0x20] sm:$0xff]  ;;  %v4502_v54 = vld [vmem:[#allocation8 + $0x18] sm:$0xff] }
 0x516   :  { %v4486_v13 = vadd.f32 %v830_v49, %v822_v52  ;;  %639 = vmatpush1.msra.mxu1 %v4497_v30  ;;  %v4504_v49 = vld [vmem:[#allocation8 + $0x10] sm:$0xff]  ;;  %1007 = vmatpush1.msra.mxu0 %v4497_v30 }
 0x517   :  { %3714 = vtanh.f32 %v4480_v2  ;;  %640 = vmatprep.subr.mxu1 %v4502_v54  ;;  %1008 = vmatprep.subr.mxu0 %v4502_v54 }
 0x518   :  { %3716 = vtanh.f32 %v4486_v13  ;;  %v849_v14 = vpop.permute.xlu1 %848  ;;  %641 = vmatpush1.msra.mxu1 %v4504_v49  ;;  %1009 = vmatpush1.msra.mxu0 %v4504_v49 }
 0x519   :  { %v851_v52 = vmul.f32 %v4493_v45, %v849_v14  ;;  %642 = vmatprep.subr.mxu1 %v4511_v1  ;;  %v4514_v14 = vld [vmem:[#allocation8] sm:$0xff]  ;;  %1010 = vmatprep.subr.mxu0 %v4511_v1 }
 0x51a   :  { %643 = vmatpush1.msra.mxu1 %v4514_v14  ;;  %1011 = vmatpush1.msra.mxu0 %v4514_v14 }
 0x51b   :  { %853 = vrot.lane.b32.xlu0 %v851_v52, %s4074_s23  ;;  %3510 = vmatprep.subr.mxu1 %v5515_v46 }
 0x51c   :  { %3529 = vmatprep.subr.mxu0 %v5515_v46 }
 0x524   :  { %v3715_v52 = vpop.eup %3714 }
 0x525   :  { %v3717_v44 = vpop.eup %3716  ;;  %584 = vrot.lane.b32.xlu1 %v3715_v52, %s4075_s25 }
 0x526   :  { %835 = vrot.lane.b32.xlu0 %v3717_v44, %s4075_s25 }
 0x529   :  { %589 = vrot.lane.b32.xlu1 %v4387_v31, %s4076_s20 }
 0x58d   :  { %v854_v43 = vpop.permute.xlu0 %853 }
 0x58e   :  { %v856_v42 = vadd.f32 %v854_v43, %v4444_v51 }
 0x590   :  { %3718 = vtanh.f32 %v856_v42  ;;  %v858_v42 = vsub.f32 1.0, %v4493_v45 }
 0x597   :  { %v585_v41 = vpop.permute.xlu1 %584 }
 0x598   :  { %v836_v40 = vpop.permute.xlu0 %835  ;;  %v4528_v39 = vmul.f32 %v4429_v27, %v585_v41 }
 0x599   :  { %v838_v38 = vmul.f32 %v4431_v32, %v836_v40 }
 0x59a   :  { %5516 = vst [vmem:[#allocation22_spill] sm:$0xff] %v4528_v39  ;;  %871 = vrot.lane.b32.xlu1 %v4528_v39, %s4076_s20 }
 0x59b   :  { %867 = vrot.lane.b32.xlu0 %v838_v38, %s4074_s23  ;;  %v590_v44 = vpop.permute.xlu1 %589 }
 0x59c   :  { %v592_v52 = vsel %vm474_vm9, %v590_v44, 0.0 }
 0x59d   :  { %v3719_v37 = vpop.eup %3718  ;;  %3347 = vmatmul.mubr.msk.f32.vlgmr.msra.gmra.mxu1 %vm336_vm10, %v592_v52 }
 0x59e   :  { %3511 = vmatpush3.msra.mxu1 %v4333_v53  ;;  %3526 = vmatprep.mubr.msk.f32.mxu1 %vm4077_vm2, %v5515_v46 }
 0x59f   :  { %860 = vrot.lane.b32.xlu0 %v3719_v37, %s4076_s20  ;;  %3512 = vmatprep.subr.mxu1 %v5515_v46 }
 0x5a0   :  { %3513 = vmatpush3.msra.mxu1 %v4335_v55 }
 0x5a1   :  { %3514 = vmatprep.subr.mxu1 %v5515_v46 }
 0x5a2   :  { %3515 = vmatpush3.msra.mxu1 %v4339_v57 }
 0x5a3   :  { %3516 = vmatprep.subr.mxu1 %v5515_v46 }
 0x5a4   :  { %3517 = vmatpush3.msra.mxu1 %v4343_v58 }
 0x5a5   :  { %3518 = vmatprep.subr.mxu1 %v5515_v46 }
 0x5a6   :  { %3519 = vmatpush3.msra.mxu1 %v4347_v59 }
 0x5a7   :  { %3520 = vmatprep.subr.mxu1 %v5515_v46 }
 0x5a8   :  { %3521 = vmatpush3.msra.mxu1 %v4351_v60 }
 0x5a9   :  { %3522 = vmatprep.subr.mxu1 %v5515_v46 }
 0x5aa   :  { %3523 = vmatpush3.msra.mxu1 %v4355_v61 }
 0x5ab   :  { %3524 = vmatprep.subr.mxu1 %v5515_v46 }
 0x5ac   :  { %3525 = vmatpush3.msra.mxu1 %v4361_v62 }
 0x5ad   :  { %1113 = vmatprep.subr.mxu1 %v4166_v3 }
 0x60c   :  { %v872_v37 = vpop.permute.xlu1 %871 }
 0x60d   :  { %v868_v38 = vpop.permute.xlu0 %867 }
 0x60e   :  { %v874_v40 = vsel %vm474_vm9, %v868_v38, %v872_v37 }
 0x60f   :  { %3527 = vmatmul.mubr.msk.f32.vlgmr.msra.gmra.mxu1 %vm336_vm10, %v874_v40 }
 0x610   :  { %1114 = vmatpush1.msra.mxu1 %v4171_v4  ;;  %1161 = vmatprep.mubr.f32.mxu1 %v5515_v46  ;;  %v864_v4 = vmul.f32 %v4493_v45, %v4387_v31 }
 0x611   :  { %1115 = vmatprep.subr.mxu1 %v4177_v5  ;;  %v861_v41 = vpop.permute.xlu0 %860 }
 0x612   :  { %1116 = vmatpush1.msra.mxu1 %v4182_v6  ;;  %v863_v3 = vmul.f32 %v861_v41, %v858_v42 }
 0x613   :  { %1117 = vmatprep.subr.mxu1 %v4188_v7 }
 0x614   :  { %1118 = vmatpush1.msra.mxu1 %v4194_v8  ;;  %v4571_v5 = vadd.f32 %v864_v4, %v863_v3 }
 0x615   :  { %1119 = vmatprep.subr.mxu1 %v4200_v9 }
 0x616   :  { %1120 = vmatpush1.msra.mxu1 %v4206_v10  ;;  %v1093_v6 = vsel %vm474_vm9, %v868_v38, %v4571_v5 }
 0x617   :  { %1121 = vmatprep.subr.mxu1 %v4211_v11 }
 0x618   :  { %1122 = vmatpush1.msra.mxu1 %v4218_v16  ;;  %v267_v16 = vadd.f32 %v4396_v34, %v4292_v63  ;;  %v4614_v34 = vld [vmem:[%s5491_s9] ss:$0 sm:$0xff] }
 0x619   :  { %1123 = vmatprep.subr.mxu1 %v4224_v18 }
 0x61a   :  { %1124 = vmatpush1.msra.mxu1 %v4230_v20  ;;  %v4605_v20 = vld [vmem:[%s5492_s10] ss:$0 sm:$0xff] }
 0x61b   :  { %1125 = vmatprep.subr.mxu1 %v4236_v22 }
 0x61c   :  { %1126 = vmatpush1.msra.mxu1 %v4242_v24 }
 0x61d   :  { %1127 = vmatprep.subr.mxu1 %v4248_v26 }
 0x61e   :  { %1128 = vmatpush1.msra.mxu1 %v4254_v28 }
 0x61f   :  { %3360 = vmatmul.mubr.msk.f32.vlgmr.msra.gmra.mxu1 %vm336_vm10, %v1093_v6  ;;  %1350 = vmatprep.subr.mxu1 %v4439_v50 }
 0x620   :  { %1351 = vmatpush1.msra.mxu1 %v4447_v15  ;;  %1398 = vmatprep.mubr.f32.mxu1 %v5515_v46 }
 0x621   :  { %1352 = vmatprep.subr.mxu1 %v4450_v17 }
 0x622   :  { %1353 = vmatpush1.msra.mxu1 %v4454_v19 }
 0x623   :  { %1354 = vmatprep.subr.mxu1 %v4456_v29 }
 0x624   :  { %1355 = vmatpush1.msra.mxu1 %v4458_v21 }
 0x625   :  { %1356 = vmatprep.subr.mxu1 %v4462_v23 }
 0x626   :  { %1357 = vmatpush1.msra.mxu1 %v4466_v25 }
 0x627   :  { %1358 = vmatprep.subr.mxu1 %v4471_v33 }
 0x628   :  { %1359 = vmatpush1.msra.mxu1 %v4477_v48 }
 0x629   :  { %1360 = vmatprep.subr.mxu1 %v4483_v12 }
 0x62a   :  { %1361 = vmatpush1.msra.mxu1 %v4497_v30 }
 0x62b   :  { %1362 = vmatprep.subr.mxu1 %v4502_v54 }
 0x62c   :  { %1363 = vmatpush1.msra.mxu1 %v4504_v49 }
 0x62d   :  { %1364 = vmatprep.subr.mxu1 %v4511_v1 }
 0x62e   :  { %1365 = vmatpush1.msra.mxu1 %v4514_v14 }
 0x62f   :  { %3548 = vmatprep.subr.mxu1 %v5515_v46 }
 0x65d   :  { %v678_v7 = vpop.f32.mrf.mxu1 }
 0x65e   :  { %v690_v43 = vadd.f32 %v4614_v34, %v678_v7 }
 0x65f   :  { %v680_v8 = vpop.f32.mrf.mxu1 }
 0x660   :  { %v698_v26 = vadd.f32 %v4605_v20, %v680_v8 }
 0x662   :  { %v699_v27 = vadd.f32 %v698_v26, %v690_v43 }
 0x664   :  { %v3350_v45 = vmul.f32 -1.442695, %v699_v27 }
 0x6cf   :  { %v944_v9 = vpop.f32.mrf.mxu1 }
 0x6d0   :  { %v945_v10 = vadd.f32 %v4423_v47, %v944_v9 }
 0x6d1   :  { %v3528_v11 = vpop.f32.mrf.mxu1 }
 0x6d2   :  { %3720 = vtanh.f32 %v945_v10  ;;  %v3356_v31 = vmul.f32 -1.442695, %v945_v10 }
 0x6df   :  { %v3721_v18 = vpop.eup %3720  ;;  %v1163_v22 = vpop.f32.mrf.mxu1 }
 0x6e0   :  { %v1168_v24 = vadd.f32 %v1163_v22, %v267_v16  ;;  %957 = vrot.lane.b32.xlu1 %v3721_v18, %s4075_s25  ;;  %v269_v18 = vadd.f32 %v4398_v35, %v4294_v0 }
 0x6e1   :  { %v1165_v3 = vpop.f32.mrf.mxu1 }
 0x6e2   :  { %3722 = vtanh.f32 %v1168_v24  ;;  %v3361_v32 = vmul.f32 -1.442695, %v1168_v24  ;;  %v1193_v6 = vadd.f32 %v4285_v56, %v1165_v3 }
 0x6e3   :  { %3724 = vpow2.f32 %v3356_v31 }
 0x6e4   :  { %707 = vrot.lane.b32.xlu1 %v698_v26, %s4074_s23  ;;  %3726 = vpow2.f32 %v3361_v32  ;;  %v1194_v22 = vadd.f32 %v1193_v6, %v269_v18 }
 0x6e5   :  { %3728 = vpow2.f32 %v3350_v45 }
 0x6e6   :  { %v3362_v24 = vmul.f32 -1.442695, %v1194_v22 }
 0x6ef   :  { %v3723_v28 = vpop.eup %3722 }
 0x6f0   :  { %1178 = vrot.lane.b32.xlu0 %v3723_v28, %s4075_s25  ;;  %v3725_v51 = vpop.eup %3724 }
 0x6f1   :  { %v951_v44 = vadd.f32 1.0, %v3725_v51  ;;  %v3727_v52 = vpop.eup %3726 }
 0x6f2   :  { %v3729_v37 = vpop.eup %3728  ;;  %v1172_v38 = vadd.f32 1.0, %v3727_v52 }
 0x6f3   :  { %3730 = vrcp.f32 %v951_v44  ;;  %v703_v4 = vadd.f32 1.0, %v3729_v37 }
 0x6f4   :  { %3732 = vrcp.f32 %v1172_v38 }
 0x6f5   :  { %3734 = vrcp.f32 %v703_v4 }
 0x6f6   :  { %3736 = vpow2.f32 %v3362_v24 }
 0x700   :  { %v3731_v40 = vpop.eup %3730 }
 0x701   :  { %v3733_v7 = vpop.eup %3732  ;;  %v955_v28 = vmul.f32 %v3731_v40, %v4480_v2 }
 0x702   :  { %v3735_v11 = vpop.eup %3734  ;;  %v1176_v35 = vmul.f32 %v3733_v7, %v4486_v13 }
 0x703   :  { %v3737_v56 = vpop.eup %3736 }
 0x704   :  { %v1198_v26 = vadd.f32 1.0, %v3737_v56 }
 0x706   :  { %3738 = vrcp.f32 %v1198_v26 }
 0x713   :  { %v4628_v32 = vpop.eup %3738 }
 0x752   :  { %v958_v41 = vpop.permute.xlu1 %957 }
 0x753   :  { %v960_v42 = vmul.f32 %v3731_v40, %v958_v41 }
 0x755   :  { %962 = vrot.lane.b32.xlu0 %v960_v42, %s4075_s25 }
 0x756   :  { %v708_v10 = vpop.permute.xlu1 %707 }
 0x757   :  { %v710_v16 = vmul.f32 %v3735_v11, %v708_v10 }
 0x759   :  { %1202 = vrot.lane.b32.xlu0 %v1193_v6, %s4074_s23 }
 0x762   :  { %v1179_v8 = vpop.permute.xlu0 %1178 }
 0x763   :  { %v1181_v9 = vmul.f32 %v3733_v7, %v1179_v8 }
 0x765   :  { %1183 = vrot.lane.b32.xlu1 %v1181_v9, %s4075_s25  ;;  %v717_v9 = vsub.f32 1.0, %v3735_v11 }
 0x769   :  { %712 = vrot.lane.b32.xlu1 %v710_v16, %s4074_s23  ;;  %v723_v16 = vmul.f32 0.0, %v3735_v11  ;;  %v1212_v11 = vsub.f32 1.0, %v4628_v32 }
 0x7c7   :  { %v963_v31 = vpop.permute.xlu0 %962 }
 0x7c8   :  { %v4625_v27 = vadd.f32 %v963_v31, %v955_v28  ;;  %v4712_v28 = vld [vmem:[%s5486_s4 + $0x48] sm:$0xff] }
 0x7ca   :  { %3740 = vtanh.f32 %v4625_v27 }
 0x7cb   :  { %v1203_v51 = vpop.permute.xlu0 %1202 }
 0x7cc   :  { %v1205_v45 = vmul.f32 %v4628_v32, %v1203_v51  ;;  %v4718_v51 = vld [vmem:[%s5486_s4 + $0x40] sm:$0xff] }
 0x7ce   :  { %1207 = vrot.lane.b32.xlu0 %v1205_v45, %s4074_s23  ;;  %v4724_v45 = vld [vmem:[%s5486_s4 + $0x38] sm:$0xff] }
 0x7d7   :  { %v3741_v44 = vpop.eup %3740  ;;  %v1184_v52 = vpop.permute.xlu1 %1183 }
 0x7d8   :  { %v4633_v37 = vadd.f32 %v1184_v52, %v1176_v35  ;;  %968 = vrot.lane.b32.xlu1 %v3741_v44, %s4075_s25  ;;  %v1218_v35 = vmul.f32 %v4628_v32, %v4571_v5  ;;  %v4732_v44 = vld [vmem:[%s5486_s4 + $0x30] sm:$0xff]  ;;  %v4738_v52 = vld [vmem:[%s5486_s4 + $0x28] sm:$0xff]  ;;  %v4752_v32 = vld [vmem:[%s5486_s4 + $0x18] sm:$0xff] }
 0x7da   :  { %3742 = vtanh.f32 %v4633_v37 }
 0x7db   :  { %v713_v2 = vpop.permute.xlu1 %712 }
 0x7dc   :  { %v715_v38 = vadd.f32 %v713_v2, %v690_v43 }
 0x7de   :  { %3744 = vtanh.f32 %v715_v38  ;;  %v4758_v38 = vld [vmem:[%s5486_s4 + $0x10] sm:$0xff] }
 0x7e7   :  { %v3743_v41 = vpop.eup %3742 }
 0x7e8   :  { %1189 = vrot.lane.b32.xlu0 %v3743_v41, %s4075_s25  ;;  %v4764_v41 = vld [vmem:[%s5486_s4 + $0x8] sm:$0xff] }
 0x7eb   :  { %v3745_v42 = vpop.eup %3744 }
 0x7ec   :  { %719 = vrot.lane.b32.xlu1 %v3745_v42, %s4076_s20  ;;  %973 = vrot.lane.b32.xlu0 %v4571_v5, %s4076_s20  ;;  %v4746_v5 = vld [vmem:[%s5486_s4 + $0x20] sm:$0xff] }
 0x7ed   :  { %v4770_v42 = vld [vmem:[%s5486_s4] sm:$0xff] }
 0x840   :  { %v1208_v4 = vpop.permute.xlu0 %1207 }
 0x841   :  { %v1210_v6 = vadd.f32 %v1208_v4, %v269_v18  ;;  %v4706_v18 = vld [vmem:[%s5486_s4 + $0x50] sm:$0xff] }
 0x843   :  { %3746 = vtanh.f32 %v1210_v6 }
 0x84a   :  { %v969_v13 = vpop.permute.xlu1 %968 }
 0x84b   :  { %v4641_v3 = vmul.f32 %v3731_v40, %v969_v13 }
 0x84d   :  { %5517 = vst [vmem:[#allocation23_spill] sm:$0xff] %v4641_v3  ;;  %1225 = vrot.lane.b32.xlu0 %v4641_v3, %s4076_s20 }
 0x850   :  { %v3747_v24 = vpop.eup %3746 }
 0x85a   :  { %v1190_v43 = vpop.permute.xlu0 %1189 }
 0x85b   :  { %v1192_v8 = vmul.f32 %v3733_v7, %v1190_v43  ;;  %v4699_v7 = vld [vmem:[%s5486_s4 + $0x58] sm:$0xff] }
 0x85d   :  { %1221 = vrot.lane.b32.xlu1 %v1192_v8, %s4074_s23 }
 0x85e   :  { %v720_v10 = vpop.permute.xlu1 %719  ;;  %v974_v40 = vpop.permute.xlu0 %973 }
 0x85f   :  { %v722_v22 = vmul.f32 %v720_v10, %v717_v9  ;;  %v273_v10 = vadd.f32 %v4400_v36, %v4292_v63 }
 0x861   :  { %v4646_v56 = vadd.f32 %v723_v16, %v722_v22  ;;  %1214 = vrot.lane.b32.xlu1 %v3747_v24, %s4076_s20 }
 0x863   :  { %5518 = vst [vmem:[#allocation24_spill] sm:$0xff] %v4646_v56  ;;  %v976_v26 = vsel %vm474_vm9, %v974_v40, %v4646_v56 }
 0x864   :  { %3357 = vmatmul.mubr.msk.f32.vlgmr.msra.gmra.mxu0 %vm336_vm10, %v976_v26 }
 0x865   :  { %3530 = vmatpush3.msra.mxu0 %v4333_v53  ;;  %3545 = vmatprep.mubr.msk.f32.mxu0 %vm4077_vm2, %v5515_v46  ;;  %v4672_v53 = vld [vmem:[%s5486_s4 + $0x78] sm:$0xff] }
 0x866   :  { %3531 = vmatprep.subr.mxu0 %v5515_v46 }
 0x867   :  { %3532 = vmatpush3.msra.mxu0 %v4335_v55 }
 0x868   :  { %3533 = vmatprep.subr.mxu0 %v5515_v46 }
 0x869   :  { %3534 = vmatpush3.msra.mxu0 %v4339_v57 }
 0x86a   :  { %3535 = vmatprep.subr.mxu0 %v5515_v46 }
 0x86b   :  { %3536 = vmatpush3.msra.mxu0 %v4343_v58 }
 0x86c   :  { %3537 = vmatprep.subr.mxu0 %v5515_v46 }
 0x86d   :  { %3538 = vmatpush3.msra.mxu0 %v4347_v59  ;;  %v4680_v59 = vld [vmem:[%s5486_s4 + $0x70] sm:$0xff] }
 0x86e   :  { %3539 = vmatprep.subr.mxu0 %v5515_v46 }
 0x86f   :  { %3540 = vmatpush3.msra.mxu0 %v4351_v60  ;;  %v4687_v60 = vld [vmem:[%s5486_s4 + $0x68] sm:$0xff] }
 0x870   :  { %3541 = vmatprep.subr.mxu0 %v5515_v46 }
 0x871   :  { %3542 = vmatpush3.msra.mxu0 %v4355_v61  ;;  %v4693_v61 = vld [vmem:[%s5486_s4 + $0x60] sm:$0xff] }
 0x872   :  { %3543 = vmatprep.subr.mxu0 %v5515_v46 }
 0x873   :  { %3544 = vmatpush3.msra.mxu0 %v4361_v62 }
 0x874   :  { %1467 = vmatprep.subr.mxu0 %v4672_v53 }
 0x8bf   :  { %v1226_v55 = vpop.permute.xlu0 %1225 }
 0x8cf   :  { %v1222_v57 = vpop.permute.xlu1 %1221 }
 0x8d0   :  { %v1228_v58 = vsel %vm474_vm9, %v1222_v57, %v1226_v55 }
 0x8d1   :  { %3546 = vmatmul.mubr.msk.f32.vlgmr.msra.gmra.mxu0 %vm336_vm10, %v1228_v58 }
 0x8d2   :  { %1468 = vmatpush1.msra.mxu0 %v4680_v59  ;;  %1515 = vmatprep.mubr.f32.mxu0 %v5515_v46 }
 0x8d3   :  { %1469 = vmatprep.subr.mxu0 %v4687_v60  ;;  %v1215_v62 = vpop.permute.xlu1 %1214 }
 0x8d4   :  { %1470 = vmatpush1.msra.mxu0 %v4693_v61  ;;  %v1217_v31 = vmul.f32 %v1215_v62, %v1212_v11 }
 0x8d5   :  { %1471 = vmatprep.subr.mxu0 %v4699_v7 }
 0x8d6   :  { %1472 = vmatpush1.msra.mxu0 %v4706_v18  ;;  %v4741_v2 = vadd.f32 %v1218_v35, %v1217_v31 }
 0x8d7   :  { %1473 = vmatprep.subr.mxu0 %v4712_v28 }
 0x8d8   :  { %1474 = vmatpush1.msra.mxu0 %v4718_v51  ;;  %v1447_v13 = vsel %vm474_vm9, %v1222_v57, %v4741_v2 }
 0x8d9   :  { %1475 = vmatprep.subr.mxu0 %v4724_v45 }
 0x8da   :  { %1476 = vmatpush1.msra.mxu0 %v4732_v44 }
 0x8db   :  { %1477 = vmatprep.subr.mxu0 %v4738_v52 }
 0x8dc   :  { %1478 = vmatpush1.msra.mxu0 %v4746_v5 }
 0x8dd   :  { %1479 = vmatprep.subr.mxu0 %v4752_v32 }
 0x8de   :  { %1480 = vmatpush1.msra.mxu0 %v4758_v38 }
 0x8df   :  { %1481 = vmatprep.subr.mxu0 %v4764_v41 }
 0x8e0   :  { %1482 = vmatpush1.msra.mxu0 %v4770_v42 }
 0x8e1   :  { %3368 = vmatmul.mubr.msk.f32.vlgmr.msra.gmra.mxu0 %vm336_vm10, %v1447_v13  ;;  %1704 = vmatprep.subr.mxu0 %v4439_v50 }
 0x8e2   :  { %1705 = vmatpush1.msra.mxu0 %v4447_v15  ;;  %1752 = vmatprep.mubr.f32.mxu0 %v5515_v46 }
 0x8e3   :  { %1706 = vmatprep.subr.mxu0 %v4450_v17 }
 0x8e4   :  { %1707 = vmatpush1.msra.mxu0 %v4454_v19 }
 0x8e5   :  { %1708 = vmatprep.subr.mxu0 %v4456_v29 }
 0x8e6   :  { %1709 = vmatpush1.msra.mxu0 %v4458_v21 }
 0x8e7   :  { %1710 = vmatprep.subr.mxu0 %v4462_v23 }
 0x8e8   :  { %1711 = vmatpush1.msra.mxu0 %v4466_v25 }
 0x8e9   :  { %1712 = vmatprep.subr.mxu0 %v4471_v33 }
 0x8ea   :  { %1713 = vmatpush1.msra.mxu0 %v4477_v48 }
 0x8eb   :  { %1714 = vmatprep.subr.mxu0 %v4483_v12 }
 0x8ec   :  { %1715 = vmatpush1.msra.mxu0 %v4497_v30 }
 0x8ed   :  { %1716 = vmatprep.subr.mxu0 %v4502_v54 }
 0x8ee   :  { %1717 = vmatpush1.msra.mxu0 %v4504_v49 }
 0x8ef   :  { %1718 = vmatprep.subr.mxu0 %v4511_v1 }
 0x8f0   :  { %1719 = vmatpush1.msra.mxu0 %v4514_v14 }
 0x8f1   :  { %3567 = vmatprep.subr.mxu0 %v5515_v46 }
 0x924   :  { %v1046_v4 = vpop.f32.mrf.mxu0 }
 0x926   :  { %v1048_v6 = vpop.f32.mrf.mxu0 }
 0x927   :  { %v1052_v40 = vadd.f32 %v4605_v20, %v1048_v6 }
 0x991   :  { %v1298_v43 = vpop.f32.mrf.mxu0 }
 0x992   :  { %v1299_v8 = vadd.f32 %v4423_v47, %v1298_v43  ;;  %v1051_v47 = vadd.f32 %v4614_v34, %v1046_v4  ;;  %v4806_v4 = vld [vmem:[%s5487_s5] ss:$0 sm:$0xff] }
 0x993   :  { %v3547_v9 = vpop.f32.mrf.mxu0 }
 0x994   :  { %3748 = vtanh.f32 %v1299_v8  ;;  %v3364_v55 = vmul.f32 -1.442695, %v1299_v8  ;;  %v1053_v57 = vadd.f32 %v1052_v40, %v1051_v47 }
 0x996   :  { %v3358_v62 = vmul.f32 -1.442695, %v1053_v57 }
 0x9a1   :  { %v3749_v16 = vpop.eup %3748  ;;  %v1517_v22 = vpop.f32.mrf.mxu0 }
 0x9a2   :  { %v1522_v24 = vadd.f32 %v1517_v22, %v273_v10  ;;  %1311 = vrot.lane.b32.xlu0 %v3749_v16, %s4075_s25 }
 0x9a3   :  { %v1519_v10 = vpop.f32.mrf.mxu0 }
 0x9a4   :  { %3750 = vtanh.f32 %v1522_v24  ;;  %v3369_v58 = vmul.f32 -1.442695, %v1522_v24  ;;  %v1547_v8 = vadd.f32 %v4806_v4, %v1519_v10 }
 0x9a5   :  { %3752 = vpow2.f32 %v3364_v55 }
 0x9a6   :  { %1061 = vrot.lane.b32.xlu0 %v1052_v40, %s4074_s23  ;;  %3754 = vpow2.f32 %v3369_v58  ;;  %v5519_v58 = vld [vmem:[#allocation13_spill] sm:$0xff] }
 0x9a7   :  { %3756 = vpow2.f32 %v3358_v62 }
 0x9b1   :  { %v3751_v26 = vpop.eup %3750 }
 0x9b2   :  { %1532 = vrot.lane.b32.xlu1 %v3751_v26, %s4075_s25  ;;  %v3753_v36 = vpop.eup %3752 }
 0x9b3   :  { %v1305_v11 = vadd.f32 1.0, %v3753_v36  ;;  %v3755_v31 = vpop.eup %3754  ;;  %v275_v36 = vadd.f32 %v5519_v58, %v4294_v0 }
 0x9b4   :  { %v3757_v35 = vpop.eup %3756  ;;  %v1526_v13 = vadd.f32 1.0, %v3755_v31 }
 0x9b5   :  { %3758 = vrcp.f32 %v1305_v11  ;;  %v1057_v16 = vadd.f32 1.0, %v3757_v35  ;;  %v1548_v62 = vadd.f32 %v1547_v8, %v275_v36 }
 0x9b6   :  { %3760 = vrcp.f32 %v1526_v13 }
 0x9b7   :  { %3762 = vrcp.f32 %v1057_v16  ;;  %v3370_v11 = vmul.f32 -1.442695, %v1548_v62 }
 0x9b9   :  { %3764 = vpow2.f32 %v3370_v11 }
 0x9c2   :  { %v3759_v6 = vpop.eup %3758 }
 0x9c3   :  { %v3761_v22 = vpop.eup %3760  ;;  %v1309_v13 = vmul.f32 %v3759_v6, %v4625_v27 }
 0x9c4   :  { %v3763_v55 = vpop.eup %3762 }
 0x9c6   :  { %v3765_v31 = vpop.eup %3764 }
 0x9c7   :  { %v1552_v35 = vadd.f32 1.0, %v3765_v31 }
 0x9c9   :  { %3766 = vrcp.f32 %v1552_v35 }
 0x9d6   :  { %v4818_v10 = vpop.eup %3766 }
 0xa14   :  { %v1312_v43 = vpop.permute.xlu0 %1311 }
 0xa15   :  { %v1314_v9 = vmul.f32 %v3759_v6, %v1312_v43 }
 0xa17   :  { %1316 = vrot.lane.b32.xlu1 %v1314_v9, %s4075_s25 }
 0xa18   :  { %v1062_v26 = vpop.permute.xlu0 %1061 }
 0xa19   :  { %v1064_v57 = vmul.f32 %v3763_v55, %v1062_v26 }
 0xa1b   :  { %1556 = vrot.lane.b32.xlu1 %v1547_v8, %s4074_s23  ;;  %v1530_v8 = vmul.f32 %v3761_v22, %v4633_v37 }
 0xa24   :  { %v1533_v24 = vpop.permute.xlu1 %1532 }
 0xa25   :  { %v1535_v40 = vmul.f32 %v3761_v22, %v1533_v24 }
 0xa27   :  { %1537 = vrot.lane.b32.xlu0 %v1535_v40, %s4075_s25 }
 0xa2b   :  { %1066 = vrot.lane.b32.xlu0 %v1064_v57, %s4074_s23 }
 0xa89   :  { %v1317_v43 = vpop.permute.xlu1 %1316 }
 0xa8a   :  { %v4815_v9 = vadd.f32 %v1317_v43, %v1309_v13 }
 0xa8c   :  { %3768 = vtanh.f32 %v4815_v9 }
 0xa8d   :  { %v1557_v16 = vpop.permute.xlu1 %1556 }
 0xa8e   :  { %v1559_v24 = vmul.f32 %v4818_v10, %v1557_v16  ;;  %v1071_v16 = vsub.f32 1.0, %v3763_v55 }
 0xa90   :  { %1561 = vrot.lane.b32.xlu1 %v1559_v24, %s4074_s23 }
 0xa99   :  { %v3769_v40 = vpop.eup %3768  ;;  %v1538_v26 = vpop.permute.xlu0 %1537 }
 0xa9a   :  { %v4823_v57 = vadd.f32 %v1538_v26, %v1530_v8  ;;  %1322 = vrot.lane.b32.xlu0 %v3769_v40, %s4075_s25  ;;  %v1077_v8 = vmul.f32 %v3763_v55, %v4646_v56  ;;  %v4853_v55 = vld [vmem:[#allocation6 + $0x28] sm:$0xff]  ;;  %v5526_v56 = vld [vmem:[#allocation16_spill] sm:$0xff] }
 0xa9c   :  { %3770 = vtanh.f32 %v4823_v57 }
 0xa9d   :  { %v1067_v27 = vpop.permute.xlu0 %1066 }
 0xa9e   :  { %v1069_v58 = vadd.f32 %v1067_v27, %v1051_v47 }
 0xaa0   :  { %3772 = vtanh.f32 %v1069_v58 }
 0xaa9   :  { %v3771_v62 = vpop.eup %3770 }
 0xaaa   :  { %1543 = vrot.lane.b32.xlu1 %v3771_v62, %s4075_s25  ;;  %v4857_v62 = vld [vmem:[#allocation6 + $0x20] sm:$0xff] }
 0xaad   :  { %v3773_v11 = vpop.eup %3772 }
 0xaae   :  { %1073 = vrot.lane.b32.xlu0 %v3773_v11, %s4076_s20  ;;  %1327 = vrot.lane.b32.xlu1 %v4741_v2, %s4076_s20  ;;  %v4861_v11 = vld [vmem:[#allocation6 + $0x18] sm:$0xff] }
 0xb02   :  { %v1562_v35 = vpop.permute.xlu1 %1561 }
 0xb03   :  { %v1564_v13 = vadd.f32 %v1562_v35, %v275_v36  ;;  %v4843_v36 = vld [vmem:[#allocation6 + $0x38] sm:$0xff]  ;;  %v4869_v35 = vld [vmem:[#allocation6 + $0x8] sm:$0xff] }
 0xb05   :  { %3774 = vtanh.f32 %v1564_v13  ;;  %v4873_v13 = vld [vmem:[#allocation6] sm:$0xff] }
 0xb0c   :  { %v1323_v37 = vpop.permute.xlu0 %1322 }
 0xb0d   :  { %v4831_v31 = vmul.f32 %v3759_v6, %v1323_v37  ;;  %v4865_v37 = vld [vmem:[#allocation6 + $0x10] sm:$0xff] }
 0xb0f   :  { %5520 = vst [vmem:[#allocation13_spill] sm:$0xff] %v4831_v31  ;;  %1579 = vrot.lane.b32.xlu1 %v4831_v31, %s4076_s20 }
 0xb12   :  { %v3775_v26 = vpop.eup %3774 }
 0xb1c   :  { %v1544_v47 = vpop.permute.xlu1 %1543 }
 0xb1d   :  { %v1546_v43 = vmul.f32 %v3761_v22, %v1544_v47  ;;  %v4849_v22 = vld [vmem:[#allocation6 + $0x30] sm:$0xff] }
 0xb1f   :  { %1575 = vrot.lane.b32.xlu0 %v1546_v43, %s4074_s23 }
 0xb20   :  { %v1074_v24 = vpop.permute.xlu0 %1073  ;;  %v1328_v6 = vpop.permute.xlu1 %1327 }
 0xb21   :  { %v1076_v40 = vmul.f32 %v1074_v24, %v1071_v16 }
 0xb23   :  { %v4837_v27 = vadd.f32 %v1077_v8, %v1076_v40  ;;  %1568 = vrot.lane.b32.xlu0 %v3775_v26, %s4076_s20  ;;  %v1566_v8 = vsub.f32 1.0, %v4818_v10  ;;  %v1572_v26 = vmul.f32 %v4818_v10, %v4741_v2 }
 0xb25   :  { %5521 = vst [vmem:[#allocation25_spill] sm:$0xff] %v4837_v27  ;;  %v1330_v58 = vsel %vm474_vm9, %v1328_v6, %v4837_v27 }
 0xb26   :  { %3365 = vmatmul.mubr.msk.f32.vlgmr.msra.gmra.mxu1 %vm336_vm10, %v1330_v58 }
 0xb27   :  { %3549 = vmatpush3.msra.mxu1 %v4843_v36  ;;  %3564 = vmatprep.mubr.msk.f32.mxu1 %vm4077_vm2, %v5515_v46 }
 0xb28   :  { %3550 = vmatprep.subr.mxu1 %v5515_v46 }
 0xb29   :  { %3551 = vmatpush3.msra.mxu1 %v4849_v22 }
 0xb2a   :  { %3552 = vmatprep.subr.mxu1 %v5515_v46 }
 0xb2b   :  { %3553 = vmatpush3.msra.mxu1 %v4853_v55 }
 0xb2c   :  { %3554 = vmatprep.subr.mxu1 %v5515_v46 }
 0xb2d   :  { %3555 = vmatpush3.msra.mxu1 %v4857_v62 }
 0xb2e   :  { %3556 = vmatprep.subr.mxu1 %v5515_v46 }
 0xb2f   :  { %3557 = vmatpush3.msra.mxu1 %v4861_v11 }
 0xb30   :  { %3558 = vmatprep.subr.mxu1 %v5515_v46 }
 0xb31   :  { %3559 = vmatpush3.msra.mxu1 %v4865_v37 }
 0xb32   :  { %3560 = vmatprep.subr.mxu1 %v5515_v46 }
 0xb33   :  { %3561 = vmatpush3.msra.mxu1 %v4869_v35 }
 0xb34   :  { %3562 = vmatprep.subr.mxu1 %v5515_v46 }
 0xb35   :  { %3563 = vmatpush3.msra.mxu1 %v4873_v13 }
 0xb36   :  { %1821 = vmatprep.subr.mxu1 %v4672_v53 }
 0xb81   :  { %v1580_v47 = vpop.permute.xlu1 %1579 }
 0xb91   :  { %v1576_v43 = vpop.permute.xlu0 %1575 }
 0xb92   :  { %v1582_v16 = vsel %vm474_vm9, %v1576_v43, %v1580_v47 }
 0xb93   :  { %3565 = vmatmul.mubr.msk.f32.vlgmr.msra.gmra.mxu1 %vm336_vm10, %v1582_v16 }
 0xb94   :  { %1822 = vmatpush1.msra.mxu1 %v4680_v59  ;;  %1869 = vmatprep.mubr.f32.mxu1 %v5515_v46 }
 0xb95   :  { %1823 = vmatprep.subr.mxu1 %v4687_v60  ;;  %v1569_v24 = vpop.permute.xlu0 %1568 }
 0xb96   :  { %1824 = vmatpush1.msra.mxu1 %v4693_v61  ;;  %v1571_v40 = vmul.f32 %v1569_v24, %v1566_v8 }
 0xb97   :  { %1825 = vmatprep.subr.mxu1 %v4699_v7 }
 0xb98   :  { %1826 = vmatpush1.msra.mxu1 %v4706_v18  ;;  %v4893_v6 = vadd.f32 %v1572_v26, %v1571_v40 }
 0xb99   :  { %1827 = vmatprep.subr.mxu1 %v4712_v28 }
 0xb9a   :  { %1828 = vmatpush1.msra.mxu1 %v4718_v51  ;;  %v1801_v58 = vsel %vm474_vm9, %v1576_v43, %v4893_v6 }
 0xb9b   :  { %1829 = vmatprep.subr.mxu1 %v4724_v45 }
 0xb9c   :  { %1830 = vmatpush1.msra.mxu1 %v4732_v44 }
 0xb9d   :  { %1831 = vmatprep.subr.mxu1 %v4738_v52 }
 0xb9e   :  { %1832 = vmatpush1.msra.mxu1 %v4746_v5 }
 0xb9f   :  { %1833 = vmatprep.subr.mxu1 %v4752_v32 }
 0xba0   :  { %1834 = vmatpush1.msra.mxu1 %v4758_v38 }
 0xba1   :  { %1835 = vmatprep.subr.mxu1 %v4764_v41 }
 0xba2   :  { %1836 = vmatpush1.msra.mxu1 %v4770_v42 }
 0xba3   :  { %3376 = vmatmul.mubr.msk.f32.vlgmr.msra.gmra.mxu1 %vm336_vm10, %v1801_v58  ;;  %2058 = vmatprep.subr.mxu1 %v4439_v50 }
 0xba4   :  { %2059 = vmatpush1.msra.mxu1 %v4447_v15  ;;  %2106 = vmatprep.mubr.f32.mxu1 %v5515_v46 }
 0xba5   :  { %2060 = vmatprep.subr.mxu1 %v4450_v17 }
 0xba6   :  { %2061 = vmatpush1.msra.mxu1 %v4454_v19 }
 0xba7   :  { %2062 = vmatprep.subr.mxu1 %v4456_v29 }
 0xba8   :  { %2063 = vmatpush1.msra.mxu1 %v4458_v21 }
 0xba9   :  { %2064 = vmatprep.subr.mxu1 %v4462_v23 }
 0xbaa   :  { %2065 = vmatpush1.msra.mxu1 %v4466_v25 }
 0xbab   :  { %2066 = vmatprep.subr.mxu1 %v4471_v33 }
 0xbac   :  { %2067 = vmatpush1.msra.mxu1 %v4477_v48 }
 0xbad   :  { %2068 = vmatprep.subr.mxu1 %v4483_v12 }
 0xbae   :  { %2069 = vmatpush1.msra.mxu1 %v4497_v30  ;;  %v5522_v30 = vld [vmem:[#allocation14_spill] sm:$0xff] }
 0xbaf   :  { %2070 = vmatprep.subr.mxu1 %v4502_v54  ;;  %v279_v54 = vadd.f32 %v5522_v30, %v4292_v63 }
 0xbb0   :  { %2071 = vmatpush1.msra.mxu1 %v4504_v49 }
 0xbb1   :  { %2072 = vmatprep.subr.mxu1 %v4511_v1  ;;  %v4927_v1 = vld [vmem:[%s5489_s7] ss:$0 sm:$0xff] }
 0xbb2   :  { %2073 = vmatpush1.msra.mxu1 %v4514_v14 }
 0xbb3   :  { %3586 = vmatprep.subr.mxu1 %v5515_v46 }
 0xbe6   :  { %v1400_v50 = vpop.f32.mrf.mxu1 }
 0xbe7   :  { %v1405_v19 = vadd.f32 %v4614_v34, %v1400_v50 }
 0xbe8   :  { %v1402_v15 = vpop.f32.mrf.mxu1 }
 0xbe9   :  { %v1406_v17 = vadd.f32 %v4605_v20, %v1402_v15 }
 0xbeb   :  { %1415 = vrot.lane.b32.xlu1 %v1406_v17, %s4074_s23  ;;  %v1407_v29 = vadd.f32 %v1406_v17, %v1405_v19 }
 0xbed   :  { %v3366_v21 = vmul.f32 -1.442695, %v1407_v29 }
 0xbef   :  { %3776 = vpow2.f32 %v3366_v21 }
 0xbfc   :  { %v3777_v23 = vpop.eup %3776 }
 0xbfd   :  { %v1411_v33 = vadd.f32 1.0, %v3777_v23 }
 0xc53   :  { %v1652_v25 = vpop.f32.mrf.mxu1 }
 0xc54   :  { %v1653_v48 = vadd.f32 %v4927_v1, %v1652_v25 }
 0xc55   :  { %v3566_v12 = vpop.f32.mrf.mxu1 }
 0xc56   :  { %3778 = vtanh.f32 %v1653_v48  ;;  %v3372_v24 = vmul.f32 -1.442695, %v1653_v48 }
 0xc57   :  { %3780 = vrcp.f32 %v1411_v33 }
 0xc5d   :  { %v1416_v14 = vpop.permute.xlu1 %1415 }
 0xc63   :  { %v3779_v49 = vpop.eup %3778  ;;  %v1871_v2 = vpop.f32.mrf.mxu1 }
 0xc64   :  { %v1876_v10 = vadd.f32 %v1871_v2, %v279_v54  ;;  %1665 = vrot.lane.b32.xlu0 %v3779_v49, %s4075_s25  ;;  %v3781_v47 = vpop.eup %3780  ;;  %v5523_v49 = vld [vmem:[#allocation15_spill] sm:$0xff] }
 0xc65   :  { %v1418_v43 = vmul.f32 %v3781_v47, %v1416_v14  ;;  %v1873_v21 = vpop.f32.mrf.mxu1  ;;  %v281_v14 = vadd.f32 %v5523_v49, %v4294_v0 }
 0xc66   :  { %3782 = vtanh.f32 %v1876_v10  ;;  %v3377_v8 = vmul.f32 -1.442695, %v1876_v10  ;;  %v1901_v25 = vadd.f32 %v4806_v4, %v1873_v21 }
 0xc67   :  { %3784 = vpow2.f32 %v3372_v24 }
 0xc68   :  { %1420 = vrot.lane.b32.xlu0 %v1418_v43, %s4074_s23  ;;  %3786 = vpow2.f32 %v3377_v8  ;;  %v1902_v2 = vadd.f32 %v1901_v25, %v281_v14 }
 0xc6a   :  { %v3378_v10 = vmul.f32 -1.442695, %v1902_v2 }
 0xc73   :  { %v3783_v16 = vpop.eup %3782 }
 0xc74   :  { %1886 = vrot.lane.b32.xlu1 %v3783_v16, %s4075_s25  ;;  %v3785_v40 = vpop.eup %3784 }
 0xc75   :  { %v1659_v26 = vadd.f32 1.0, %v3785_v40  ;;  %v3787_v58 = vpop.eup %3786 }
 0xc76   :  { %v1880_v50 = vadd.f32 1.0, %v3787_v58 }
 0xc77   :  { %3788 = vrcp.f32 %v1659_v26 }
 0xc78   :  { %3790 = vrcp.f32 %v1880_v50 }
 0xc84   :  { %v4935_v15 = vpop.eup %3788 }
 0xc85   :  { %v3791_v48 = vpop.eup %3790  ;;  %v1663_v16 = vmul.f32 %v4935_v15, %v4815_v9  ;;  %v1425_v9 = vsub.f32 1.0, %v3781_v47 }
 0xc86   :  { %v1884_v50 = vmul.f32 %v3791_v48, %v4823_v57 }
 0xcd6   :  { %v1666_v17 = vpop.permute.xlu0 %1665 }
 0xcd7   :  { %v1668_v29 = vmul.f32 %v4935_v15, %v1666_v17 }
 0xcd9   :  { %1670 = vrot.lane.b32.xlu1 %v1668_v29, %s4075_s25 }
 0xcda   :  { %v1421_v23 = vpop.permute.xlu0 %1420 }
 0xcdb   :  { %v1423_v33 = vadd.f32 %v1421_v23, %v1405_v19 }
 0xcdd   :  { %3792 = vtanh.f32 %v1423_v33  ;;  %1910 = vrot.lane.b32.xlu1 %v1901_v25, %s4074_s23  ;;  %v1431_v25 = vmul.f32 %v3781_v47, %v4837_v27 }
 0xcde   :  { %3794 = vpow2.f32 %v3378_v10 }
 0xce1   :  { %1681 = vrot.lane.b32.xlu1 %v4893_v6, %s4076_s20 }
 0xce6   :  { %v1887_v12 = vpop.permute.xlu1 %1886 }
 0xce7   :  { %v1889_v30 = vmul.f32 %v3791_v48, %v1887_v12 }
 0xce9   :  { %1891 = vrot.lane.b32.xlu0 %v1889_v30, %s4075_s25 }
 0xcea   :  { %v3793_v54 = vpop.eup %3792 }
 0xceb   :  { %v3795_v19 = vpop.eup %3794 }
 0xcec   :  { %v1906_v43 = vadd.f32 1.0, %v3795_v19 }
 0xced   :  { %1427 = vrot.lane.b32.xlu0 %v3793_v54, %s4076_s20 }
 0xcee   :  { %3796 = vrcp.f32 %v1906_v43 }
 0xcfb   :  { %v4952_v40 = vpop.eup %3796 }
 0xd4b   :  { %v1671_v24 = vpop.permute.xlu1 %1670 }
 0xd4c   :  { %v4949_v8 = vadd.f32 %v1671_v24, %v1663_v16 }
 0xd4e   :  { %3798 = vtanh.f32 %v4949_v8 }
 0xd4f   :  { %v1911_v26 = vpop.permute.xlu1 %1910 }
 0xd50   :  { %v1913_v58 = vmul.f32 %v4952_v40, %v1911_v26 }
 0xd52   :  { %1915 = vrot.lane.b32.xlu0 %v1913_v58, %s4074_s23 }
 0xd53   :  { %v1682_v30 = vpop.permute.xlu1 %1681 }
 0xd5b   :  { %v3799_v17 = vpop.eup %3798  ;;  %v1892_v29 = vpop.permute.xlu0 %1891 }
 0xd5c   :  { %v4957_v21 = vadd.f32 %v1892_v29, %v1884_v50  ;;  %1676 = vrot.lane.b32.xlu1 %v3799_v17, %s4075_s25  ;;  %v1926_v29 = vmul.f32 %v4952_v40, %v4893_v6  ;;  %v5021_v6 = vld [vmem:[#allocation8 + $0x78] sm:$0xff] }
 0xd5e   :  { %3800 = vtanh.f32 %v4957_v21 }
 0xd5f   :  { %v1428_v23 = vpop.permute.xlu0 %1427 }
 0xd60   :  { %v1430_v33 = vmul.f32 %v1428_v23, %v1425_v9 }
 0xd62   :  { %v4962_v12 = vadd.f32 %v1431_v25, %v1430_v33  ;;  %v5028_v25 = vld [vmem:[#allocation8 + $0x68] sm:$0xff]  ;;  %v5031_v33 = vld [vmem:[#allocation8 + $0x60] sm:$0xff] }
 0xd64   :  { %5524 = vst [vmem:[#allocation14_spill] sm:$0xff] %v4962_v12  ;;  %v1684_v54 = vsel %vm474_vm9, %v1682_v30, %v4962_v12  ;;  %v5034_v30 = vld [vmem:[#allocation8 + $0x58] sm:$0xff] }
 0xd65   :  { %3373 = vmatmul.mubr.msk.f32.vlgmr.msra.gmra.mxu0 %vm336_vm10, %v1684_v54  ;;  %v5037_v54 = vld [vmem:[#allocation8 + $0x50] sm:$0xff] }
 0xd66   :  { %3568 = vmatpush3.msra.mxu0 %v4843_v36  ;;  %3583 = vmatprep.mubr.msk.f32.mxu0 %vm4077_vm2, %v5515_v46 }
 0xd67   :  { %3569 = vmatprep.subr.mxu0 %v5515_v46 }
 0xd68   :  { %3570 = vmatpush3.msra.mxu0 %v4849_v22 }
 0xd69   :  { %3571 = vmatprep.subr.mxu0 %v5515_v46 }
 0xd6a   :  { %3572 = vmatpush3.msra.mxu0 %v4853_v55 }
 0xd6b   :  { %v3801_v57 = vpop.eup %3800  ;;  %3573 = vmatprep.subr.mxu0 %v5515_v46 }
 0xd6c   :  { %1897 = vrot.lane.b32.xlu0 %v3801_v57, %s4075_s25  ;;  %3574 = vmatpush3.msra.mxu0 %v4857_v62  ;;  %v5040_v57 = vld [vmem:[#allocation8 + $0x48] sm:$0xff] }
 0xd6d   :  { %3575 = vmatprep.subr.mxu0 %v5515_v46 }
 0xd6e   :  { %3576 = vmatpush3.msra.mxu0 %v4861_v11 }
 0xd6f   :  { %3577 = vmatprep.subr.mxu0 %v5515_v46 }
 0xd70   :  { %3578 = vmatpush3.msra.mxu0 %v4865_v37 }
 0xd71   :  { %3579 = vmatprep.subr.mxu0 %v5515_v46 }
 0xd72   :  { %3580 = vmatpush3.msra.mxu0 %v4869_v35 }
 0xd73   :  { %3581 = vmatprep.subr.mxu0 %v5515_v46 }
 0xd74   :  { %3582 = vmatpush3.msra.mxu0 %v4873_v13 }
 0xd75   :  { %2175 = vmatprep.subr.mxu0 %v4672_v53 }
 0xdc4   :  { %v1916_v2 = vpop.permute.xlu0 %1915 }
 0xdc5   :  { %v1918_v10 = vadd.f32 %v1916_v2, %v281_v14  ;;  %v5046_v2 = vld [vmem:[#allocation8 + $0x38] sm:$0xff] }
 0xdc7   :  { %3802 = vtanh.f32 %v1918_v10  ;;  %v5049_v10 = vld [vmem:[#allocation8 + $0x30] sm:$0xff] }
 0xdce   :  { %v1677_v47 = vpop.permute.xlu1 %1676 }
 0xdcf   :  { %v4987_v49 = vmul.f32 %v4935_v15, %v1677_v47  ;;  %v5043_v47 = vld [vmem:[#allocation8 + $0x40] sm:$0xff] }
 0xdd1   :  { %5525 = vst [vmem:[#allocation15_spill] sm:$0xff] %v4987_v49  ;;  %1933 = vrot.lane.b32.xlu0 %v4987_v49, %s4076_s20 }
 0xdd4   :  { %v3803_v16 = vpop.eup %3802 }
 0xdde   :  { %v1898_v19 = vpop.permute.xlu0 %1897 }
 0xddf   :  { %v1900_v43 = vmul.f32 %v3791_v48, %v1898_v19  ;;  %v5052_v19 = vld [vmem:[#allocation8 + $0x28] sm:$0xff] }
 0xde1   :  { %1929 = vrot.lane.b32.xlu1 %v1900_v43, %s4074_s23  ;;  %v5055_v43 = vld [vmem:[#allocation8 + $0x20] sm:$0xff] }
 0xde5   :  { %1922 = vrot.lane.b32.xlu1 %v3803_v16, %s4076_s20 }
 0xe25   :  { %v1754_v24 = vpop.f32.mrf.mxu0 }
 0xe26   :  { %v1759_v16 = vadd.f32 %v4614_v34, %v1754_v24 }
 0xe27   :  { %v1756_v26 = vpop.f32.mrf.mxu0 }
 0xe28   :  { %v1760_v58 = vadd.f32 %v4605_v20, %v1756_v26  ;;  %v1920_v20 = vsub.f32 1.0, %v4952_v40  ;;  %v5024_v40 = vld [vmem:[#allocation8 + $0x70] sm:$0xff]  ;;  %v5059_v26 = vld [vmem:[#allocation8 + $0x18] sm:$0xff] }
 0xe2a   :  { %1769 = vrot.lane.b32.xlu0 %v1760_v58, %s4074_s23 }
 0xe43   :  { %v1934_v15 = vpop.permute.xlu0 %1933 }
 0xe53   :  { %v1930_v50 = vpop.permute.xlu1 %1929 }
 0xe54   :  { %v1936_v17 = vsel %vm474_vm9, %v1930_v50, %v1934_v15  ;;  %v5062_v15 = vld [vmem:[#allocation8 + $0x10] sm:$0xff] }
 0xe55   :  { %3584 = vmatmul.mubr.msk.f32.vlgmr.msra.gmra.mxu0 %vm336_vm10, %v1936_v17  ;;  %v5065_v17 = vld [vmem:[#allocation8 + $0x8] sm:$0xff] }
 0xe56   :  { %2176 = vmatpush1.msra.mxu0 %v4680_v59  ;;  %2223 = vmatprep.mubr.f32.mxu0 %v5515_v46 }
 0xe57   :  { %2177 = vmatprep.subr.mxu0 %v4687_v60  ;;  %v1923_v48 = vpop.permute.xlu1 %1922 }
 0xe58   :  { %2178 = vmatpush1.msra.mxu0 %v4693_v61  ;;  %v1925_v14 = vmul.f32 %v1923_v48, %v1920_v20  ;;  %v5068_v48 = vld [vmem:[#allocation8] sm:$0xff] }
 0xe59   :  { %2179 = vmatprep.subr.mxu0 %v4699_v7 }
 0xe5a   :  { %2180 = vmatpush1.msra.mxu0 %v4706_v18  ;;  %v5011_v9 = vadd.f32 %v1926_v29, %v1925_v14 }
 0xe5b   :  { %2181 = vmatprep.subr.mxu0 %v4712_v28 }
 0xe5c   :  { %2182 = vmatpush1.msra.mxu0 %v4718_v51  ;;  %v2155_v23 = vsel %vm474_vm9, %v1930_v50, %v5011_v9  ;;  %v1761_v50 = vadd.f32 %v1760_v58, %v1759_v16 }
 0xe5d   :  { %2183 = vmatprep.subr.mxu0 %v4724_v45 }
 0xe5e   :  { %2184 = vmatpush1.msra.mxu0 %v4732_v44  ;;  %v3374_v34 = vmul.f32 -1.442695, %v1761_v50  ;;  %v285_v50 = vadd.f32 %v5526_v56, %v4292_v63 }
 0xe5f   :  { %2185 = vmatprep.subr.mxu0 %v4738_v52 }
 0xe60   :  { %2186 = vmatpush1.msra.mxu0 %v4746_v5  ;;  %3804 = vpow2.f32 %v3374_v34 }
 0xe61   :  { %2187 = vmatprep.subr.mxu0 %v4752_v32 }
 0xe62   :  { %2188 = vmatpush1.msra.mxu0 %v4758_v38 }
 0xe63   :  { %2189 = vmatprep.subr.mxu0 %v4764_v41 }
 0xe64   :  { %2190 = vmatpush1.msra.mxu0 %v4770_v42 }
 0xe65   :  { %3384 = vmatmul.mubr.msk.f32.vlgmr.msra.gmra.mxu0 %vm336_vm10, %v2155_v23  ;;  %2412 = vmatprep.subr.mxu0 %v5021_v6 }
 0xe66   :  { %2413 = vmatpush1.msra.mxu0 %v5024_v40  ;;  %2460 = vmatprep.mubr.f32.mxu0 %v5515_v46 }
 0xe67   :  { %2414 = vmatprep.subr.mxu0 %v5028_v25 }
 0xe68   :  { %2415 = vmatpush1.msra.mxu0 %v5031_v33 }
 0xe69   :  { %2416 = vmatprep.subr.mxu0 %v5034_v30 }
 0xe6a   :  { %2417 = vmatpush1.msra.mxu0 %v5037_v54 }
 0xe6b   :  { %2418 = vmatprep.subr.mxu0 %v5040_v57 }
 0xe6c   :  { %2419 = vmatpush1.msra.mxu0 %v5043_v47 }
 0xe6d   :  { %2420 = vmatprep.subr.mxu0 %v5046_v2  ;;  %v3805_v24 = vpop.eup %3804 }
 0xe6e   :  { %2421 = vmatpush1.msra.mxu0 %v5049_v10  ;;  %v1765_v20 = vadd.f32 1.0, %v3805_v24 }
 0xe6f   :  { %2422 = vmatprep.subr.mxu0 %v5052_v19 }
 0xe70   :  { %2423 = vmatpush1.msra.mxu0 %v5055_v43  ;;  %3806 = vrcp.f32 %v1765_v20 }
 0xe71   :  { %2424 = vmatprep.subr.mxu0 %v5059_v26 }
 0xe72   :  { %2425 = vmatpush1.msra.mxu0 %v5062_v15 }
 0xe73   :  { %2426 = vmatprep.subr.mxu0 %v5065_v17 }
 0xe74   :  { %2427 = vmatpush1.msra.mxu0 %v5068_v48 }
 0xe75   :  { %3605 = vmatprep.subr.mxu0 %v5515_v46 }
 0xe7d   :  { %v3807_v14 = vpop.eup %3806 }
 0xe9c   :  { %v1770_v29 = vpop.permute.xlu0 %1769 }
 0xe9d   :  { %v1772_v23 = vmul.f32 %v3807_v14, %v1770_v29 }
 0xe9f   :  { %1774 = vrot.lane.b32.xlu1 %v1772_v23, %s4074_s23 }
 0xf11   :  { %v1775_v58 = vpop.permute.xlu1 %1774 }
 0xf12   :  { %v1777_v3 = vadd.f32 %v1775_v58, %v1759_v16 }
 0xf15   :  { %v2006_v49 = vpop.f32.mrf.mxu0 }
 0xf16   :  { %v2007_v31 = vadd.f32 %v4927_v1, %v2006_v49 }
 0xf17   :  { %v3585_v39 = vpop.f32.mrf.mxu0 }
 0xf18   :  { %3808 = vtanh.f32 %v2007_v31  ;;  %v3380_v39 = vmul.f32 -1.442695, %v2007_v31 }
 0xf19   :  { %3810 = vtanh.f32 %v1777_v3 }
 0xf25   :  { %v3809_v34 = vpop.eup %3808  ;;  %v2225_v27 = vpop.f32.mrf.mxu0 }
 0xf26   :  { %v2230_v24 = vadd.f32 %v2225_v27, %v285_v50  ;;  %2019 = vrot.lane.b32.xlu0 %v3809_v34, %s4075_s25  ;;  %v3811_v20 = vpop.eup %3810 }
 0xf27   :  { %v2227_v34 = vpop.f32.mrf.mxu0 }
 0xf28   :  { %3812 = vtanh.f32 %v2230_v24  ;;  %v3385_v3 = vmul.f32 -1.442695, %v2230_v24 }
 0xf29   :  { %3814 = vpow2.f32 %v3380_v39 }
 0xf2a   :  { %1781 = vrot.lane.b32.xlu0 %v3811_v20, %s4076_s20  ;;  %3816 = vpow2.f32 %v3385_v3  ;;  %v2255_v20 = vadd.f32 %v4806_v4, %v2227_v34  ;;  %v1785_v3 = vmul.f32 %v3807_v14, %v4962_v12 }
 0xf35   :  { %v3813_v29 = vpop.eup %3812 }
 0xf36   :  { %2240 = vrot.lane.b32.xlu1 %v3813_v29, %s4075_s25  ;;  %v3815_v49 = vpop.eup %3814  ;;  %v1779_v29 = vsub.f32 1.0, %v3807_v14  ;;  %v5527_v14 = vld [vmem:[#allocation17_spill] sm:$0xff] }
 0xf37   :  { %v2013_v56 = vadd.f32 1.0, %v3815_v49  ;;  %v3817_v27 = vpop.eup %3816 }
 0xf38   :  { %v2234_v16 = vadd.f32 1.0, %v3817_v27 }
 0xf39   :  { %3818 = vrcp.f32 %v2013_v56 }
 0xf3a   :  { %2035 = vrot.lane.b32.xlu1 %v5011_v9, %s4076_s20  ;;  %3820 = vrcp.f32 %v2234_v16 }
 0xf46   :  { %v3819_v23 = vpop.eup %3818 }
 0xf47   :  { %v3821_v39 = vpop.eup %3820 }
 0xf98   :  { %v2020_v58 = vpop.permute.xlu0 %2019 }
 0xf99   :  { %v2022_v50 = vmul.f32 %v3819_v23, %v2020_v58 }
 0xf9b   :  { %2024 = vrot.lane.b32.xlu0 %v2022_v50, %s4075_s25  ;;  %v287_v50 = vadd.f32 %v5527_v14, %v4294_v0 }
 0xf9c   :  { %v1782_v31 = vpop.permute.xlu0 %1781 }
 0xf9d   :  { %v1784_v24 = vmul.f32 %v1782_v31, %v1779_v29  ;;  %v2256_v34 = vadd.f32 %v2255_v20, %v287_v50 }
 0xf9f   :  { %2264 = vrot.lane.b32.xlu0 %v2255_v20, %s4074_s23  ;;  %v5085_v27 = vadd.f32 %v1785_v3, %v1784_v24  ;;  %v3386_v31 = vmul.f32 -1.442695, %v2256_v34 }
 0xfa1   :  { %3822 = vpow2.f32 %v3386_v31 }
 0xfa8   :  { %v2241_v49 = vpop.permute.xlu1 %2240 }
 0xfa9   :  { %v2243_v56 = vmul.f32 %v3821_v39, %v2241_v49  ;;  %v2017_v49 = vmul.f32 %v3819_v23, %v4949_v8 }
 0xfab   :  { %2245 = vrot.lane.b32.xlu1 %v2243_v56, %s4075_s25 }
 0xfac   :  { %v2036_v58 = vpop.permute.xlu1 %2035 }
 0xfad   :  { %v2038_v16 = vsel %vm474_vm9, %v2036_v58, %v5085_v27 }
 0xfae   :  { %3381 = vmatmul.mubr.msk.f32.vlgmr.msra.gmra.mxu1 %vm336_vm10, %v2038_v16  ;;  %v3823_v29 = vpop.eup %3822 }
 0xfaf   :  { %3587 = vmatpush3.msra.mxu1 %v4843_v36  ;;  %3602 = vmatprep.mubr.msk.f32.mxu1 %vm4077_vm2, %v5515_v46  ;;  %v2260_v24 = vadd.f32 1.0, %v3823_v29 }
 0xfb0   :  { %3588 = vmatprep.subr.mxu1 %v5515_v46 }
 0xfb1   :  { %3589 = vmatpush3.msra.mxu1 %v4849_v22  ;;  %3824 = vrcp.f32 %v2260_v24 }
 0xfb2   :  { %3590 = vmatprep.subr.mxu1 %v5515_v46 }
 0xfb3   :  { %3591 = vmatpush3.msra.mxu1 %v4853_v55 }
 0xfb4   :  { %3592 = vmatprep.subr.mxu1 %v5515_v46 }
 0xfb5   :  { %3593 = vmatpush3.msra.mxu1 %v4857_v62 }
 0xfb6   :  { %3594 = vmatprep.subr.mxu1 %v5515_v46 }
 0xfb7   :  { %3595 = vmatpush3.msra.mxu1 %v4861_v11 }
 0xfb8   :  { %3596 = vmatprep.subr.mxu1 %v5515_v46 }
 0xfb9   :  { %3597 = vmatpush3.msra.mxu1 %v4865_v37 }
 0xfba   :  { %3598 = vmatprep.subr.mxu1 %v5515_v46 }
 0xfbb   :  { %3599 = vmatpush3.msra.mxu1 %v4869_v35 }
 0xfbc   :  { %3600 = vmatprep.subr.mxu1 %v5515_v46 }
 0xfbd   :  { %3601 = vmatpush3.msra.mxu1 %v4873_v13 }
 0xfbe   :  { %2529 = vmatprep.subr.mxu1 %v4672_v53  ;;  %v3825_v58 = vpop.eup %3824  ;;  %v2238_v53 = vmul.f32 %v3821_v39, %v4957_v21  ;;  %v5129_v21 = vld [vmem:[%s5492_s10] ss:$0 sm:$0xff] }
0x100d   :  { %v2025_v3 = vpop.permute.xlu0 %2024 }
0x100e   :  { %v5112_v56 = vadd.f32 %v2025_v3, %v2017_v49 }
0x1010   :  { %3826 = vtanh.f32 %v5112_v56 }
0x1011   :  { %v2265_v16 = vpop.permute.xlu0 %2264 }
0x1012   :  { %v2267_v12 = vmul.f32 %v3825_v58, %v2265_v16 }
0x1014   :  { %2269 = vrot.lane.b32.xlu1 %v2267_v12, %s4074_s23 }
0x101d   :  { %v3827_v20 = vpop.eup %3826  ;;  %v2246_v14 = vpop.permute.xlu1 %2245 }
0x101e   :  { %v5117_v34 = vadd.f32 %v2246_v14, %v2238_v53  ;;  %2030 = vrot.lane.b32.xlu0 %v3827_v20, %s4075_s25  ;;  %v5138_v14 = vld [vmem:[%s5491_s9] ss:$0 sm:$0xff] }
0x1020   :  { %3828 = vtanh.f32 %v5117_v34 }
0x102d   :  { %v3829_v8 = vpop.eup %3828 }
0x102e   :  { %2251 = vrot.lane.b32.xlu1 %v3829_v8, %s4075_s25 }
0x106e   :  { %v2108_v31 = vpop.f32.mrf.mxu1 }
0x106f   :  { %v2113_v8 = vadd.f32 %v5138_v14, %v2108_v31  ;;  %v2274_v31 = vsub.f32 1.0, %v3825_v58 }
0x1070   :  { %v2110_v49 = vpop.f32.mrf.mxu1 }
0x1071   :  { %v2114_v12 = vadd.f32 %v5129_v21, %v2110_v49 }
0x1086   :  { %v2270_v3 = vpop.permute.xlu1 %2269 }
0x1087   :  { %v2272_v16 = vadd.f32 %v2270_v3, %v287_v50 }
0x1089   :  { %3830 = vtanh.f32 %v2272_v16 }
0x1090   :  { %v2031_v29 = vpop.permute.xlu0 %2030 }
0x1091   :  { %v5122_v24 = vmul.f32 %v3819_v23, %v2031_v29  ;;  %v2115_v29 = vadd.f32 %v2114_v12, %v2113_v8 }
0x1093   :  { %5528 = vst [vmem:[#allocation16_spill] sm:$0xff] %v5122_v24  ;;  %2287 = vrot.lane.b32.xlu1 %v5122_v24, %s4076_s20  ;;  %v3382_v49 = vmul.f32 -1.442695, %v2115_v29  ;;  %v2280_v29 = vmul.f32 %v3825_v58, %v5011_v9 }
0x1095   :  { %3832 = vpow2.f32 %v3382_v49 }
0x1096   :  { %v3831_v23 = vpop.eup %3830 }
0x1097   :  { %2123 = vrot.lane.b32.xlu1 %v2114_v12, %s4074_s23 }
0x10a0   :  { %v2252_v53 = vpop.permute.xlu1 %2251 }
0x10a1   :  { %v2254_v20 = vmul.f32 %v3821_v39, %v2252_v53 }
0x10a2   :  { %v3833_v50 = vpop.eup %3832 }
0x10a3   :  { %2283 = vrot.lane.b32.xlu0 %v2254_v20, %s4074_s23  ;;  %v2119_v3 = vadd.f32 1.0, %v3833_v50 }
0x10a5   :  { %3834 = vrcp.f32 %v2119_v3 }
0x10a7   :  { %2276 = vrot.lane.b32.xlu0 %v3831_v23, %s4076_s20 }
0x10b2   :  { %v5141_v39 = vpop.eup %3834 }
0x10b3   :  { %v2139_v9 = vmul.f32 %v5141_v39, %v5085_v27 }
0x1105   :  { %v2288_v16 = vpop.permute.xlu1 %2287 }
0x1109   :  { %v2124_v53 = vpop.permute.xlu1 %2123 }
0x110a   :  { %v2126_v20 = vmul.f32 %v5141_v39, %v2124_v53 }
0x110c   :  { %2128 = vrot.lane.b32.xlu0 %v2126_v20, %s4074_s23 }
0x1115   :  { %v2284_v23 = vpop.permute.xlu0 %2283 }
0x1116   :  { %v2290_v24 = vsel %vm474_vm9, %v2284_v23, %v2288_v16 }
0x1117   :  { %3603 = vmatmul.mubr.msk.f32.vlgmr.msra.gmra.mxu1 %vm336_vm10, %v2290_v24 }
0x1118   :  { %2530 = vmatpush1.msra.mxu1 %v4680_v59  ;;  %2577 = vmatprep.mubr.f32.mxu1 %v5515_v46 }
0x1119   :  { %2531 = vmatprep.subr.mxu1 %v4687_v60  ;;  %v2277_v12 = vpop.permute.xlu0 %2276 }
0x111a   :  { %v2279_v49 = vmul.f32 %v2277_v12, %v2274_v31  ;;  %2532 = vmatpush1.msra.mxu1 %v4693_v61 }
0x111b   :  { %2533 = vmatprep.subr.mxu1 %v4699_v7 }
0x111c   :  { %v5153_v50 = vadd.f32 %v2280_v29, %v2279_v49  ;;  %2534 = vmatpush1.msra.mxu1 %v4706_v18  ;;  %v5530_v29 = vld [vmem:[#allocation19_spill] sm:$0xff] }
0x111d   :  { %2535 = vmatprep.subr.mxu1 %v4712_v28  ;;  %v293_v49 = vadd.f32 %v5530_v29, %v4294_v0 }
0x111e   :  { %2536 = vmatpush1.msra.mxu1 %v4718_v51  ;;  %2389 = vrot.lane.b32.xlu0 %v5153_v50, %s4076_s20  ;;  %v2509_v59 = vsel %vm474_vm9, %v2284_v23, %v5153_v50 }
0x111f   :  { %2537 = vmatprep.subr.mxu1 %v4724_v45  ;;  %v5529_v45 = vld [vmem:[#allocation18_spill] sm:$0xff] }
0x1120   :  { %2538 = vmatpush1.msra.mxu1 %v4732_v44  ;;  %v291_v44 = vadd.f32 %v5529_v45, %v4292_v63 }
0x1121   :  { %2539 = vmatprep.subr.mxu1 %v4738_v52 }
0x1122   :  { %2540 = vmatpush1.msra.mxu1 %v4746_v5 }
0x1123   :  { %2541 = vmatprep.subr.mxu1 %v4752_v32 }
0x1124   :  { %2542 = vmatpush1.msra.mxu1 %v4758_v38 }
0x1125   :  { %2543 = vmatprep.subr.mxu1 %v4764_v41  ;;  %v2133_v41 = vsub.f32 1.0, %v5141_v39 }
0x1126   :  { %2544 = vmatpush1.msra.mxu1 %v4770_v42 }
0x1127   :  { %3392 = vmatmul.mubr.msk.f32.vlgmr.msra.gmra.mxu1 %vm336_vm10, %v2509_v59  ;;  %2766 = vmatprep.subr.mxu1 %v5021_v6 }
0x1128   :  { %2767 = vmatpush1.msra.mxu1 %v5024_v40  ;;  %2814 = vmatprep.mubr.f32.mxu1 %v5515_v46 }
0x1129   :  { %2768 = vmatprep.subr.mxu1 %v5028_v25 }
0x112a   :  { %2769 = vmatpush1.msra.mxu1 %v5031_v33 }
0x112b   :  { %2770 = vmatprep.subr.mxu1 %v5034_v30 }
0x112c   :  { %2771 = vmatpush1.msra.mxu1 %v5037_v54 }
0x112d   :  { %2772 = vmatprep.subr.mxu1 %v5040_v57 }
0x112e   :  { %2773 = vmatpush1.msra.mxu1 %v5043_v47 }
0x112f   :  { %2774 = vmatprep.subr.mxu1 %v5046_v2 }
0x1130   :  { %2775 = vmatpush1.msra.mxu1 %v5049_v10 }
0x1131   :  { %2776 = vmatprep.subr.mxu1 %v5052_v19 }
0x1132   :  { %2777 = vmatpush1.msra.mxu1 %v5055_v43 }
0x1133   :  { %2778 = vmatprep.subr.mxu1 %v5059_v26 }
0x1134   :  { %2779 = vmatpush1.msra.mxu1 %v5062_v15 }
0x1135   :  { %2780 = vmatprep.subr.mxu1 %v5065_v17 }
0x1136   :  { %2781 = vmatpush1.msra.mxu1 %v5068_v48 }
0x1137   :  { %3624 = vmatprep.subr.mxu1 %v5515_v46 }
0x117e   :  { %v2129_v60 = vpop.permute.xlu0 %2128 }
0x117f   :  { %v2131_v61 = vadd.f32 %v2129_v60, %v2113_v8 }
0x1181   :  { %3836 = vtanh.f32 %v2131_v61 }
0x118e   :  { %v3837_v7 = vpop.eup %3836 }
0x118f   :  { %2135 = vrot.lane.b32.xlu1 %v3837_v7, %s4076_s20 }
0x1190   :  { %v2390_v8 = vpop.permute.xlu0 %2389 }
0x11d7   :  { %v2360_v18 = vpop.f32.mrf.mxu1 }
0x11d8   :  { %v2361_v28 = vadd.f32 %v4927_v1, %v2360_v18 }
0x11d9   :  { %v3604_v51 = vpop.f32.mrf.mxu1 }
0x11da   :  { %3838 = vtanh.f32 %v2361_v28 }
0x11e7   :  { %v3839_v52 = vpop.eup %3838  ;;  %v2579_v5 = vpop.f32.mrf.mxu1 }
0x11e8   :  { %v2584_v32 = vadd.f32 %v2579_v5, %v291_v44  ;;  %2373 = vrot.lane.b32.xlu1 %v3839_v52, %s4075_s25 }
0x11e9   :  { %v2581_v20 = vpop.f32.mrf.mxu1 }
0x11ea   :  { %3840 = vtanh.f32 %v2584_v32 }
0x11f7   :  { %v3841_v38 = vpop.eup %3840 }
0x11f8   :  { %2594 = vrot.lane.b32.xlu0 %v3841_v38, %s4075_s25 }
0x1201   :  { %v2136_v42 = vpop.permute.xlu1 %2135 }
0x1202   :  { %v2138_v58 = vmul.f32 %v2136_v42, %v2133_v41 }
0x1204   :  { %v5198_v24 = vadd.f32 %v2139_v9, %v2138_v58 }
0x1206   :  { %v2392_v3 = vsel %vm474_vm9, %v2390_v8, %v5198_v24 }
0x1207   :  { %3389 = vmatmul.mubr.msk.f32.vlgmr.msra.gmra.mxu0 %vm336_vm10, %v2392_v3 }
0x1208   :  { %3606 = vmatpush3.msra.mxu0 %v4843_v36  ;;  %3621 = vmatprep.mubr.msk.f32.mxu0 %vm4077_vm2, %v5515_v46  ;;  %v3952_v36 = vld [vmem:[%s5486_s4 + $0x78] sm:$0xff] }
0x1209   :  { %3607 = vmatprep.subr.mxu0 %v5515_v46 }
0x120a   :  { %3608 = vmatpush3.msra.mxu0 %v4849_v22  ;;  %v3388_v22 = vmul.f32 -1.442695, %v2361_v28 }
0x120b   :  { %3609 = vmatprep.subr.mxu0 %v5515_v46 }
0x120c   :  { %3610 = vmatpush3.msra.mxu0 %v4853_v55  ;;  %3842 = vpow2.f32 %v3388_v22  ;;  %v3393_v55 = vmul.f32 -1.442695, %v2584_v32 }
0x120d   :  { %3611 = vmatprep.subr.mxu0 %v5515_v46 }
0x120e   :  { %3612 = vmatpush3.msra.mxu0 %v4857_v62  ;;  %3844 = vpow2.f32 %v3393_v55 }
0x120f   :  { %3613 = vmatprep.subr.mxu0 %v5515_v46 }
0x1210   :  { %3614 = vmatpush3.msra.mxu0 %v4861_v11 }
0x1211   :  { %3615 = vmatprep.subr.mxu0 %v5515_v46 }
0x1212   :  { %3616 = vmatpush3.msra.mxu0 %v4865_v37 }
0x1213   :  { %3617 = vmatprep.subr.mxu0 %v5515_v46 }
0x1214   :  { %3618 = vmatpush3.msra.mxu0 %v4869_v35 }
0x1215   :  { %3619 = vmatprep.subr.mxu0 %v5515_v46 }
0x1216   :  { %3620 = vmatpush3.msra.mxu0 %v4873_v13  ;;  %v2609_v13 = vadd.f32 %v4806_v4, %v2581_v20 }
0x1217   :  { %2883 = vmatprep.subr.mxu0 %v3952_v36 }
0x1218   :  { %v2610_v59 = vadd.f32 %v2609_v13, %v293_v49 }
0x1219   :  { %v3843_v62 = vpop.eup %3842 }
0x121a   :  { %v2367_v11 = vadd.f32 1.0, %v3843_v62  ;;  %v3394_v60 = vmul.f32 -1.442695, %v2610_v59 }
0x121b   :  { %v3845_v37 = vpop.eup %3844 }
0x121c   :  { %3846 = vrcp.f32 %v2367_v11  ;;  %v2588_v16 = vadd.f32 1.0, %v3845_v37 }
0x121e   :  { %3848 = vrcp.f32 %v2588_v16 }
0x121f   :  { %3850 = vpow2.f32 %v3394_v60 }
0x1229   :  { %v3847_v39 = vpop.eup %3846 }
0x122a   :  { %v2371_v18 = vmul.f32 %v3847_v39, %v5112_v56 }
0x122b   :  { %v3849_v23 = vpop.eup %3848 }
0x122c   :  { %v3851_v61 = vpop.eup %3850  ;;  %v2592_v52 = vmul.f32 %v3849_v23, %v5117_v34 }
0x122d   :  { %v2614_v7 = vadd.f32 1.0, %v3851_v61 }
0x122f   :  { %3852 = vrcp.f32 %v2614_v7  ;;  %v3955_v7 = vld [vmem:[%s5486_s4 + $0x60] sm:$0xff] }
0x123c   :  { %v3853_v51 = vpop.eup %3852 }
0x123d   :  { %v2628_v29 = vsub.f32 1.0, %v3853_v51  ;;  %v2634_v60 = vmul.f32 %v3853_v51, %v5153_v50  ;;  %v3958_v50 = vld [vmem:[%s5486_s4 + $0x48] sm:$0xff] }
0x125a   :  { %v2374_v35 = vpop.permute.xlu1 %2373 }
0x125b   :  { %v2376_v53 = vmul.f32 %v3847_v39, %v2374_v35 }
0x125d   :  { %2378 = vrot.lane.b32.xlu1 %v2376_v53, %s4075_s25 }
0x1261   :  { %2618 = vrot.lane.b32.xlu1 %v2609_v13, %s4074_s23 }
0x126a   :  { %v2595_v31 = vpop.permute.xlu0 %2594 }
0x126b   :  { %v2597_v12 = vmul.f32 %v3849_v23, %v2595_v31 }
0x126d   :  { %2599 = vrot.lane.b32.xlu0 %v2597_v12, %s4075_s25  ;;  %v3953_v12 = vld [vmem:[%s5486_s4 + $0x70] sm:$0xff] }
0x12c7   :  { %v2462_v41 = vpop.f32.mrf.mxu0 }
0x12c8   :  { %v5249_v62 = vadd.f32 %v5138_v14, %v2462_v41  ;;  %v3965_v41 = vld [vmem:[%s5486_s4 + $0x10] sm:$0xff] }
0x12c9   :  { %v2464_v58 = vpop.f32.mrf.mxu0 }
0x12ca   :  { %v2468_v34 = vadd.f32 %v5129_v21, %v2464_v58  ;;  %v3967_v58 = vld [vmem:[%s5486_s4] sm:$0xff] }
0x12cc   :  { %v2469_v11 = vadd.f32 %v2468_v34, %v5249_v62 }
0x12ce   :  { %v3390_v37 = vmul.f32 -1.442695, %v2469_v11  ;;  %v3973_v11 = vld [vmem:[#allocation6 + $0x10] sm:$0xff] }
0x12cf   :  { %v2379_v28 = vpop.permute.xlu1 %2378 }
0x12d0   :  { %v5230_v4 = vadd.f32 %v2379_v28, %v2371_v18  ;;  %v3956_v18 = vld [vmem:[%s5486_s4 + $0x58] sm:$0xff] }
0x12d2   :  { %3854 = vtanh.f32 %v5230_v4 }
0x12d3   :  { %v2619_v45 = vpop.permute.xlu1 %2618 }
0x12d4   :  { %v2621_v44 = vmul.f32 %v3853_v51, %v2619_v45  ;;  %v3957_v45 = vld [vmem:[%s5486_s4 + $0x50] sm:$0xff]  ;;  %v3959_v51 = vld [vmem:[%s5486_s4 + $0x40] sm:$0xff] }
0x12d6   :  { %2623 = vrot.lane.b32.xlu0 %v2621_v44, %s4074_s23  ;;  %v3960_v44 = vld [vmem:[%s5486_s4 + $0x38] sm:$0xff] }
0x12df   :  { %v3855_v5 = vpop.eup %3854  ;;  %v2600_v32 = vpop.permute.xlu0 %2599 }
0x12e0   :  { %v5235_v38 = vadd.f32 %v2600_v32, %v2592_v52  ;;  %2384 = vrot.lane.b32.xlu1 %v3855_v5, %s4075_s25  ;;  %v3961_v52 = vld [vmem:[%s5486_s4 + $0x30] sm:$0xff]  ;;  %v3962_v5 = vld [vmem:[%s5486_s4 + $0x28] sm:$0xff]  ;;  %v3963_v32 = vld [vmem:[%s5486_s4 + $0x20] sm:$0xff] }
0x12e2   :  { %3856 = vtanh.f32 %v5235_v38 }
0x12ef   :  { %v3857_v56 = vpop.eup %3856 }
0x12f0   :  { %2605 = vrot.lane.b32.xlu0 %v3857_v56, %s4075_s25  ;;  %v3964_v56 = vld [vmem:[%s5486_s4 + $0x18] sm:$0xff] }
0x1348   :  { %v2624_v8 = vpop.permute.xlu0 %2623 }
0x1349   :  { %v2626_v3 = vadd.f32 %v2624_v8, %v293_v49  ;;  %v3954_v49 = vld [vmem:[%s5486_s4 + $0x68] sm:$0xff] }
0x134b   :  { %3858 = vtanh.f32 %v2626_v3  ;;  %v3968_v3 = vld [vmem:[#allocation6 + $0x38] sm:$0xff] }
0x134c   :  { %3860 = vpow2.f32 %v3390_v37  ;;  %v3974_v37 = vld [vmem:[#allocation6 + $0x8] sm:$0xff] }
0x1352   :  { %v2385_v42 = vpop.permute.xlu1 %2384 }
0x1353   :  { %v5240_v9 = vmul.f32 %v3847_v39, %v2385_v42  ;;  %v3966_v42 = vld [vmem:[%s5486_s4 + $0x8] sm:$0xff] }
0x1355   :  { %2641 = vrot.lane.b32.xlu0 %v5240_v9, %s4076_s20 }
0x1358   :  { %v3859_v55 = vpop.eup %3858 }
0x1359   :  { %2477 = vrot.lane.b32.xlu0 %v2468_v34, %s4074_s23  ;;  %v3861_v16 = vpop.eup %3860 }
0x135a   :  { %v2473_v39 = vadd.f32 1.0, %v3861_v16  ;;  %v3975_v16 = vld [vmem:[#allocation6] sm:$0xff] }
0x135c   :  { %3862 = vrcp.f32 %v2473_v39 }
0x1362   :  { %v2606_v36 = vpop.permute.xlu0 %2605 }
0x1363   :  { %v2608_v22 = vmul.f32 %v3849_v23, %v2606_v36  ;;  %v3969_v36 = vld [vmem:[#allocation6 + $0x30] sm:$0xff] }
0x1365   :  { %2637 = vrot.lane.b32.xlu1 %v2608_v22, %s4074_s23  ;;  %v3970_v22 = vld [vmem:[#allocation6 + $0x28] sm:$0xff] }
0x1369   :  { %2630 = vrot.lane.b32.xlu1 %v3859_v55, %s4076_s20  ;;  %v5252_v53 = vpop.eup %3862  ;;  %v3971_v55 = vld [vmem:[#allocation6 + $0x20] sm:$0xff] }
0x13c7   :  { %v2642_v35 = vpop.permute.xlu0 %2641 }
0x13cb   :  { %v2478_v20 = vpop.permute.xlu0 %2477 }
0x13cc   :  { %v2480_v13 = vmul.f32 %v5252_v53, %v2478_v20 }
0x13ce   :  { %2482 = vrot.lane.b32.xlu1 %v2480_v13, %s4074_s23 }
0x13d7   :  { %v2638_v23 = vpop.permute.xlu1 %2637 }
0x13d8   :  { %v2644_v31 = vsel %vm474_vm9, %v2638_v23, %v2642_v35 }
0x13d9   :  { %3622 = vmatmul.mubr.msk.f32.vlgmr.msra.gmra.mxu0 %vm336_vm10, %v2644_v31 }
0x13da   :  { %2884 = vmatpush1.msra.mxu0 %v3953_v12  ;;  %2931 = vmatprep.mubr.f32.mxu0 %v5515_v46 }
0x13db   :  { %2885 = vmatprep.subr.mxu0 %v3954_v49  ;;  %v2631_v59 = vpop.permute.xlu1 %2630 }
0x13dc   :  { %v2633_v61 = vmul.f32 %v2631_v59, %v2628_v29  ;;  %2886 = vmatpush1.msra.mxu0 %v3955_v7  ;;  %v3976_v59 = vld [vmem:[%s5487_s5] ss:$0 sm:$0xff] }
0x13dd   :  { %2887 = vmatprep.subr.mxu0 %v3956_v18 }
0x13de   :  { %v5272_v28 = vadd.f32 %v2634_v60, %v2633_v61  ;;  %2888 = vmatpush1.msra.mxu0 %v3957_v45  ;;  %v5532_v45 = vld [vmem:[#allocation21_spill] sm:$0xff] }
0x13df   :  { %2889 = vmatprep.subr.mxu0 %v3958_v50  ;;  %v299_v50 = vadd.f32 %v5532_v45, %v4294_v0 }
0x13e0   :  { %2890 = vmatpush1.msra.mxu0 %v3959_v51  ;;  %2743 = vrot.lane.b32.xlu1 %v5272_v28, %s4076_s20  ;;  %v2863_v8 = vsel %vm474_vm9, %v2638_v23, %v5272_v28 }
0x13e1   :  { %2891 = vmatprep.subr.mxu0 %v3960_v44 }
0x13e2   :  { %2892 = vmatpush1.msra.mxu0 %v3961_v52 }
0x13e3   :  { %2893 = vmatprep.subr.mxu0 %v3962_v5 }
0x13e4   :  { %2894 = vmatpush1.msra.mxu0 %v3963_v32 }
0x13e5   :  { %2895 = vmatprep.subr.mxu0 %v3964_v56 }
0x13e6   :  { %2896 = vmatpush1.msra.mxu0 %v3965_v41 }
0x13e7   :  { %2897 = vmatprep.subr.mxu0 %v3966_v42 }
0x13e8   :  { %2898 = vmatpush1.msra.mxu0 %v3967_v58 }
0x13e9   :  { %3400 = vmatmul.mubr.msk.f32.vlgmr.msra.gmra.mxu0 %vm336_vm10, %v2863_v8  ;;  %3120 = vmatprep.subr.mxu0 %v5021_v6 }
0x13ea   :  { %3121 = vmatpush1.msra.mxu0 %v5024_v40  ;;  %3168 = vmatprep.mubr.f32.mxu0 %v5515_v46 }
0x13eb   :  { %3122 = vmatprep.subr.mxu0 %v5028_v25 }
0x13ec   :  { %3123 = vmatpush1.msra.mxu0 %v5031_v33 }
0x13ed   :  { %3124 = vmatprep.subr.mxu0 %v5034_v30 }
0x13ee   :  { %3125 = vmatpush1.msra.mxu0 %v5037_v54 }
0x13ef   :  { %3126 = vmatprep.subr.mxu0 %v5040_v57  ;;  %v5531_v57 = vld [vmem:[#allocation20_spill] sm:$0xff] }
0x13f0   :  { %3127 = vmatpush1.msra.mxu0 %v5043_v47  ;;  %v297_v47 = vadd.f32 %v5531_v57, %v4292_v63 }
0x13f1   :  { %3128 = vmatprep.subr.mxu0 %v5046_v2 }
0x13f2   :  { %3129 = vmatpush1.msra.mxu0 %v5049_v10 }
0x13f3   :  { %3130 = vmatprep.subr.mxu0 %v5052_v19 }
0x13f4   :  { %3131 = vmatpush1.msra.mxu0 %v5055_v43 }
0x13f5   :  { %3132 = vmatprep.subr.mxu0 %v5059_v26  ;;  %v2487_v26 = vsub.f32 1.0, %v5252_v53 }
0x13f6   :  { %3133 = vmatpush1.msra.mxu0 %v5062_v15 }
0x13f7   :  { %3134 = vmatprep.subr.mxu0 %v5065_v17 }
0x13f8   :  { %3135 = vmatpush1.msra.mxu0 %v5068_v48 }
0x1440   :  { %v2483_v6 = vpop.permute.xlu1 %2482 }
0x1441   :  { %v2485_v40 = vadd.f32 %v2483_v6, %v5249_v62  ;;  %v3972_v62 = vld [vmem:[#allocation6 + $0x18] sm:$0xff] }
0x1443   :  { %3864 = vtanh.f32 %v2485_v40 }
0x1450   :  { %v3865_v25 = vpop.eup %3864 }
0x1451   :  { %2489 = vrot.lane.b32.xlu0 %v3865_v25, %s4076_s20 }
0x1452   :  { %v2744_v34 = vpop.permute.xlu1 %2743 }
0x1499   :  { %v2714_v33 = vpop.f32.mrf.mxu0 }
0x149a   :  { %v2715_v30 = vadd.f32 %v4927_v1, %v2714_v33  ;;  %v2493_v1 = vmul.f32 %v5252_v53, %v5198_v24 }
0x149b   :  { %v3623_v54 = vpop.f32.mrf.mxu0 }
0x149c   :  { %3866 = vtanh.f32 %v2715_v30  ;;  %v3396_v39 = vmul.f32 -1.442695, %v2715_v30 }
0x14a9   :  { %v3867_v2 = vpop.eup %3866  ;;  %v2933_v10 = vpop.f32.mrf.mxu0 }
0x14aa   :  { %v2938_v19 = vadd.f32 %v2933_v10, %v297_v47  ;;  %2727 = vrot.lane.b32.xlu0 %v3867_v2, %s4075_s25 }
0x14ab   :  { %v2935_v49 = vpop.f32.mrf.mxu0 }
0x14ac   :  { %3868 = vtanh.f32 %v2938_v19  ;;  %v3401_v35 = vmul.f32 -1.442695, %v2938_v19  ;;  %v2963_v60 = vadd.f32 %v3976_v59, %v2935_v49 }
0x14ad   :  { %3870 = vpow2.f32 %v3396_v39 }
0x14ae   :  { %3872 = vpow2.f32 %v3401_v35  ;;  %v2964_v51 = vadd.f32 %v2963_v60, %v299_v50 }
0x14b0   :  { %v3402_v44 = vmul.f32 -1.442695, %v2964_v51 }
0x14b9   :  { %v3869_v43 = vpop.eup %3868 }
0x14ba   :  { %2948 = vrot.lane.b32.xlu1 %v3869_v43, %s4075_s25  ;;  %v3871_v53 = vpop.eup %3870 }
0x14bb   :  { %v2721_v20 = vadd.f32 1.0, %v3871_v53  ;;  %v3873_v13 = vpop.eup %3872 }
0x14bc   :  { %v2942_v23 = vadd.f32 1.0, %v3873_v13 }
0x14bd   :  { %3874 = vrcp.f32 %v2721_v20 }
0x14be   :  { %3876 = vrcp.f32 %v2942_v23 }
0x14bf   :  { %3878 = vpow2.f32 %v3402_v44 }
0x14c3   :  { %v2490_v15 = vpop.permute.xlu0 %2489 }
0x14c4   :  { %v2492_v17 = vmul.f32 %v2490_v15, %v2487_v26 }
0x14c6   :  { %v5339_v48 = vadd.f32 %v2493_v1, %v2492_v17 }
0x14c8   :  { %v2746_v63 = vsel %vm474_vm9, %v2744_v34, %v5339_v48 }
0x14c9   :  { %3397 = vmatmul.mubr.msk.f32.vlgmr.msra.gmra.mxu1 %vm336_vm10, %v2746_v63 }
0x14ca   :  { %3625 = vmatpush3.msra.mxu1 %v3968_v3  ;;  %3640 = vmatprep.mubr.msk.f32.mxu1 %vm4077_vm2, %v5515_v46  ;;  %v3875_v31 = vpop.eup %3874 }
0x14cb   :  { %3626 = vmatprep.subr.mxu1 %v5515_v46  ;;  %v3877_v61 = vpop.eup %3876  ;;  %v2725_v42 = vmul.f32 %v3875_v31, %v5230_v4 }
0x14cc   :  { %3627 = vmatpush3.msra.mxu1 %v3969_v36  ;;  %v3879_v52 = vpop.eup %3878  ;;  %v2946_v25 = vmul.f32 %v3877_v61, %v5235_v38 }
0x14cd   :  { %3628 = vmatprep.subr.mxu1 %v5515_v46  ;;  %v2968_v5 = vadd.f32 1.0, %v3879_v52 }
0x14ce   :  { %3629 = vmatpush3.msra.mxu1 %v3970_v22 }
0x14cf   :  { %3630 = vmatprep.subr.mxu1 %v5515_v46  ;;  %3880 = vrcp.f32 %v2968_v5 }
0x14d0   :  { %3631 = vmatpush3.msra.mxu1 %v3971_v55 }
0x14d1   :  { %3632 = vmatprep.subr.mxu1 %v5515_v46 }
0x14d2   :  { %3633 = vmatpush3.msra.mxu1 %v3972_v62 }
0x14d3   :  { %3634 = vmatprep.subr.mxu1 %v5515_v46 }
0x14d4   :  { %3635 = vmatpush3.msra.mxu1 %v3973_v11 }
0x14d5   :  { %3636 = vmatprep.subr.mxu1 %v5515_v46 }
0x14d6   :  { %3637 = vmatpush3.msra.mxu1 %v3974_v37 }
0x14d7   :  { %3638 = vmatprep.subr.mxu1 %v5515_v46 }
0x14d8   :  { %3639 = vmatpush3.msra.mxu1 %v3975_v16 }
0x14d9   :  { %3643 = vmatprep.subr.mxu1 %v5515_v46 }
0x14dc   :  { %v3881_v0 = vpop.eup %3880 }
0x14dd   :  { %v2982_v39 = vsub.f32 1.0, %v3881_v0  ;;  %v2988_v53 = vmul.f32 %v3881_v0, %v5272_v28  ;;  %v3977_v28 = vld [vmem:[%s5489_s7] ss:$0 sm:$0xff] }
0x151c   :  { %v2728_v12 = vpop.permute.xlu0 %2727 }
0x151d   :  { %v2730_v29 = vmul.f32 %v3875_v31, %v2728_v12 }
0x151f   :  { %2732 = vrot.lane.b32.xlu0 %v2730_v29, %s4075_s25 }
0x1523   :  { %2972 = vrot.lane.b32.xlu0 %v2963_v60, %s4074_s23 }
0x152c   :  { %v2949_v7 = vpop.permute.xlu1 %2948 }
0x152d   :  { %v2951_v18 = vmul.f32 %v3877_v61, %v2949_v7 }
0x152f   :  { %2953 = vrot.lane.b32.xlu1 %v2951_v18, %s4075_s25 }
0x1589   :  { %v2816_v32 = vpop.f32.mrf.mxu1 }
0x158a   :  { %v2821_v4 = vadd.f32 %v5138_v14, %v2816_v32  ;;  %v317_v32 = vld [vmem:[%s5483_s1] sm:$0xff] }
0x158b   :  { %v2818_v56 = vpop.f32.mrf.mxu1  ;;  %vm725_vm11 = vcmp.eq.s32.totalorder %v317_v32, 0  ;;  %vm1079_vm12 = vcmp.eq.s32.totalorder %v317_v32, 1  ;;  %vm1787_vm13 = vcmp.eq.s32.totalorder %v317_v32, 3  ;;  %vm2495_vm14 = vcmp.eq.s32.totalorder %v317_v32, 5 }
0x158c   :  { %v2822_v41 = vadd.f32 %v5129_v21, %v2818_v56  ;;  %vm3203_vm15 = vcmp.eq.s32.totalorder %v317_v32, 7  ;;  %vm1433_vm0 = vcmp.eq.s32.totalorder %v317_v32, 2  ;;  %vm2141_vm1 = vcmp.eq.s32.totalorder %v317_v32, 4 }
0x158e   :  { %2831 = vrot.lane.b32.xlu1 %v2822_v41, %s4074_s23  ;;  %v2823_v47 = vadd.f32 %v2822_v41, %v2821_v4 }
0x1590   :  { %v3398_v2 = vmul.f32 -1.442695, %v2823_v47 }
0x1591   :  { %v2733_v58 = vpop.permute.xlu0 %2732 }
0x1592   :  { %v5365_v8 = vadd.f32 %v2733_v58, %v2725_v42  ;;  %v3351_v58 = vsel %vm725_vm11, 1.0, %v5515_v46 }
0x1594   :  { %3882 = vtanh.f32 %v5365_v8 }
0x1595   :  { %v2973_v6 = vpop.permute.xlu0 %2972 }
0x1596   :  { %v2975_v40 = vmul.f32 %v3881_v0, %v2973_v6  ;;  %v3359_v0 = vsel %vm1079_vm12, 1.0, %v5515_v46 }
0x1598   :  { %2977 = vrot.lane.b32.xlu0 %v2975_v40, %s4074_s23  ;;  %v3679_v40 = vpack.i.bf16 %v3359_v0, %v3351_v58 }
0x15a1   :  { %v3883_v33 = vpop.eup %3882  ;;  %v2954_v30 = vpop.permute.xlu1 %2953 }
0x15a2   :  { %v2956_v54 = vadd.f32 %v2954_v30, %v2946_v25  ;;  %2738 = vrot.lane.b32.xlu1 %v3883_v33, %s4075_s25  ;;  %v3391_v25 = vsel %vm2495_vm14, 1.0, %v5515_v46  ;;  %v3407_v33 = vsel %vm3203_vm15, 1.0, %v5515_v46 }
0x15a4   :  { %3884 = vtanh.f32 %v2956_v54 }
0x15a5   :  { %3886 = vpow2.f32 %v3398_v2 }
0x15b1   :  { %v3885_v57 = vpop.eup %3884 }
0x15b2   :  { %2959 = vrot.lane.b32.xlu0 %v3885_v57, %s4075_s25  ;;  %v3887_v10 = vpop.eup %3886 }
0x15b3   :  { %v2827_v19 = vadd.f32 1.0, %v3887_v10 }
0x15b5   :  { %3888 = vrcp.f32 %v2827_v19 }
0x15c2   :  { %v3889_v43 = vpop.eup %3888 }
0x15c3   :  { %v2847_v29 = vmul.f32 %v3889_v43, %v5339_v48 }
0x1600   :  { %v2832_v26 = vpop.permute.xlu1 %2831 }
0x1601   :  { %v2834_v38 = vmul.f32 %v3889_v43, %v2832_v26 }
0x1603   :  { %2836 = vrot.lane.b32.xlu1 %v2834_v38, %s4074_s23 }
0x160a   :  { %v2978_v17 = vpop.permute.xlu0 %2977 }
0x160b   :  { %v2980_v34 = vadd.f32 %v2978_v17, %v299_v50 }
0x160d   :  { %3890 = vtanh.f32 %v2980_v34 }
0x1614   :  { %v2739_v15 = vpop.permute.xlu1 %2738 }
0x1615   :  { %v5374_v1 = vmul.f32 %v3875_v31, %v2739_v15  ;;  %v2841_v31 = vsub.f32 1.0, %v3889_v43  ;;  %v3367_v43 = vsel %vm1433_vm0, 1.0, %v5515_v46  ;;  %v3383_v15 = vsel %vm2141_vm1, 1.0, %v5515_v46 }
0x1617   :  { %2995 = vrot.lane.b32.xlu1 %v5374_v1, %s4076_s20 }
0x161a   :  { %v3891_v36 = vpop.eup %3890 }
0x1624   :  { %v2960_v63 = vpop.permute.xlu0 %2959 }
0x1625   :  { %v2962_v3 = vmul.f32 %v3877_v61, %v2960_v63 }
0x1627   :  { %2991 = vrot.lane.b32.xlu0 %v2962_v3, %s4074_s23 }
0x162b   :  { %2984 = vrot.lane.b32.xlu0 %v3891_v36, %s4076_s20 }
0x1675   :  { %v2837_v22 = vpop.permute.xlu1 %2836 }
0x1676   :  { %v2839_v55 = vadd.f32 %v2837_v22, %v2821_v4  ;;  %v5533_v22 = vld [vmem:[#allocation25_spill] sm:$0xff] }
0x1678   :  { %3892 = vtanh.f32 %v2839_v55 }
0x1685   :  { %v3893_v62 = vpop.eup %3892 }
0x1686   :  { %2843 = vrot.lane.b32.xlu1 %v3893_v62, %s4076_s20  ;;  %v5534_v62 = vld [vmem:[#allocation24_spill] sm:$0xff] }
0x1689   :  { %v2996_v11 = vpop.permute.xlu1 %2995 }
0x1699   :  { %v2992_v37 = vpop.permute.xlu0 %2991 }
0x169a   :  { %v2998_v16 = vsel %vm474_vm9, %v2992_v37, %v2996_v11 }
0x169b   :  { %3641 = vmatmul.mubr.msk.f32.vlgmr.msra.gmra.mxu1 %vm336_vm10, %v2998_v16 }
0x169c   :  { %3659 = vmatprep.mubr.msk.f32.mxu1 %vm4077_vm2, %v5515_v46  ;;  %vm2849_vm2 = vcmp.eq.s32.totalorder %v317_v32, 6 }
0x169d   :  { %v2985_v35 = vpop.permute.xlu0 %2984  ;;  %v3399_v17 = vsel %vm2849_vm2, 1.0, %v5515_v46 }
0x169e   :  { %v2987_v20 = vmul.f32 %v2985_v35, %v2982_v39  ;;  %v3227_v39 = vld [vmem:[%s5493_s11 + $0x38] sm:$0xff]  ;;  %v3226_v35 = vld [vmem:[%s5493_s11 + $0x30] sm:$0xff] }
0x169f   :  { %3644 = vmatpush3.msra.mxu1 %v3227_v39 }
0x16a0   :  { %v2989_v13 = vadd.f32 %v2988_v53, %v2987_v20  ;;  %3645 = vmatprep.subr.mxu1 %v5515_v46  ;;  %v3225_v53 = vld [vmem:[%s5493_s11 + $0x28] sm:$0xff]  ;;  %v3224_v20 = vld [vmem:[%s5493_s11 + $0x20] sm:$0xff] }
0x16a1   :  { %3646 = vmatpush3.msra.mxu1 %v3226_v35 }
0x16a2   :  { %3097 = vrot.lane.b32.xlu0 %v2989_v13, %s4076_s20  ;;  %3647 = vmatprep.subr.mxu1 %v5515_v46  ;;  %v5535_v13 = vld [vmem:[#allocation23_spill] sm:$0xff] }
0x16a3   :  { %3648 = vmatpush3.msra.mxu1 %v3225_v53 }
0x16a4   :  { %3649 = vmatprep.subr.mxu1 %v5515_v46 }
0x16a5   :  { %3650 = vmatpush3.msra.mxu1 %v3224_v20 }
0x16a6   :  { %3651 = vmatprep.subr.mxu1 %v5515_v46 }
0x16f8   :  { %v2844_v23 = vpop.permute.xlu1 %2843 }
0x16f9   :  { %v2846_v12 = vmul.f32 %v2844_v23, %v2841_v31  ;;  %v5536_v31 = vld [vmem:[#allocation22_spill] sm:$0xff] }
0x16fb   :  { %v5388_v49 = vadd.f32 %v2847_v29, %v2846_v12 }
0x1714   :  { %v3098_v59 = vpop.permute.xlu0 %3097 }
0x1715   :  { %v3100_v60 = vsel %vm474_vm9, %v3098_v59, %v5388_v49  ;;  %v3223_v59 = vld [vmem:[%s5493_s11 + $0x18] sm:$0xff] }
0x1716   :  { %3405 = vmatmul.mubr.msk.f32.vlgmr.msra.gmra.mxu0 %vm336_vm10, %v3100_v60  ;;  %3652 = vmatpush3.msra.mxu1 %v3223_v59 }
0x1717   :  { %3653 = vmatprep.subr.mxu1 %v5515_v46 }
0x175b   :  { %v3068_v61 = vpop.f32.mrf.mxu1 }
0x175c   :  { %v3069_v7 = vadd.f32 %v3977_v28, %v3068_v61  ;;  %v3222_v61 = vld [vmem:[%s5493_s11 + $0x10] sm:$0xff] }
0x175d   :  { %v3642_v18 = vpop.f32.mrf.mxu1  ;;  %3654 = vmatpush3.msra.mxu1 %v3222_v61 }
0x175e   :  { %3894 = vtanh.f32 %v3069_v7  ;;  %v3404_v50 = vmul.f32 -1.442695, %v3069_v7  ;;  %v5537_v7 = vld [vmem:[#allocation13_spill] sm:$0xff]  ;;  %3655 = vmatprep.subr.mxu1 %v5515_v46 }
0x1760   :  { %3896 = vpow2.f32 %v3404_v50 }
0x176b   :  { %v3895_v45 = vpop.eup %3894 }
0x176c   :  { %3081 = vrot.lane.b32.xlu1 %v3895_v45, %s4075_s25  ;;  %v5538_v45 = vld [vmem:[#allocation14_spill] sm:$0xff] }
0x176d   :  { %v3897_v51 = vpop.eup %3896 }
0x176e   :  { %v3075_v44 = vadd.f32 1.0, %v3897_v51  ;;  %v3221_v51 = vld [vmem:[%s5493_s11 + $0x8] sm:$0xff] }
0x176f   :  { %3656 = vmatpush3.msra.mxu1 %v3221_v51 }
0x1770   :  { %3898 = vrcp.f32 %v3075_v44  ;;  %3657 = vmatprep.subr.mxu1 %v5515_v46 }
0x177d   :  { %v5402_v41 = vpop.eup %3898 }
0x177e   :  { %v3079_v26 = vmul.f32 %v5402_v41, %v5365_v8 }
0x17d6   :  { %v3170_v52 = vpop.f32.mrf.mxu0 }
0x17d7   :  { %v3175_v30 = vadd.f32 %v5138_v14, %v3170_v52  ;;  %v5539_v52 = vld [vmem:[#allocation15_spill] sm:$0xff] }
0x17d8   :  { %v3172_v5 = vpop.f32.mrf.mxu0 }
0x17d9   :  { %v3176_v56 = vadd.f32 %v5129_v21, %v3172_v5  ;;  %v3375_v21 = vsel %vm1787_vm13, 1.0, %v5515_v46 }
0x17db   :  { %3185 = vrot.lane.b32.xlu0 %v3176_v56, %s4074_s23  ;;  %v3177_v54 = vadd.f32 %v3176_v56, %v3175_v30 }
0x17dd   :  { %v3406_v57 = vmul.f32 -1.442695, %v3177_v54 }
0x17de   :  { %v3082_v42 = vpop.permute.xlu1 %3081 }
0x17df   :  { %v3084_v6 = vmul.f32 %v5402_v41, %v3082_v42  ;;  %3900 = vpow2.f32 %v3406_v57 }
0x17e1   :  { %3086 = vrot.lane.b32.xlu1 %v3084_v6, %s4075_s25 }
0x17e5   :  { %3680 = vperm.xlu1 %3678, %v3679_v40  }
0x17e9   :  { %1792 = vperm.xlu1 %3678, %v3375_v21   ;;  %v5540_v21 = vld [vmem:[#allocation16_spill] sm:$0xff] }
0x17ec   :  { %v3901_v4 = vpop.eup %3900 }
0x17ed   :  { %2500 = vperm.xlu1 %3678, %v3391_v25   ;;  %v3181_v47 = vadd.f32 1.0, %v3901_v4 }
0x17ef   :  { %3902 = vrcp.f32 %v3181_v47 }
0x17f1   :  { %3208 = vperm.xlu1 %3678, %v3407_v33  }
0x17fc   :  { %v5412_v2 = vpop.eup %3902 }
0x184d   :  { %v3186_v10 = vpop.permute.xlu0 %3185 }
0x184e   :  { %v3188_v19 = vmul.f32 %v5412_v2, %v3186_v10 }
0x1850   :  { %3190 = vrot.lane.b32.xlu0 %v3188_v19, %s4074_s23 }
0x1853   :  { %v3087_v14 = vpop.permute.xlu1 %3086 }
0x1854   :  { %v3089_v38 = vadd.f32 %v3087_v14, %v3079_v26  ;;  %1438 = vperm.xlu0 %3677, %v3367_v43  }
0x1856   :  { %3904 = vtanh.f32 %v3089_v38 }
0x1858   :  { %2146 = vperm.xlu0 %3677, %v3383_v15  }
0x185c   :  { %2854 = vperm.xlu0 %3677, %v3399_v17  }
0x1860   :  { %v3681_v34 = vpop.permute.xlu1 %3680 }
0x1861   :  { %v3683_v63 = vunpack.i.h.bf16 %v3681_v34  ;;  %v3682_v3 = vunpack.i.l.bf16 %v3681_v34  ;;  %v3195_v34 = vsub.f32 1.0, %v5412_v2 }
0x1863   :  { %v3905_v36 = vpop.eup %3904  ;;  %v1089_v55 = vmul.f32 %v3683_v63, %v5533_v22  ;;  %v735_v8 = vmul.f32 %v3682_v3, %v5534_v62  ;;  %v1087_v23 = vmul.f32 %v3683_v63, %v5535_v13  ;;  %v733_v12 = vmul.f32 %v3682_v3, %v5536_v31 }
0x1864   :  { %3092 = vrot.lane.b32.xlu0 %v3905_v36, %s4075_s25  ;;  %v1793_v29 = vpop.permute.xlu1 %1792  ;;  %v3201_v3 = vmul.f32 %v5412_v2, %v5388_v49 }
0x1865   :  { %v1090_v11 = vadd.f32 %v1089_v55, %v735_v8  ;;  %v1088_v28 = vadd.f32 %v1087_v23, %v733_v12  ;;  %v1795_v5 = vmul.f32 %v1793_v29, %v5539_v52  ;;  %v1797_v32 = vmul.f32 %v1793_v29, %v5085_v27  ;;  %v3220_v27 = vld [vmem:[%s5493_s11] sm:$0xff] }
0x1866   :  { %3658 = vmatpush3.msra.mxu1 %v3220_v27 }
0x1868   :  { %v2501_v58 = vpop.permute.xlu1 %2500 }
0x1869   :  { %v2503_v47 = vmul.f32 %v2501_v58, %v5240_v9 }
0x186c   :  { %v3209_v38 = vpop.permute.xlu1 %3208 }
0x18c2   :  { %v3191_v37 = vpop.permute.xlu0 %3190 }
0x18c3   :  { %v3193_v16 = vadd.f32 %v3191_v37, %v3175_v30  ;;  %v2505_v30 = vmul.f32 %v2501_v58, %v5339_v48 }
0x18c5   :  { %3906 = vtanh.f32 %v3193_v16 }
0x18cf   :  { %v1439_v60 = vpop.permute.xlu0 %1438 }
0x18d0   :  { %v1441_v18 = vmul.f32 %v1439_v60, %v5537_v7  ;;  %v1443_v50 = vmul.f32 %v1439_v60, %v5538_v45 }
0x18d2   :  { %v3907_v44 = vpop.eup %3906  ;;  %v1442_v56 = vadd.f32 %v1441_v18, %v1088_v28  ;;  %v1444_v42 = vadd.f32 %v1443_v50, %v1090_v11 }
0x18d3   :  { %v2147_v0 = vpop.permute.xlu0 %2146  ;;  %3197 = vrot.lane.b32.xlu1 %v3907_v44, %s4076_s20 }
0x18d4   :  { %v1796_v6 = vadd.f32 %v1795_v5, %v1442_v56  ;;  %v1798_v40 = vadd.f32 %v1797_v32, %v1444_v42  ;;  %v2149_v25 = vmul.f32 %v2147_v0, %v5540_v21  ;;  %v2151_v33 = vmul.f32 %v2147_v0, %v5198_v24 }
0x18d6   :  { %v2150_v54 = vadd.f32 %v2149_v25, %v1796_v6  ;;  %v2152_v57 = vadd.f32 %v2151_v33, %v1798_v40 }
0x18d7   :  { %v2855_v4 = vpop.permute.xlu0 %2854 }
0x18d8   :  { %v2506_v10 = vadd.f32 %v2505_v30, %v2152_v57  ;;  %v2859_v19 = vmul.f32 %v2855_v4, %v5388_v49  ;;  %v2504_v43 = vadd.f32 %v2503_v47, %v2150_v54  ;;  %v2857_v24 = vmul.f32 %v2855_v4, %v5374_v1 }
0x18da   :  { %v2860_v26 = vadd.f32 %v2859_v19, %v2506_v10  ;;  %v2858_v15 = vadd.f32 %v2857_v24, %v2504_v43 }
0x18db   :  { %v3093_v46 = vpop.permute.xlu0 %3092 }
0x18dc   :  { %v3095_v14 = vmul.f32 %v5402_v41, %v3093_v46  ;;  %v3408_v41 = vld [vmem:[%s5494_s12] ss:$0 sm:$0xff] }
0x18de   :  { %v3211_v17 = vmul.f32 %v3209_v38, %v3095_v14 }
0x18e0   :  { %v3212_v48 = vadd.f32 %v3211_v17, %v2858_v15 }
0x18e2   :  { %3216 = vrot.lane.b32.xlu0 %v3212_v48, %s4074_s23  ;;  %s4078_s23 = smov [#allocation9]  }
0x18e3   :  { %s3315_s14 = sshll.u32 %s4078_s23, 4  ;;  %s3316_s14 = int_to_ptr.vmem [resolvable:$true] %s3315_s14 }
0x18e4   :  { %s4038_s15 = scalar_lea.vmem %s3316_s14, 128  ;;  %p4043_p2 = scmp.lt.s32.totalorder %s3316_s14, %s3316_s14 }
0x18e5   :  { %p4039_p1 = scmp.ne.s32.totalorder %s3316_s14, %s4038_s15  ;;  %p4044_p3 = scmp.lt.s32.totalorder %s4038_s15, %s4038_s15 }
0x18e7   :  { %p4045_p4 = por %p4044_p3, %p4043_p2 }
0x18e9   :  { %p4046_p5 = pnand %p4045_p4, %p4039_p1 }
0x1945   :  { %v3198_v63 = vpop.permute.xlu1 %3197 }
0x1946   :  { %v3200_v9 = vmul.f32 %v3198_v63, %v3195_v34 }
0x1948   :  { %v3202_v36 = vadd.f32 %v3201_v3, %v3200_v9 }
0x194a   :  { %v3213_v22 = vmul.f32 %v3209_v38, %v3202_v36 }
0x194c   :  { %v3214_v1 = vadd.f32 %v3213_v22, %v2860_v26 }
0x1954   :  { %v3217_v55 = vpop.permute.xlu0 %3216 }
0x1955   :  { %v3219_v62 = vsel %vm474_vm9, %v3217_v55, %v3214_v1 }
0x1956   :  { %3660 = vmatmul.mubr.msk.f32.vlgmr.msra.gmra.mxu1 %vm336_vm10, %v3219_v62 }
0x1a16   :  { %v3304_v8 = vpop.f32.mrf.mxu1 }
0x1a17   :  { %v3305_v11 = vadd.f32 %v3408_v41, %v3304_v8 }
0x1a18   :  { %v3661_v37 = vpop.f32.mrf.mxu1 }
0x1a19   :  { %3308 = vst.msk [vmem:[#allocation9] sm:$0xff] %vm474_vm9, %v3305_v11 }
0x1a1a   :  { %4049 = shalt.err (!%p4046_p5)
}
0x1a1b   :  { %3318 = dma.vmem_to_hbm [thread:$0]  %s3316_s14, 128, %s5495_s13, [#allocation5]  }
0x1a1c   :  { %4062 = dma.done.wait [#allocation5], 128  }
0x1a1d   :  { %4063 = vsyncadd [#allocation5], 4294967168 }
0x1a1e   :  { %3322 = vsyncpa [#allocation4], 1 }
0x1a1f   :  { %3323 = vsyncpa [#allocation7], 1 }
0x1a20   :  { %3324 = vsyncpa [#allocation5], 1 }

</bundles_post_ra>
